<compile_context>
chip_gen: v6e
topology: v6e:2x2x1
jax: 0.10.0
libtpu: 0.0.40
codegen_flags: <defaults>
</compile_context>

<pallas_src>
import functools

import jax
import jax.numpy as jnp
import numpy as np
from jax.experimental import pallas as pl
from jax.experimental.pallas import tpu as pltpu


# ----------------------------------------------------------------------------
# helpers
# ----------------------------------------------------------------------------
def make_divisible(value, divisor, min_value=None, round_down_protect=True):
    if min_value is None:
        min_value = divisor
    new_value = max(min_value, int(value + divisor / 2) // divisor * divisor)
    if round_down_protect and new_value < 0.9 * value:
        new_value += divisor
    return int(new_value)


# ----------------------------------------------------------------------------
# fused kernel (one grid step == one batch element), layout (channels, H*W)
# ----------------------------------------------------------------------------
def _uib_kernel(x_ref, prm_ref, out_ref, *, H, W, C, k1, k2a, k2b,
                residual, off):
    HW = H * W
    C2 = 2 * C

    def P(name):
        c0, r, cw = off[name]
        return prm_ref[0:r, c0:c0 + cw]          # small one-time VMEM loads

    xf = x_ref[0]                                 # (Cin, HW) f32

    # flat spatial index -> (row, col) index vectors, computed once
    idx = jax.lax.broadcasted_iota(jnp.int32, (1, HW), 1)
    if (W & (W - 1)) == 0:
        i_idx = jnp.right_shift(idx, W.bit_length() - 1)
        j_idx = jnp.bitwise_and(idx, W - 1)
    else:  # fallback (not used by the example); div-by-constant is slower
        i_idx = idx // W
        j_idx = idx - i_idx * W

    def dw_conv(xin, k, w_a, b_a, w_b=None, b_b=None, relu=False):
        """Depthwise k x k conv(s), stride 1, 'same' zero padding, + bias.

        xin: (c, HW).  Spatial taps are lane rotations of the flat HW axis;
        image-edge taps are killed with row/column masks (the row mask also
        kills every wrap-around element, so the rotation is exact).  When a
        second weight set is given, both convolutions share the shifted and
        masked tap tiles (used for the two branches' start-dw over the same
        input).
        """
        p = (k - 1) // 2
        jms = [None if dj == 0 else
               jnp.logical_and(j_idx >= -dj, j_idx < W - dj)
               for dj in range(-p, p + 1)]
        acc_a = acc_b = None
        t = 0
        for di in range(-p, p + 1):
            im = (None if di == 0 else
                  jnp.logical_and(i_idx >= -di, i_idx < H - di))
            for dj in range(-p, p + 1):
                jm = jms[dj + p]
                offp = di * W + dj
                s = xin if offp == 0 else pltpu.roll(
                    xin, shift=(-offp) % HW, axis=1)
                if im is not None or jm is not None:
                    m = (im if jm is None else
                         jm if im is None else jnp.logical_and(im, jm))
                    s = s * jnp.where(m, 1.0, 0.0)
                ta = s * w_a[:, t:t + 1]
                acc_a = ta if acc_a is None else acc_a + ta
                if w_b is not None:
                    tb = s * w_b[:, t:t + 1]
                    acc_b = tb if acc_b is None else acc_b + tb
                t += 1
        acc_a = acc_a + b_a
        if relu:
            acc_a = jnp.maximum(acc_a, 0.0)
        if w_b is None:
            return acc_a
        acc_b = acc_b + b_b
        if relu:
            acc_b = jnp.maximum(acc_b, 0.0)
        return acc_a, acc_b

    def pw_conv(xin, w, b, relu):
        y = jnp.dot(w, xin, preferred_element_type=jnp.float32) + b
        return jnp.maximum(y, 0.0) if relu else y

    # --- start dw (act=False); one shared tap loop for both branches --------
    h1, h2 = dw_conv(xf, k1, P('b1_dw1_w'), P('b1_dw1_b'),
                     P('b2_dw1_w'), P('b2_dw1_b'), relu=False)

    # --- branch 1: expand 1x1 -> middle dw -> proj 1x1 (BN / LS folded) -----
    e1 = pw_conv(h1, P('b1_exp_w'), P('b1_exp_b'), relu=True)
    e1 = dw_conv(e1, k2a, P('b1_dw2_w'), P('b1_dw2_b'), relu=True)
    o1 = pw_conv(e1, P('b1_prj_w'), P('b1_prj_b'), relu=False)

    # --- branch 2 (larger middle kernel) -------------------------------------
    e2 = pw_conv(h2, P('b2_exp_w'), P('b2_exp_b'), relu=True)
    e2 = dw_conv(e2, k2b, P('b2_dw2_w'), P('b2_dw2_b'), relu=True)
    o2 = pw_conv(e2, P('b2_prj_w'), P('b2_prj_b'), relu=False)

    # --- channel self-attention: global pool + LN + len-1 MHA + sigmoid -----
    inv_hw = 1.0 / HW
    p1 = jnp.sum(o1, axis=1, keepdims=True) * inv_hw           # (C, 1)
    p2 = jnp.sum(o2, axis=1, keepdims=True) * inv_hw           # (C, 1)
    inv_c2 = 1.0 / C2
    mu = (jnp.sum(p1, axis=0, keepdims=True)
          + jnp.sum(p2, axis=0, keepdims=True)) * inv_c2       # (1, 1)
    d1 = p1 - mu
    d2 = p2 - mu
    var = (jnp.sum(d1 * d1, axis=0, keepdims=True)
           + jnp.sum(d2 * d2, axis=0, keepdims=True)) * inv_c2  # two-pass LN
    rstd = jax.lax.rsqrt(var + 1e-5)
    lnw, lnb = P('ln_w'), P('ln_b')                              # (2C, 1)
    xn1 = d1 * rstd * lnw[0:C, :] + lnb[0:C, :]
    xn2 = d2 * rstd * lnw[C:C2, :] + lnb[C:C2, :]
    # len-1 sequence MHA: softmax over a single key == 1, so the result is
    # exactly out_proj(V(LN(x))); Q/K projections do not matter.
    wv = P('wv')
    v = (jnp.dot(wv[:, 0:C], xn1, preferred_element_type=jnp.float32)
         + jnp.dot(wv[:, C:C2], xn2, preferred_element_type=jnp.float32)
         + P('bv'))
    ao = jnp.dot(P('wo'), v, preferred_element_type=jnp.float32) + P('bo')
    att = jax.nn.sigmoid(
        jnp.dot(P('wp'), ao, preferred_element_type=jnp.float32) + P('bp'))

    y = o1 * att[0:C, :] + o2 * att[C:C2, :]
    if residual:
        y = y + xf
    out_ref[0] = y.astype(out_ref.dtype)


# ----------------------------------------------------------------------------
# wrapper: (B, C, H, W) -> (B, C, H, W), reshape-only I/O (no transposes)
# ----------------------------------------------------------------------------
def uib_forward(x_nchw, packed, off, *, start_k, middle_k, use_res_connect):
    B, Cin, H, W = x_nchw.shape
    HW = H * W
    Cout = off['b1_prj_b'][1]
    k2b = min(middle_k + 2, 7)
    R, TOT = packed.shape
    if use_res_connect:
        assert Cin == Cout, "residual requires inp == oup (and stride == 1)"

    xb = x_nchw.reshape(B, Cin, HW).astype(jnp.float32)     # no transpose

    kernel = functools.partial(
        _uib_kernel, H=H, W=W, C=Cout, k1=start_k, k2a=middle_k, k2b=k2b,
        residual=use_res_connect, off=off)

    out = pl.pallas_call(
        kernel,
        out_shape=jax.ShapeDtypeStruct((B, Cout, HW), jnp.float32),
        grid=(B,),
        in_specs=[pl.BlockSpec((1, Cin, HW), lambda b: (b, 0, 0)),
                  pl.BlockSpec((R, TOT), lambda b: (0, 0))],   # params: 1 DMA
        out_specs=pl.BlockSpec((1, Cout, HW), lambda b: (b, 0, 0)),
        compiler_params=pltpu.CompilerParams(
            dimension_semantics=("parallel",)),
    )(xb, packed)

    return out.reshape(B, Cout, H, W)


# ----------------------------------------------------------------------------
# parameter preparation: fold inference BN + LayerScale, pack into one buffer
# ----------------------------------------------------------------------------
def _fold_bn(gamma, beta, mean, var, eps=1e-5):
    s = gamma / jnp.sqrt(var + eps)
    return s, beta - mean * s


def prepare_params(raw, inp, oup, expand, start_k, middle_k):
    """Returns (packed (R, TOT) f32 buffer, {name: (col, rows, cols)})."""
    k2b = min(middle_k + 2, 7)
    entries = []

    def add_branch(tag, p, kmid):
        s, b = _fold_bn(*p['bn1'])
        entries.append((tag + '_dw1_w',
                        (p['dw1_w'] * s[:, None, None]).reshape(inp, start_k * start_k)))
        entries.append((tag + '_dw1_b', b.reshape(inp, 1)))
        s, b = _fold_bn(*p['bn2'])
        entries.append((tag + '_exp_w', p['exp_w'] * s[:, None]))
        entries.append((tag + '_exp_b', b.reshape(expand, 1)))
        s, b = _fold_bn(*p['bn3'])
        entries.append((tag + '_dw2_w',
                        (p['dw2_w'] * s[:, None, None]).reshape(expand, kmid * kmid)))
        entries.append((tag + '_dw2_b', b.reshape(expand, 1)))
        s, b = _fold_bn(*p['bn4'])
        ls = p['ls'] if p['ls'] is not None else jnp.ones((oup,), jnp.float32)
        entries.append((tag + '_prj_w', p['prj_w'] * (s * ls)[:, None]))
        entries.append((tag + '_prj_b', (b * ls).reshape(oup, 1)))

    add_branch('b1', raw['branch1'], middle_k)
    add_branch('b2', raw['branch2'], k2b)

    a = raw['attn']
    c2 = 2 * oup
    entries += [
        ('ln_w', a['ln_w'].reshape(c2, 1)),
        ('ln_b', a['ln_b'].reshape(c2, 1)),
        ('wv', a['in_proj_w'][2 * c2:3 * c2, :]),   # only V matters for len-1 seq
        ('bv', a['in_proj_b'][2 * c2:].reshape(c2, 1)),
        ('wo', a['out_w']),
        ('bo', a['out_b'].reshape(c2, 1)),
        ('wp', a['proj_w']),
        ('bp', a['proj_b'].reshape(c2, 1)),
    ]

    rows_max = max(arr.shape[0] for _, arr in entries)
    blocks, off, col = [], {}, 0
    for name, arr in entries:
        r, c = arr.shape
        blocks.append(jnp.zeros((rows_max, c), jnp.float32)
                      .at[:r, :].set(arr.astype(jnp.float32)))
        off[name] = (col, r, c)
        col += c
    return jnp.concatenate(blocks, axis=1), off


# ----------------------------------------------------------------------------
# deterministic synthetic "PyTorch" parameters (raw conv weights + BN stats)
# ----------------------------------------------------------------------------
def _bn_stats(key, c):
    kg, kb, km, kv = jax.random.split(key, 4)
    return (1.0 + 0.1 * jax.random.normal(kg, (c,), jnp.float32),
            0.1 * jax.random.normal(kb, (c,), jnp.float32),
            0.1 * jax.random.normal(km, (c,), jnp.float32),
            1.0 + 0.1 * jnp.abs(jax.random.normal(kv, (c,), jnp.float32)))


def make_raw_params(key, inp, oup, start_k, middle_k, expand_ratio,
                    use_layer_scale=True):
    expand = make_divisible(inp * expand_ratio, 8)
    k2b = min(middle_k + 2, 7)
    ls_init = 1e-5 if use_layer_scale else None

    def branch(bkey, kmid):
        ks = jax.random.split(bkey, 8)
        return dict(
            dw1_w=0.1 * jax.random.normal(ks[0], (inp, start_k, start_k), jnp.float32),
            bn1=_bn_stats(ks[1], inp),
            exp_w=0.1 * jax.random.normal(ks[2], (expand, inp), jnp.float32),
            bn2=_bn_stats(ks[3], expand),
            dw2_w=0.1 * jax.random.normal(ks[4], (expand, kmid, kmid), jnp.float32),
            bn3=_bn_stats(ks[5], expand),
            prj_w=0.1 * jax.random.normal(ks[6], (oup, expand), jnp.float32),
            bn4=_bn_stats(ks[7], oup),
            ls=(ls_init * jnp.ones((oup,), jnp.float32)) if ls_init is not None else None,
        )

    c2 = 2 * oup
    kb1, kb2, ka = jax.random.split(key, 3)
    ks = jax.random.split(ka, 8)
    attn = dict(
        ln_w=1.0 + 0.1 * jax.random.normal(ks[0], (c2,), jnp.float32),
        ln_b=0.1 * jax.random.normal(ks[1], (c2,), jnp.float32),
        in_proj_w=0.1 * jax.random.normal(ks[2], (3 * c2, c2), jnp.float32),
        in_proj_b=0.1 * jax.random.normal(ks[3], (3 * c2,), jnp.float32),
        out_w=0.1 * jax.random.normal(ks[4], (c2, c2), jnp.float32),
        out_b=0.1 * jax.random.normal(ks[5], (c2,), jnp.float32),
        proj_w=0.1 * jax.random.normal(ks[6], (c2, c2), jnp.float32),
        proj_b=0.1 * jax.random.normal(ks[7], (c2,), jnp.float32),
    )
    return dict(branch1=branch(kb1, middle_k), branch2=branch(kb2, k2b),
                attn=attn), expand


# ----------------------------------------------------------------------------
# pure-JAX reference of the PyTorch module (for numerical validation)
# ----------------------------------------------------------------------------
_HI = jax.lax.Precision.HIGHEST


def _bn_ref(x, stats, eps=1e-5):
    g, b, m, v = stats
    s = g / jnp.sqrt(v + eps)
    return x * s[None, :, None, None] + (b - m * s)[None, :, None, None]


def _dw_conv_ref(x, w):
    k = w.shape[-1]
    p = (k - 1) // 2
    return jax.lax.conv_general_dilated(
        x, w[:, None, :, :], window_strides=(1, 1), padding=[(p, p), (p, p)],
        dimension_numbers=('NCHW', 'OIHW', 'NCHW'),
        feature_group_count=x.shape[1], precision=_HI)


def _branch_ref(x, p):
    h = _bn_ref(_dw_conv_ref(x, p['dw1_w']), p['bn1'])                       # act=False
    h = jax.nn.relu(_bn_ref(jnp.einsum('bchw,oc->bohw', h, p['exp_w'],
                                       precision=_HI), p['bn2']))
    h = jax.nn.relu(_bn_ref(_dw_conv_ref(h, p['dw2_w']), p['bn3']))
    h = _bn_ref(jnp.einsum('bchw,oc->bohw', h, p['prj_w'],
                           precision=_HI), p['bn4'])                          # act=False
    if p['ls'] is not None:
        h = h * p['ls'][None, :, None, None]
    return h


def uib_reference(x, raw, use_res_connect):
    o1 = _branch_ref(x, raw['branch1'])
    o2 = _branch_ref(x, raw['branch2'])
    a = raw['attn']
    c2 = o1.shape[1] + o2.shape[1]
    pooled = jnp.concatenate([jnp.mean(o1, axis=(2, 3)),
                              jnp.mean(o2, axis=(2, 3))], axis=1)            # (B, 2C)
    mu = jnp.mean(pooled, axis=-1, keepdims=True)
    var = jnp.mean((pooled - mu) ** 2, axis=-1, keepdims=True)
    normed = (pooled - mu) / jnp.sqrt(var + 1e-5) * a['ln_w'] + a['ln_b']
    wv = a['in_proj_w'][2 * c2:3 * c2]
    bv = a['in_proj_b'][2 * c2:]
    v = jnp.dot(normed, wv.T, precision=_HI) + bv                            # len-1 MHA
    ao = jnp.dot(v, a['out_w'].T, precision=_HI) + a['out_b']
    att = jax.nn.sigmoid(jnp.dot(ao, a['proj_w'].T, precision=_HI) + a['proj_b'])
    c = c2 // 2
    y = o1 * att[:, :c, None, None] + o2 * att[:, c:, None, None]
    return y + x if use_res_connect else y


# ----------------------------------------------------------------------------
if __name__ == "__main__":
    # UniversalInvertedBottleneckBlock(inp=4, oup=4, start_dw_kernel_size=3,
    #   middle_dw_kernel_size=3, middle_dw_downsample=True, stride=1,
    #   expand_ratio=4.0, use_layer_scale=True, use_multi_branch=True)
    inp, oup = 4, 4
    start_k, middle_k = 3, 3
    expand_ratio = 4.0
    stride = 1
    B, H, W = 2, 16, 16
    use_res_connect = (inp == oup) and (stride == 1)

    key = jax.random.PRNGKey(0)
    kx, kp = jax.random.split(key)
    x = jax.random.normal(kx, (B, inp, H, W), jnp.float32)
    raw, expand = make_raw_params(kp, inp, oup, start_k, middle_k, expand_ratio,
                                  use_layer_scale=True)

    # --- the spec configuration (use_layer_scale=True) ----------------------
    packed, off = prepare_params(raw, inp, oup, expand, start_k, middle_k)
    out = uib_forward(x, packed, off, start_k=start_k, middle_k=middle_k,
                      use_res_connect=use_res_connect)
    out = jax.block_until_ready(out)
    assert out.shape == (B, oup, H, W), out.shape
    assert bool(jnp.isfinite(out).all())
    ref = uib_reference(x, raw, use_res_connect)
    np.testing.assert_allclose(np.asarray(out), np.asarray(ref),
                               atol=1e-4, rtol=0.0)

    # --- same kernel without LayerScale (stronger numerical check: branch
    #     outputs are O(1) instead of O(1e-5), so conv/attention errors are
    #     not hidden behind the residual) -------------------------------------
    raw_nols = dict(branch1=dict(raw['branch1'], ls=None),
                    branch2=dict(raw['branch2'], ls=None),
                    attn=raw['attn'])
    packed2, off2 = prepare_params(raw_nols, inp, oup, expand, start_k, middle_k)
    out2 = uib_forward(x, packed2, off2, start_k=start_k, middle_k=middle_k,
                       use_res_connect=use_res_connect)
    out2 = jax.block_until_ready(out2)
    ref2 = uib_reference(x, raw_nols, use_res_connect)
    np.testing.assert_allclose(np.asarray(out2), np.asarray(ref2),
                               atol=5e-3, rtol=0.0)

    print("KERNEL_OK")
</pallas_src>

<mosaic_0001>
module attributes {stable_mosaic.version = 11 : i64} {
  func.func @_uib_kernel(%arg0: i32, %arg1: memref<1x4x256xf32, #tpu.memory_space<vmem>>, %arg2: memref<16x129xf32, #tpu.memory_space<vmem>>, %arg3: memref<1x4x256xf32, #tpu.memory_space<vmem>>) attributes {dimension_semantics = [#tpu.dimension_semantics<parallel>], iteration_bounds = array<i64: 2>, scalar_prefetch = 0 : i64, scratch_operands = 0 : i64, tpu.core_type = #tpu.core_type<tc>, window_params = [{transform_indices = @transform_0, window_bounds = array<i64: 1, 4, 256>}, {pipeline_mode = #tpu.pipeline_mode<synchronous>, transform_indices = @transform_1, window_bounds = array<i64: 16, 129>}, {transform_indices = @transform_2, window_bounds = array<i64: 1, 4, 256>}]} {
    %c0 = arith.constant 0 : index
    %c0_0 = arith.constant 0 : index
    %c0_1 = arith.constant 0 : index
    %0 = vector.load %arg1[%c0, %c0_0, %c0_1] : memref<1x4x256xf32, #tpu.memory_space<vmem>>, vector<1x4x256xf32>
    %1 = vector.shape_cast %0 : vector<1x4x256xf32> to vector<4x256xf32>
    %2 = tpu.iota {dimensions = array<i32: 1>} : vector<1x256xi32>
    %c4_i32 = arith.constant 4 : i32
    %3 = vector.broadcast %c4_i32 : i32 to vector<1x256xi32>
    %4 = arith.shrsi %2, %3 : vector<1x256xi32>
    %c15_i32 = arith.constant 15 : i32
    %5 = vector.broadcast %c15_i32 : i32 to vector<1x256xi32>
    %6 = arith.andi %2, %5 : vector<1x256xi32>
    %c0_2 = arith.constant 0 : index
    %c0_3 = arith.constant 0 : index
    %7 = vector.load %arg2[%c0_2, %c0_3] : memref<16x129xf32, #tpu.memory_space<vmem>>, vector<4x9xf32>
    %c0_4 = arith.constant 0 : index
    %c9 = arith.constant 9 : index
    %8 = vector.load %arg2[%c0_4, %c9] : memref<16x129xf32, #tpu.memory_space<vmem>>, vector<4x1xf32>
    %c0_5 = arith.constant 0 : index
    %c42 = arith.constant 42 : index
    %9 = vector.load %arg2[%c0_5, %c42] : memref<16x129xf32, #tpu.memory_space<vmem>>, vector<4x9xf32>
    %c0_6 = arith.constant 0 : index
    %c51 = arith.constant 51 : index
    %10 = vector.load %arg2[%c0_6, %c51] : memref<16x129xf32, #tpu.memory_space<vmem>>, vector<4x1xf32>
    %c1_i32 = arith.constant 1 : i32
    %11 = vector.broadcast %c1_i32 : i32 to vector<1x256xi32>
    %12 = arith.cmpi sge, %6, %11 : vector<1x256xi32>
    %c17_i32 = arith.constant 17 : i32
    %13 = vector.broadcast %c17_i32 : i32 to vector<1x256xi32>
    %14 = arith.cmpi slt, %6, %13 : vector<1x256xi32>
    %15 = arith.andi %12, %14 : vector<1x256xi1>
    %c-1_i32 = arith.constant -1 : i32
    %16 = vector.broadcast %c-1_i32 : i32 to vector<1x256xi32>
    %17 = arith.cmpi sge, %6, %16 : vector<1x256xi32>
    %c15_i32_7 = arith.constant 15 : i32
    %18 = vector.broadcast %c15_i32_7 : i32 to vector<1x256xi32>
    %19 = arith.cmpi slt, %6, %18 : vector<1x256xi32>
    %20 = arith.andi %17, %19 : vector<1x256xi1>
    %c1_i32_8 = arith.constant 1 : i32
    %21 = vector.broadcast %c1_i32_8 : i32 to vector<1x256xi32>
    %22 = arith.cmpi sge, %4, %21 : vector<1x256xi32>
    %c17_i32_9 = arith.constant 17 : i32
    %23 = vector.broadcast %c17_i32_9 : i32 to vector<1x256xi32>
    %24 = arith.cmpi slt, %4, %23 : vector<1x256xi32>
    %25 = arith.andi %22, %24 : vector<1x256xi1>
    %c17_i32_10 = arith.constant 17 : i32
    %26 = tpu.dynamic_rotate %1 by %c17_i32_10 dim 1 : vector<4x256xf32>, i32 -> vector<4x256xf32>
    %27 = arith.andi %25, %15 : vector<1x256xi1>
    %cst = arith.constant 1.000000e+00 : f32
    %cst_11 = arith.constant 0.000000e+00 : f32
    %28 = vector.broadcast %cst : f32 to vector<1x256xf32>
    %29 = vector.broadcast %cst_11 : f32 to vector<1x256xf32>
    %30 = arith.select %27, %28, %29 : vector<1x256xi1>, vector<1x256xf32>
    %31 = vector.broadcast %30 : vector<1x256xf32> to vector<4x256xf32>
    %32 = arith.mulf %26, %31 : vector<4x256xf32>
    %33 = vector.extract_strided_slice %7 {offsets = [0, 0], sizes = [4, 1], strides = [1, 1]} : vector<4x9xf32> to vector<4x1xf32>
    %34 = vector.broadcast %33 : vector<4x1xf32> to vector<4x256xf32>
    %35 = arith.mulf %32, %34 : vector<4x256xf32>
    %36 = vector.extract_strided_slice %9 {offsets = [0, 0], sizes = [4, 1], strides = [1, 1]} : vector<4x9xf32> to vector<4x1xf32>
    %37 = vector.broadcast %36 : vector<4x1xf32> to vector<4x256xf32>
    %38 = arith.mulf %32, %37 : vector<4x256xf32>
    %c16_i32 = arith.constant 16 : i32
    %39 = tpu.dynamic_rotate %1 by %c16_i32 dim 1 : vector<4x256xf32>, i32 -> vector<4x256xf32>
    %cst_12 = arith.constant 1.000000e+00 : f32
    %cst_13 = arith.constant 0.000000e+00 : f32
    %40 = vector.broadcast %cst_12 : f32 to vector<1x256xf32>
    %41 = vector.broadcast %cst_13 : f32 to vector<1x256xf32>
    %42 = arith.select %25, %40, %41 : vector<1x256xi1>, vector<1x256xf32>
    %43 = vector.broadcast %42 : vector<1x256xf32> to vector<4x256xf32>
    %44 = arith.mulf %39, %43 : vector<4x256xf32>
    %45 = vector.extract_strided_slice %7 {offsets = [0, 1], sizes = [4, 1], strides = [1, 1]} : vector<4x9xf32> to vector<4x1xf32>
    %46 = vector.broadcast %45 : vector<4x1xf32> to vector<4x256xf32>
    %47 = arith.mulf %44, %46 : vector<4x256xf32>
    %48 = arith.addf %35, %47 : vector<4x256xf32>
    %49 = vector.extract_strided_slice %9 {offsets = [0, 1], sizes = [4, 1], strides = [1, 1]} : vector<4x9xf32> to vector<4x1xf32>
    %50 = vector.broadcast %49 : vector<4x1xf32> to vector<4x256xf32>
    %51 = arith.mulf %44, %50 : vector<4x256xf32>
    %52 = arith.addf %38, %51 : vector<4x256xf32>
    %c15_i32_14 = arith.constant 15 : i32
    %53 = tpu.dynamic_rotate %1 by %c15_i32_14 dim 1 : vector<4x256xf32>, i32 -> vector<4x256xf32>
    %54 = arith.andi %25, %20 : vector<1x256xi1>
    %cst_15 = arith.constant 1.000000e+00 : f32
    %cst_16 = arith.constant 0.000000e+00 : f32
    %55 = vector.broadcast %cst_15 : f32 to vector<1x256xf32>
    %56 = vector.broadcast %cst_16 : f32 to vector<1x256xf32>
    %57 = arith.select %54, %55, %56 : vector<1x256xi1>, vector<1x256xf32>
    %58 = vector.broadcast %57 : vector<1x256xf32> to vector<4x256xf32>
    %59 = arith.mulf %53, %58 : vector<4x256xf32>
    %60 = vector.extract_strided_slice %7 {offsets = [0, 2], sizes = [4, 1], strides = [1, 1]} : vector<4x9xf32> to vector<4x1xf32>
    %61 = vector.broadcast %60 : vector<4x1xf32> to vector<4x256xf32>
    %62 = arith.mulf %59, %61 : vector<4x256xf32>
    %63 = arith.addf %48, %62 : vector<4x256xf32>
    %64 = vector.extract_strided_slice %9 {offsets = [0, 2], sizes = [4, 1], strides = [1, 1]} : vector<4x9xf32> to vector<4x1xf32>
    %65 = vector.broadcast %64 : vector<4x1xf32> to vector<4x256xf32>
    %66 = arith.mulf %59, %65 : vector<4x256xf32>
    %67 = arith.addf %52, %66 : vector<4x256xf32>
    %c1_i32_17 = arith.constant 1 : i32
    %68 = tpu.dynamic_rotate %1 by %c1_i32_17 dim 1 : vector<4x256xf32>, i32 -> vector<4x256xf32>
    %cst_18 = arith.constant 1.000000e+00 : f32
    %cst_19 = arith.constant 0.000000e+00 : f32
    %69 = vector.broadcast %cst_18 : f32 to vector<1x256xf32>
    %70 = vector.broadcast %cst_19 : f32 to vector<1x256xf32>
    %71 = arith.select %15, %69, %70 : vector<1x256xi1>, vector<1x256xf32>
    %72 = vector.broadcast %71 : vector<1x256xf32> to vector<4x256xf32>
    %73 = arith.mulf %68, %72 : vector<4x256xf32>
    %74 = vector.extract_strided_slice %7 {offsets = [0, 3], sizes = [4, 1], strides = [1, 1]} : vector<4x9xf32> to vector<4x1xf32>
    %75 = vector.broadcast %74 : vector<4x1xf32> to vector<4x256xf32>
    %76 = arith.mulf %73, %75 : vector<4x256xf32>
    %77 = arith.addf %63, %76 : vector<4x256xf32>
    %78 = vector.extract_strided_slice %9 {offsets = [0, 3], sizes = [4, 1], strides = [1, 1]} : vector<4x9xf32> to vector<4x1xf32>
    %79 = vector.broadcast %78 : vector<4x1xf32> to vector<4x256xf32>
    %80 = arith.mulf %73, %79 : vector<4x256xf32>
    %81 = arith.addf %67, %80 : vector<4x256xf32>
    %82 = vector.extract_strided_slice %7 {offsets = [0, 4], sizes = [4, 1], strides = [1, 1]} : vector<4x9xf32> to vector<4x1xf32>
    %83 = vector.broadcast %82 : vector<4x1xf32> to vector<4x256xf32>
    %84 = arith.mulf %1, %83 : vector<4x256xf32>
    %85 = arith.addf %77, %84 : vector<4x256xf32>
    %86 = vector.extract_strided_slice %9 {offsets = [0, 4], sizes = [4, 1], strides = [1, 1]} : vector<4x9xf32> to vector<4x1xf32>
    %87 = vector.broadcast %86 : vector<4x1xf32> to vector<4x256xf32>
    %88 = arith.mulf %1, %87 : vector<4x256xf32>
    %89 = arith.addf %81, %88 : vector<4x256xf32>
    %c255_i32 = arith.constant 255 : i32
    %90 = tpu.dynamic_rotate %1 by %c255_i32 dim 1 : vector<4x256xf32>, i32 -> vector<4x256xf32>
    %cst_20 = arith.constant 1.000000e+00 : f32
    %cst_21 = arith.constant 0.000000e+00 : f32
    %91 = vector.broadcast %cst_20 : f32 to vector<1x256xf32>
    %92 = vector.broadcast %cst_21 : f32 to vector<1x256xf32>
    %93 = arith.select %20, %91, %92 : vector<1x256xi1>, vector<1x256xf32>
    %94 = vector.broadcast %93 : vector<1x256xf32> to vector<4x256xf32>
    %95 = arith.mulf %90, %94 : vector<4x256xf32>
    %96 = vector.extract_strided_slice %7 {offsets = [0, 5], sizes = [4, 1], strides = [1, 1]} : vector<4x9xf32> to vector<4x1xf32>
    %97 = vector.broadcast %96 : vector<4x1xf32> to vector<4x256xf32>
    %98 = arith.mulf %95, %97 : vector<4x256xf32>
    %99 = arith.addf %85, %98 : vector<4x256xf32>
    %100 = vector.extract_strided_slice %9 {offsets = [0, 5], sizes = [4, 1], strides = [1, 1]} : vector<4x9xf32> to vector<4x1xf32>
    %101 = vector.broadcast %100 : vector<4x1xf32> to vector<4x256xf32>
    %102 = arith.mulf %95, %101 : vector<4x256xf32>
    %103 = arith.addf %89, %102 : vector<4x256xf32>
    %c-1_i32_22 = arith.constant -1 : i32
    %104 = vector.broadcast %c-1_i32_22 : i32 to vector<1x256xi32>
    %105 = arith.cmpi sge, %4, %104 : vector<1x256xi32>
    %c15_i32_23 = arith.constant 15 : i32
    %106 = vector.broadcast %c15_i32_23 : i32 to vector<1x256xi32>
    %107 = arith.cmpi slt, %4, %106 : vector<1x256xi32>
    %108 = arith.andi %105, %107 : vector<1x256xi1>
    %c241_i32 = arith.constant 241 : i32
    %109 = tpu.dynamic_rotate %1 by %c241_i32 dim 1 : vector<4x256xf32>, i32 -> vector<4x256xf32>
    %110 = arith.andi %108, %15 : vector<1x256xi1>
    %cst_24 = arith.constant 1.000000e+00 : f32
    %cst_25 = arith.constant 0.000000e+00 : f32
    %111 = vector.broadcast %cst_24 : f32 to vector<1x256xf32>
    %112 = vector.broadcast %cst_25 : f32 to vector<1x256xf32>
    %113 = arith.select %110, %111, %112 : vector<1x256xi1>, vector<1x256xf32>
    %114 = vector.broadcast %113 : vector<1x256xf32> to vector<4x256xf32>
    %115 = arith.mulf %109, %114 : vector<4x256xf32>
    %116 = vector.extract_strided_slice %7 {offsets = [0, 6], sizes = [4, 1], strides = [1, 1]} : vector<4x9xf32> to vector<4x1xf32>
    %117 = vector.broadcast %116 : vector<4x1xf32> to vector<4x256xf32>
    %118 = arith.mulf %115, %117 : vector<4x256xf32>
    %119 = arith.addf %99, %118 : vector<4x256xf32>
    %120 = vector.extract_strided_slice %9 {offsets = [0, 6], sizes = [4, 1], strides = [1, 1]} : vector<4x9xf32> to vector<4x1xf32>
    %121 = vector.broadcast %120 : vector<4x1xf32> to vector<4x256xf32>
    %122 = arith.mulf %115, %121 : vector<4x256xf32>
    %123 = arith.addf %103, %122 : vector<4x256xf32>
    %c240_i32 = arith.constant 240 : i32
    %124 = tpu.dynamic_rotate %1 by %c240_i32 dim 1 : vector<4x256xf32>, i32 -> vector<4x256xf32>
    %cst_26 = arith.constant 1.000000e+00 : f32
    %cst_27 = arith.constant 0.000000e+00 : f32
    %125 = vector.broadcast %cst_26 : f32 to vector<1x256xf32>
    %126 = vector.broadcast %cst_27 : f32 to vector<1x256xf32>
    %127 = arith.select %108, %125, %126 : vector<1x256xi1>, vector<1x256xf32>
    %128 = vector.broadcast %127 : vector<1x256xf32> to vector<4x256xf32>
    %129 = arith.mulf %124, %128 : vector<4x256xf32>
    %130 = vector.extract_strided_slice %7 {offsets = [0, 7], sizes = [4, 1], strides = [1, 1]} : vector<4x9xf32> to vector<4x1xf32>
    %131 = vector.broadcast %130 : vector<4x1xf32> to vector<4x256xf32>
    %132 = arith.mulf %129, %131 : vector<4x256xf32>
    %133 = arith.addf %119, %132 : vector<4x256xf32>
    %134 = vector.extract_strided_slice %9 {offsets = [0, 7], sizes = [4, 1], strides = [1, 1]} : vector<4x9xf32> to vector<4x1xf32>
    %135 = vector.broadcast %134 : vector<4x1xf32> to vector<4x256xf32>
    %136 = arith.mulf %129, %135 : vector<4x256xf32>
    %137 = arith.addf %123, %136 : vector<4x256xf32>
    %c239_i32 = arith.constant 239 : i32
    %138 = tpu.dynamic_rotate %1 by %c239_i32 dim 1 : vector<4x256xf32>, i32 -> vector<4x256xf32>
    %139 = arith.andi %108, %20 : vector<1x256xi1>
    %cst_28 = arith.constant 1.000000e+00 : f32
    %cst_29 = arith.constant 0.000000e+00 : f32
    %140 = vector.broadcast %cst_28 : f32 to vector<1x256xf32>
    %141 = vector.broadcast %cst_29 : f32 to vector<1x256xf32>
    %142 = arith.select %139, %140, %141 : vector<1x256xi1>, vector<1x256xf32>
    %143 = vector.broadcast %142 : vector<1x256xf32> to vector<4x256xf32>
    %144 = arith.mulf %138, %143 : vector<4x256xf32>
    %145 = vector.extract_strided_slice %7 {offsets = [0, 8], sizes = [4, 1], strides = [1, 1]} : vector<4x9xf32> to vector<4x1xf32>
    %146 = vector.broadcast %145 : vector<4x1xf32> to vector<4x256xf32>
    %147 = arith.mulf %144, %146 : vector<4x256xf32>
    %148 = arith.addf %133, %147 : vector<4x256xf32>
    %149 = vector.extract_strided_slice %9 {offsets = [0, 8], sizes = [4, 1], strides = [1, 1]} : vector<4x9xf32> to vector<4x1xf32>
    %150 = vector.broadcast %149 : vector<4x1xf32> to vector<4x256xf32>
    %151 = arith.mulf %144, %150 : vector<4x256xf32>
    %152 = arith.addf %137, %151 : vector<4x256xf32>
    %153 = vector.broadcast %8 : vector<4x1xf32> to vector<4x256xf32>
    %154 = arith.addf %148, %153 : vector<4x256xf32>
    %155 = vector.broadcast %10 : vector<4x1xf32> to vector<4x256xf32>
    %156 = arith.addf %152, %155 : vector<4x256xf32>
    %c0_30 = arith.constant 0 : index
    %c10 = arith.constant 10 : index
    %157 = vector.load %arg2[%c0_30, %c10] : memref<16x129xf32, #tpu.memory_space<vmem>>, vector<16x4xf32>
    %c0_31 = arith.constant 0 : index
    %c14 = arith.constant 14 : index
    %158 = vector.load %arg2[%c0_31, %c14] : memref<16x129xf32, #tpu.memory_space<vmem>>, vector<16x1xf32>
    %cst_32 = arith.constant dense<0.000000e+00> : vector<16x256xf32>
    %159 = tpu.matmul %157, %154, %cst_32 {dimension_numbers = #tpu.dot_dimension_numbers<[1], [0], [0], [1], [0, 0, 1, 1], [], []>} : vector<16x4xf32>, vector<4x256xf32>, vector<16x256xf32> -> vector<16x256xf32>
    %160 = vector.broadcast %158 : vector<16x1xf32> to vector<16x256xf32>
    %161 = arith.addf %159, %160 : vector<16x256xf32>
    %cst_33 = arith.constant 0.000000e+00 : f32
    %162 = vector.broadcast %cst_33 : f32 to vector<16x256xf32>
    %163 = arith.maximumf %161, %162 : vector<16x256xf32>
    %c0_34 = arith.constant 0 : index
    %c15 = arith.constant 15 : index
    %164 = vector.load %arg2[%c0_34, %c15] : memref<16x129xf32, #tpu.memory_space<vmem>>, vector<16x9xf32>
    %c0_35 = arith.constant 0 : index
    %c24 = arith.constant 24 : index
    %165 = vector.load %arg2[%c0_35, %c24] : memref<16x129xf32, #tpu.memory_space<vmem>>, vector<16x1xf32>
    %c1_i32_36 = arith.constant 1 : i32
    %166 = vector.broadcast %c1_i32_36 : i32 to vector<1x256xi32>
    %167 = arith.cmpi sge, %6, %166 : vector<1x256xi32>
    %c17_i32_37 = arith.constant 17 : i32
    %168 = vector.broadcast %c17_i32_37 : i32 to vector<1x256xi32>
    %169 = arith.cmpi slt, %6, %168 : vector<1x256xi32>
    %170 = arith.andi %167, %169 : vector<1x256xi1>
    %c-1_i32_38 = arith.constant -1 : i32
    %171 = vector.broadcast %c-1_i32_38 : i32 to vector<1x256xi32>
    %172 = arith.cmpi sge, %6, %171 : vector<1x256xi32>
    %c15_i32_39 = arith.constant 15 : i32
    %173 = vector.broadcast %c15_i32_39 : i32 to vector<1x256xi32>
    %174 = arith.cmpi slt, %6, %173 : vector<1x256xi32>
    %175 = arith.andi %172, %174 : vector<1x256xi1>
    %c1_i32_40 = arith.constant 1 : i32
    %176 = vector.broadcast %c1_i32_40 : i32 to vector<1x256xi32>
    %177 = arith.cmpi sge, %4, %176 : vector<1x256xi32>
    %c17_i32_41 = arith.constant 17 : i32
    %178 = vector.broadcast %c17_i32_41 : i32 to vector<1x256xi32>
    %179 = arith.cmpi slt, %4, %178 : vector<1x256xi32>
    %180 = arith.andi %177, %179 : vector<1x256xi1>
    %c17_i32_42 = arith.constant 17 : i32
    %181 = tpu.dynamic_rotate %163 by %c17_i32_42 dim 1 : vector<16x256xf32>, i32 -> vector<16x256xf32>
    %182 = arith.andi %180, %170 : vector<1x256xi1>
    %cst_43 = arith.constant 1.000000e+00 : f32
    %cst_44 = arith.constant 0.000000e+00 : f32
    %183 = vector.broadcast %cst_43 : f32 to vector<1x256xf32>
    %184 = vector.broadcast %cst_44 : f32 to vector<1x256xf32>
    %185 = arith.select %182, %183, %184 : vector<1x256xi1>, vector<1x256xf32>
    %186 = vector.broadcast %185 : vector<1x256xf32> to vector<16x256xf32>
    %187 = arith.mulf %181, %186 : vector<16x256xf32>
    %188 = vector.extract_strided_slice %164 {offsets = [0, 0], sizes = [16, 1], strides = [1, 1]} : vector<16x9xf32> to vector<16x1xf32>
    %189 = vector.broadcast %188 : vector<16x1xf32> to vector<16x256xf32>
    %190 = arith.mulf %187, %189 : vector<16x256xf32>
    %c16_i32_45 = arith.constant 16 : i32
    %191 = tpu.dynamic_rotate %163 by %c16_i32_45 dim 1 : vector<16x256xf32>, i32 -> vector<16x256xf32>
    %cst_46 = arith.constant 1.000000e+00 : f32
    %cst_47 = arith.constant 0.000000e+00 : f32
    %192 = vector.broadcast %cst_46 : f32 to vector<1x256xf32>
    %193 = vector.broadcast %cst_47 : f32 to vector<1x256xf32>
    %194 = arith.select %180, %192, %193 : vector<1x256xi1>, vector<1x256xf32>
    %195 = vector.broadcast %194 : vector<1x256xf32> to vector<16x256xf32>
    %196 = arith.mulf %191, %195 : vector<16x256xf32>
    %197 = vector.extract_strided_slice %164 {offsets = [0, 1], sizes = [16, 1], strides = [1, 1]} : vector<16x9xf32> to vector<16x1xf32>
    %198 = vector.broadcast %197 : vector<16x1xf32> to vector<16x256xf32>
    %199 = arith.mulf %196, %198 : vector<16x256xf32>
    %200 = arith.addf %190, %199 : vector<16x256xf32>
    %c15_i32_48 = arith.constant 15 : i32
    %201 = tpu.dynamic_rotate %163 by %c15_i32_48 dim 1 : vector<16x256xf32>, i32 -> vector<16x256xf32>
    %202 = arith.andi %180, %175 : vector<1x256xi1>
    %cst_49 = arith.constant 1.000000e+00 : f32
    %cst_50 = arith.constant 0.000000e+00 : f32
    %203 = vector.broadcast %cst_49 : f32 to vector<1x256xf32>
    %204 = vector.broadcast %cst_50 : f32 to vector<1x256xf32>
    %205 = arith.select %202, %203, %204 : vector<1x256xi1>, vector<1x256xf32>
    %206 = vector.broadcast %205 : vector<1x256xf32> to vector<16x256xf32>
    %207 = arith.mulf %201, %206 : vector<16x256xf32>
    %208 = vector.extract_strided_slice %164 {offsets = [0, 2], sizes = [16, 1], strides = [1, 1]} : vector<16x9xf32> to vector<16x1xf32>
    %209 = vector.broadcast %208 : vector<16x1xf32> to vector<16x256xf32>
    %210 = arith.mulf %207, %209 : vector<16x256xf32>
    %211 = arith.addf %200, %210 : vector<16x256xf32>
    %c1_i32_51 = arith.constant 1 : i32
    %212 = tpu.dynamic_rotate %163 by %c1_i32_51 dim 1 : vector<16x256xf32>, i32 -> vector<16x256xf32>
    %cst_52 = arith.constant 1.000000e+00 : f32
    %cst_53 = arith.constant 0.000000e+00 : f32
    %213 = vector.broadcast %cst_52 : f32 to vector<1x256xf32>
    %214 = vector.broadcast %cst_53 : f32 to vector<1x256xf32>
    %215 = arith.select %170, %213, %214 : vector<1x256xi1>, vector<1x256xf32>
    %216 = vector.broadcast %215 : vector<1x256xf32> to vector<16x256xf32>
    %217 = arith.mulf %212, %216 : vector<16x256xf32>
    %218 = vector.extract_strided_slice %164 {offsets = [0, 3], sizes = [16, 1], strides = [1, 1]} : vector<16x9xf32> to vector<16x1xf32>
    %219 = vector.broadcast %218 : vector<16x1xf32> to vector<16x256xf32>
    %220 = arith.mulf %217, %219 : vector<16x256xf32>
    %221 = arith.addf %211, %220 : vector<16x256xf32>
    %222 = vector.extract_strided_slice %164 {offsets = [0, 4], sizes = [16, 1], strides = [1, 1]} : vector<16x9xf32> to vector<16x1xf32>
    %223 = vector.broadcast %222 : vector<16x1xf32> to vector<16x256xf32>
    %224 = arith.mulf %163, %223 : vector<16x256xf32>
    %225 = arith.addf %221, %224 : vector<16x256xf32>
    %c255_i32_54 = arith.constant 255 : i32
    %226 = tpu.dynamic_rotate %163 by %c255_i32_54 dim 1 : vector<16x256xf32>, i32 -> vector<16x256xf32>
    %cst_55 = arith.constant 1.000000e+00 : f32
    %cst_56 = arith.constant 0.000000e+00 : f32
    %227 = vector.broadcast %cst_55 : f32 to vector<1x256xf32>
    %228 = vector.broadcast %cst_56 : f32 to vector<1x256xf32>
    %229 = arith.select %175, %227, %228 : vector<1x256xi1>, vector<1x256xf32>
    %230 = vector.broadcast %229 : vector<1x256xf32> to vector<16x256xf32>
    %231 = arith.mulf %226, %230 : vector<16x256xf32>
    %232 = vector.extract_strided_slice %164 {offsets = [0, 5], sizes = [16, 1], strides = [1, 1]} : vector<16x9xf32> to vector<16x1xf32>
    %233 = vector.broadcast %232 : vector<16x1xf32> to vector<16x256xf32>
    %234 = arith.mulf %231, %233 : vector<16x256xf32>
    %235 = arith.addf %225, %234 : vector<16x256xf32>
    %c-1_i32_57 = arith.constant -1 : i32
    %236 = vector.broadcast %c-1_i32_57 : i32 to vector<1x256xi32>
    %237 = arith.cmpi sge, %4, %236 : vector<1x256xi32>
    %c15_i32_58 = arith.constant 15 : i32
    %238 = vector.broadcast %c15_i32_58 : i32 to vector<1x256xi32>
    %239 = arith.cmpi slt, %4, %238 : vector<1x256xi32>
    %240 = arith.andi %237, %239 : vector<1x256xi1>
    %c241_i32_59 = arith.constant 241 : i32
    %241 = tpu.dynamic_rotate %163 by %c241_i32_59 dim 1 : vector<16x256xf32>, i32 -> vector<16x256xf32>
    %242 = arith.andi %240, %170 : vector<1x256xi1>
    %cst_60 = arith.constant 1.000000e+00 : f32
    %cst_61 = arith.constant 0.000000e+00 : f32
    %243 = vector.broadcast %cst_60 : f32 to vector<1x256xf32>
    %244 = vector.broadcast %cst_61 : f32 to vector<1x256xf32>
    %245 = arith.select %242, %243, %244 : vector<1x256xi1>, vector<1x256xf32>
    %246 = vector.broadcast %245 : vector<1x256xf32> to vector<16x256xf32>
    %247 = arith.mulf %241, %246 : vector<16x256xf32>
    %248 = vector.extract_strided_slice %164 {offsets = [0, 6], sizes = [16, 1], strides = [1, 1]} : vector<16x9xf32> to vector<16x1xf32>
    %249 = vector.broadcast %248 : vector<16x1xf32> to vector<16x256xf32>
    %250 = arith.mulf %247, %249 : vector<16x256xf32>
    %251 = arith.addf %235, %250 : vector<16x256xf32>
    %c240_i32_62 = arith.constant 240 : i32
    %252 = tpu.dynamic_rotate %163 by %c240_i32_62 dim 1 : vector<16x256xf32>, i32 -> vector<16x256xf32>
    %cst_63 = arith.constant 1.000000e+00 : f32
    %cst_64 = arith.constant 0.000000e+00 : f32
    %253 = vector.broadcast %cst_63 : f32 to vector<1x256xf32>
    %254 = vector.broadcast %cst_64 : f32 to vector<1x256xf32>
    %255 = arith.select %240, %253, %254 : vector<1x256xi1>, vector<1x256xf32>
    %256 = vector.broadcast %255 : vector<1x256xf32> to vector<16x256xf32>
    %257 = arith.mulf %252, %256 : vector<16x256xf32>
    %258 = vector.extract_strided_slice %164 {offsets = [0, 7], sizes = [16, 1], strides = [1, 1]} : vector<16x9xf32> to vector<16x1xf32>
    %259 = vector.broadcast %258 : vector<16x1xf32> to vector<16x256xf32>
    %260 = arith.mulf %257, %259 : vector<16x256xf32>
    %261 = arith.addf %251, %260 : vector<16x256xf32>
    %c239_i32_65 = arith.constant 239 : i32
    %262 = tpu.dynamic_rotate %163 by %c239_i32_65 dim 1 : vector<16x256xf32>, i32 -> vector<16x256xf32>
    %263 = arith.andi %240, %175 : vector<1x256xi1>
    %cst_66 = arith.constant 1.000000e+00 : f32
    %cst_67 = arith.constant 0.000000e+00 : f32
    %264 = vector.broadcast %cst_66 : f32 to vector<1x256xf32>
    %265 = vector.broadcast %cst_67 : f32 to vector<1x256xf32>
    %266 = arith.select %263, %264, %265 : vector<1x256xi1>, vector<1x256xf32>
    %267 = vector.broadcast %266 : vector<1x256xf32> to vector<16x256xf32>
    %268 = arith.mulf %262, %267 : vector<16x256xf32>
    %269 = vector.extract_strided_slice %164 {offsets = [0, 8], sizes = [16, 1], strides = [1, 1]} : vector<16x9xf32> to vector<16x1xf32>
    %270 = vector.broadcast %269 : vector<16x1xf32> to vector<16x256xf32>
    %271 = arith.mulf %268, %270 : vector<16x256xf32>
    %272 = arith.addf %261, %271 : vector<16x256xf32>
    %273 = vector.broadcast %165 : vector<16x1xf32> to vector<16x256xf32>
    %274 = arith.addf %272, %273 : vector<16x256xf32>
    %cst_68 = arith.constant 0.000000e+00 : f32
    %275 = vector.broadcast %cst_68 : f32 to vector<16x256xf32>
    %276 = arith.maximumf %274, %275 : vector<16x256xf32>
    %c0_69 = arith.constant 0 : index
    %c25 = arith.constant 25 : index
    %277 = vector.load %arg2[%c0_69, %c25] : memref<16x129xf32, #tpu.memory_space<vmem>>, vector<4x16xf32>
    %c0_70 = arith.constant 0 : index
    %c41 = arith.constant 41 : index
    %278 = vector.load %arg2[%c0_70, %c41] : memref<16x129xf32, #tpu.memory_space<vmem>>, vector<4x1xf32>
    %cst_71 = arith.constant dense<0.000000e+00> : vector<4x256xf32>
    %279 = tpu.matmul %277, %276, %cst_71 {dimension_numbers = #tpu.dot_dimension_numbers<[1], [0], [0], [1], [0, 0, 1, 1], [], []>} : vector<4x16xf32>, vector<16x256xf32>, vector<4x256xf32> -> vector<4x256xf32>
    %280 = vector.broadcast %278 : vector<4x1xf32> to vector<4x256xf32>
    %281 = arith.addf %279, %280 : vector<4x256xf32>
    %c0_72 = arith.constant 0 : index
    %c52 = arith.constant 52 : index
    %282 = vector.load %arg2[%c0_72, %c52] : memref<16x129xf32, #tpu.memory_space<vmem>>, vector<16x4xf32>
    %c0_73 = arith.constant 0 : index
    %c56 = arith.constant 56 : index
    %283 = vector.load %arg2[%c0_73, %c56] : memref<16x129xf32, #tpu.memory_space<vmem>>, vector<16x1xf32>
    %cst_74 = arith.constant dense<0.000000e+00> : vector<16x256xf32>
    %284 = tpu.matmul %282, %156, %cst_74 {dimension_numbers = #tpu.dot_dimension_numbers<[1], [0], [0], [1], [0, 0, 1, 1], [], []>} : vector<16x4xf32>, vector<4x256xf32>, vector<16x256xf32> -> vector<16x256xf32>
    %285 = vector.broadcast %283 : vector<16x1xf32> to vector<16x256xf32>
    %286 = arith.addf %284, %285 : vector<16x256xf32>
    %cst_75 = arith.constant 0.000000e+00 : f32
    %287 = vector.broadcast %cst_75 : f32 to vector<16x256xf32>
    %288 = arith.maximumf %286, %287 : vector<16x256xf32>
    %c0_76 = arith.constant 0 : index
    %c57 = arith.constant 57 : index
    %289 = vector.load %arg2[%c0_76, %c57] : memref<16x129xf32, #tpu.memory_space<vmem>>, vector<16x25xf32>
    %c0_77 = arith.constant 0 : index
    %c82 = arith.constant 82 : index
    %290 = vector.load %arg2[%c0_77, %c82] : memref<16x129xf32, #tpu.memory_space<vmem>>, vector<16x1xf32>
    %c2_i32 = arith.constant 2 : i32
    %291 = vector.broadcast %c2_i32 : i32 to vector<1x256xi32>
    %292 = arith.cmpi sge, %6, %291 : vector<1x256xi32>
    %c18_i32 = arith.constant 18 : i32
    %293 = vector.broadcast %c18_i32 : i32 to vector<1x256xi32>
    %294 = arith.cmpi slt, %6, %293 : vector<1x256xi32>
    %295 = arith.andi %292, %294 : vector<1x256xi1>
    %c1_i32_78 = arith.constant 1 : i32
    %296 = vector.broadcast %c1_i32_78 : i32 to vector<1x256xi32>
    %297 = arith.cmpi sge, %6, %296 : vector<1x256xi32>
    %c17_i32_79 = arith.constant 17 : i32
    %298 = vector.broadcast %c17_i32_79 : i32 to vector<1x256xi32>
    %299 = arith.cmpi slt, %6, %298 : vector<1x256xi32>
    %300 = arith.andi %297, %299 : vector<1x256xi1>
    %c-1_i32_80 = arith.constant -1 : i32
    %301 = vector.broadcast %c-1_i32_80 : i32 to vector<1x256xi32>
    %302 = arith.cmpi sge, %6, %301 : vector<1x256xi32>
    %c15_i32_81 = arith.constant 15 : i32
    %303 = vector.broadcast %c15_i32_81 : i32 to vector<1x256xi32>
    %304 = arith.cmpi slt, %6, %303 : vector<1x256xi32>
    %305 = arith.andi %302, %304 : vector<1x256xi1>
    %c-2_i32 = arith.constant -2 : i32
    %306 = vector.broadcast %c-2_i32 : i32 to vector<1x256xi32>
    %307 = arith.cmpi sge, %6, %306 : vector<1x256xi32>
    %c14_i32 = arith.constant 14 : i32
    %308 = vector.broadcast %c14_i32 : i32 to vector<1x256xi32>
    %309 = arith.cmpi slt, %6, %308 : vector<1x256xi32>
    %310 = arith.andi %307, %309 : vector<1x256xi1>
    %c2_i32_82 = arith.constant 2 : i32
    %311 = vector.broadcast %c2_i32_82 : i32 to vector<1x256xi32>
    %312 = arith.cmpi sge, %4, %311 : vector<1x256xi32>
    %c18_i32_83 = arith.constant 18 : i32
    %313 = vector.broadcast %c18_i32_83 : i32 to vector<1x256xi32>
    %314 = arith.cmpi slt, %4, %313 : vector<1x256xi32>
    %315 = arith.andi %312, %314 : vector<1x256xi1>
    %c34_i32 = arith.constant 34 : i32
    %316 = tpu.dynamic_rotate %288 by %c34_i32 dim 1 : vector<16x256xf32>, i32 -> vector<16x256xf32>
    %317 = arith.andi %315, %295 : vector<1x256xi1>
    %cst_84 = arith.constant 1.000000e+00 : f32
    %cst_85 = arith.constant 0.000000e+00 : f32
    %318 = vector.broadcast %cst_84 : f32 to vector<1x256xf32>
    %319 = vector.broadcast %cst_85 : f32 to vector<1x256xf32>
    %320 = arith.select %317, %318, %319 : vector<1x256xi1>, vector<1x256xf32>
    %321 = vector.broadcast %320 : vector<1x256xf32> to vector<16x256xf32>
    %322 = arith.mulf %316, %321 : vector<16x256xf32>
    %323 = vector.extract_strided_slice %289 {offsets = [0, 0], sizes = [16, 1], strides = [1, 1]} : vector<16x25xf32> to vector<16x1xf32>
    %324 = vector.broadcast %323 : vector<16x1xf32> to vector<16x256xf32>
    %325 = arith.mulf %322, %324 : vector<16x256xf32>
    %c33_i32 = arith.constant 33 : i32
    %326 = tpu.dynamic_rotate %288 by %c33_i32 dim 1 : vector<16x256xf32>, i32 -> vector<16x256xf32>
    %327 = arith.andi %315, %300 : vector<1x256xi1>
    %cst_86 = arith.constant 1.000000e+00 : f32
    %cst_87 = arith.constant 0.000000e+00 : f32
    %328 = vector.broadcast %cst_86 : f32 to vector<1x256xf32>
    %329 = vector.broadcast %cst_87 : f32 to vector<1x256xf32>
    %330 = arith.select %327, %328, %329 : vector<1x256xi1>, vector<1x256xf32>
    %331 = vector.broadcast %330 : vector<1x256xf32> to vector<16x256xf32>
    %332 = arith.mulf %326, %331 : vector<16x256xf32>
    %333 = vector.extract_strided_slice %289 {offsets = [0, 1], sizes = [16, 1], strides = [1, 1]} : vector<16x25xf32> to vector<16x1xf32>
    %334 = vector.broadcast %333 : vector<16x1xf32> to vector<16x256xf32>
    %335 = arith.mulf %332, %334 : vector<16x256xf32>
    %336 = arith.addf %325, %335 : vector<16x256xf32>
    %c32_i32 = arith.constant 32 : i32
    %337 = tpu.dynamic_rotate %288 by %c32_i32 dim 1 : vector<16x256xf32>, i32 -> vector<16x256xf32>
    %cst_88 = arith.constant 1.000000e+00 : f32
    %cst_89 = arith.constant 0.000000e+00 : f32
    %338 = vector.broadcast %cst_88 : f32 to vector<1x256xf32>
    %339 = vector.broadcast %cst_89 : f32 to vector<1x256xf32>
    %340 = arith.select %315, %338, %339 : vector<1x256xi1>, vector<1x256xf32>
    %341 = vector.broadcast %340 : vector<1x256xf32> to vector<16x256xf32>
    %342 = arith.mulf %337, %341 : vector<16x256xf32>
    %343 = vector.extract_strided_slice %289 {offsets = [0, 2], sizes = [16, 1], strides = [1, 1]} : vector<16x25xf32> to vector<16x1xf32>
    %344 = vector.broadcast %343 : vector<16x1xf32> to vector<16x256xf32>
    %345 = arith.mulf %342, %344 : vector<16x256xf32>
    %346 = arith.addf %336, %345 : vector<16x256xf32>
    %c31_i32 = arith.constant 31 : i32
    %347 = tpu.dynamic_rotate %288 by %c31_i32 dim 1 : vector<16x256xf32>, i32 -> vector<16x256xf32>
    %348 = arith.andi %315, %305 : vector<1x256xi1>
    %cst_90 = arith.constant 1.000000e+00 : f32
    %cst_91 = arith.constant 0.000000e+00 : f32
    %349 = vector.broadcast %cst_90 : f32 to vector<1x256xf32>
    %350 = vector.broadcast %cst_91 : f32 to vector<1x256xf32>
    %351 = arith.select %348, %349, %350 : vector<1x256xi1>, vector<1x256xf32>
    %352 = vector.broadcast %351 : vector<1x256xf32> to vector<16x256xf32>
    %353 = arith.mulf %347, %352 : vector<16x256xf32>
    %354 = vector.extract_strided_slice %289 {offsets = [0, 3], sizes = [16, 1], strides = [1, 1]} : vector<16x25xf32> to vector<16x1xf32>
    %355 = vector.broadcast %354 : vector<16x1xf32> to vector<16x256xf32>
    %356 = arith.mulf %353, %355 : vector<16x256xf32>
    %357 = arith.addf %346, %356 : vector<16x256xf32>
    %c30_i32 = arith.constant 30 : i32
    %358 = tpu.dynamic_rotate %288 by %c30_i32 dim 1 : vector<16x256xf32>, i32 -> vector<16x256xf32>
    %359 = arith.andi %315, %310 : vector<1x256xi1>
    %cst_92 = arith.constant 1.000000e+00 : f32
    %cst_93 = arith.constant 0.000000e+00 : f32
    %360 = vector.broadcast %cst_92 : f32 to vector<1x256xf32>
    %361 = vector.broadcast %cst_93 : f32 to vector<1x256xf32>
    %362 = arith.select %359, %360, %361 : vector<1x256xi1>, vector<1x256xf32>
    %363 = vector.broadcast %362 : vector<1x256xf32> to vector<16x256xf32>
    %364 = arith.mulf %358, %363 : vector<16x256xf32>
    %365 = vector.extract_strided_slice %289 {offsets = [0, 4], sizes = [16, 1], strides = [1, 1]} : vector<16x25xf32> to vector<16x1xf32>
    %366 = vector.broadcast %365 : vector<16x1xf32> to vector<16x256xf32>
    %367 = arith.mulf %364, %366 : vector<16x256xf32>
    %368 = arith.addf %357, %367 : vector<16x256xf32>
    %c1_i32_94 = arith.constant 1 : i32
    %369 = vector.broadcast %c1_i32_94 : i32 to vector<1x256xi32>
    %370 = arith.cmpi sge, %4, %369 : vector<1x256xi32>
    %c17_i32_95 = arith.constant 17 : i32
    %371 = vector.broadcast %c17_i32_95 : i32 to vector<1x256xi32>
    %372 = arith.cmpi slt, %4, %371 : vector<1x256xi32>
    %373 = arith.andi %370, %372 : vector<1x256xi1>
    %c18_i32_96 = arith.constant 18 : i32
    %374 = tpu.dynamic_rotate %288 by %c18_i32_96 dim 1 : vector<16x256xf32>, i32 -> vector<16x256xf32>
    %375 = arith.andi %373, %295 : vector<1x256xi1>
    %cst_97 = arith.constant 1.000000e+00 : f32
    %cst_98 = arith.constant 0.000000e+00 : f32
    %376 = vector.broadcast %cst_97 : f32 to vector<1x256xf32>
    %377 = vector.broadcast %cst_98 : f32 to vector<1x256xf32>
    %378 = arith.select %375, %376, %377 : vector<1x256xi1>, vector<1x256xf32>
    %379 = vector.broadcast %378 : vector<1x256xf32> to vector<16x256xf32>
    %380 = arith.mulf %374, %379 : vector<16x256xf32>
    %381 = vector.extract_strided_slice %289 {offsets = [0, 5], sizes = [16, 1], strides = [1, 1]} : vector<16x25xf32> to vector<16x1xf32>
    %382 = vector.broadcast %381 : vector<16x1xf32> to vector<16x256xf32>
    %383 = arith.mulf %380, %382 : vector<16x256xf32>
    %384 = arith.addf %368, %383 : vector<16x256xf32>
    %c17_i32_99 = arith.constant 17 : i32
    %385 = tpu.dynamic_rotate %288 by %c17_i32_99 dim 1 : vector<16x256xf32>, i32 -> vector<16x256xf32>
    %386 = arith.andi %373, %300 : vector<1x256xi1>
    %cst_100 = arith.constant 1.000000e+00 : f32
    %cst_101 = arith.constant 0.000000e+00 : f32
    %387 = vector.broadcast %cst_100 : f32 to vector<1x256xf32>
    %388 = vector.broadcast %cst_101 : f32 to vector<1x256xf32>
    %389 = arith.select %386, %387, %388 : vector<1x256xi1>, vector<1x256xf32>
    %390 = vector.broadcast %389 : vector<1x256xf32> to vector<16x256xf32>
    %391 = arith.mulf %385, %390 : vector<16x256xf32>
    %392 = vector.extract_strided_slice %289 {offsets = [0, 6], sizes = [16, 1], strides = [1, 1]} : vector<16x25xf32> to vector<16x1xf32>
    %393 = vector.broadcast %392 : vector<16x1xf32> to vector<16x256xf32>
    %394 = arith.mulf %391, %393 : vector<16x256xf32>
    %395 = arith.addf %384, %394 : vector<16x256xf32>
    %c16_i32_102 = arith.constant 16 : i32
    %396 = tpu.dynamic_rotate %288 by %c16_i32_102 dim 1 : vector<16x256xf32>, i32 -> vector<16x256xf32>
    %cst_103 = arith.constant 1.000000e+00 : f32
    %cst_104 = arith.constant 0.000000e+00 : f32
    %397 = vector.broadcast %cst_103 : f32 to vector<1x256xf32>
    %398 = vector.broadcast %cst_104 : f32 to vector<1x256xf32>
    %399 = arith.select %373, %397, %398 : vector<1x256xi1>, vector<1x256xf32>
    %400 = vector.broadcast %399 : vector<1x256xf32> to vector<16x256xf32>
    %401 = arith.mulf %396, %400 : vector<16x256xf32>
    %402 = vector.extract_strided_slice %289 {offsets = [0, 7], sizes = [16, 1], strides = [1, 1]} : vector<16x25xf32> to vector<16x1xf32>
    %403 = vector.broadcast %402 : vector<16x1xf32> to vector<16x256xf32>
    %404 = arith.mulf %401, %403 : vector<16x256xf32>
    %405 = arith.addf %395, %404 : vector<16x256xf32>
    %c15_i32_105 = arith.constant 15 : i32
    %406 = tpu.dynamic_rotate %288 by %c15_i32_105 dim 1 : vector<16x256xf32>, i32 -> vector<16x256xf32>
    %407 = arith.andi %373, %305 : vector<1x256xi1>
    %cst_106 = arith.constant 1.000000e+00 : f32
    %cst_107 = arith.constant 0.000000e+00 : f32
    %408 = vector.broadcast %cst_106 : f32 to vector<1x256xf32>
    %409 = vector.broadcast %cst_107 : f32 to vector<1x256xf32>
    %410 = arith.select %407, %408, %409 : vector<1x256xi1>, vector<1x256xf32>
    %411 = vector.broadcast %410 : vector<1x256xf32> to vector<16x256xf32>
    %412 = arith.mulf %406, %411 : vector<16x256xf32>
    %413 = vector.extract_strided_slice %289 {offsets = [0, 8], sizes = [16, 1], strides = [1, 1]} : vector<16x25xf32> to vector<16x1xf32>
    %414 = vector.broadcast %413 : vector<16x1xf32> to vector<16x256xf32>
    %415 = arith.mulf %412, %414 : vector<16x256xf32>
    %416 = arith.addf %405, %415 : vector<16x256xf32>
    %c14_i32_108 = arith.constant 14 : i32
    %417 = tpu.dynamic_rotate %288 by %c14_i32_108 dim 1 : vector<16x256xf32>, i32 -> vector<16x256xf32>
    %418 = arith.andi %373, %310 : vector<1x256xi1>
    %cst_109 = arith.constant 1.000000e+00 : f32
    %cst_110 = arith.constant 0.000000e+00 : f32
    %419 = vector.broadcast %cst_109 : f32 to vector<1x256xf32>
    %420 = vector.broadcast %cst_110 : f32 to vector<1x256xf32>
    %421 = arith.select %418, %419, %420 : vector<1x256xi1>, vector<1x256xf32>
    %422 = vector.broadcast %421 : vector<1x256xf32> to vector<16x256xf32>
    %423 = arith.mulf %417, %422 : vector<16x256xf32>
    %424 = vector.extract_strided_slice %289 {offsets = [0, 9], sizes = [16, 1], strides = [1, 1]} : vector<16x25xf32> to vector<16x1xf32>
    %425 = vector.broadcast %424 : vector<16x1xf32> to vector<16x256xf32>
    %426 = arith.mulf %423, %425 : vector<16x256xf32>
    %427 = arith.addf %416, %426 : vector<16x256xf32>
    %c2_i32_111 = arith.constant 2 : i32
    %428 = tpu.dynamic_rotate %288 by %c2_i32_111 dim 1 : vector<16x256xf32>, i32 -> vector<16x256xf32>
    %cst_112 = arith.constant 1.000000e+00 : f32
    %cst_113 = arith.constant 0.000000e+00 : f32
    %429 = vector.broadcast %cst_112 : f32 to vector<1x256xf32>
    %430 = vector.broadcast %cst_113 : f32 to vector<1x256xf32>
    %431 = arith.select %295, %429, %430 : vector<1x256xi1>, vector<1x256xf32>
    %432 = vector.broadcast %431 : vector<1x256xf32> to vector<16x256xf32>
    %433 = arith.mulf %428, %432 : vector<16x256xf32>
    %434 = vector.extract_strided_slice %289 {offsets = [0, 10], sizes = [16, 1], strides = [1, 1]} : vector<16x25xf32> to vector<16x1xf32>
    %435 = vector.broadcast %434 : vector<16x1xf32> to vector<16x256xf32>
    %436 = arith.mulf %433, %435 : vector<16x256xf32>
    %437 = arith.addf %427, %436 : vector<16x256xf32>
    %c1_i32_114 = arith.constant 1 : i32
    %438 = tpu.dynamic_rotate %288 by %c1_i32_114 dim 1 : vector<16x256xf32>, i32 -> vector<16x256xf32>
    %cst_115 = arith.constant 1.000000e+00 : f32
    %cst_116 = arith.constant 0.000000e+00 : f32
    %439 = vector.broadcast %cst_115 : f32 to vector<1x256xf32>
    %440 = vector.broadcast %cst_116 : f32 to vector<1x256xf32>
    %441 = arith.select %300, %439, %440 : vector<1x256xi1>, vector<1x256xf32>
    %442 = vector.broadcast %441 : vector<1x256xf32> to vector<16x256xf32>
    %443 = arith.mulf %438, %442 : vector<16x256xf32>
    %444 = vector.extract_strided_slice %289 {offsets = [0, 11], sizes = [16, 1], strides = [1, 1]} : vector<16x25xf32> to vector<16x1xf32>
    %445 = vector.broadcast %444 : vector<16x1xf32> to vector<16x256xf32>
    %446 = arith.mulf %443, %445 : vector<16x256xf32>
    %447 = arith.addf %437, %446 : vector<16x256xf32>
    %448 = vector.extract_strided_slice %289 {offsets = [0, 12], sizes = [16, 1], strides = [1, 1]} : vector<16x25xf32> to vector<16x1xf32>
    %449 = vector.broadcast %448 : vector<16x1xf32> to vector<16x256xf32>
    %450 = arith.mulf %288, %449 : vector<16x256xf32>
    %451 = arith.addf %447, %450 : vector<16x256xf32>
    %c255_i32_117 = arith.constant 255 : i32
    %452 = tpu.dynamic_rotate %288 by %c255_i32_117 dim 1 : vector<16x256xf32>, i32 -> vector<16x256xf32>
    %cst_118 = arith.constant 1.000000e+00 : f32
    %cst_119 = arith.constant 0.000000e+00 : f32
    %453 = vector.broadcast %cst_118 : f32 to vector<1x256xf32>
    %454 = vector.broadcast %cst_119 : f32 to vector<1x256xf32>
    %455 = arith.select %305, %453, %454 : vector<1x256xi1>, vector<1x256xf32>
    %456 = vector.broadcast %455 : vector<1x256xf32> to vector<16x256xf32>
    %457 = arith.mulf %452, %456 : vector<16x256xf32>
    %458 = vector.extract_strided_slice %289 {offsets = [0, 13], sizes = [16, 1], strides = [1, 1]} : vector<16x25xf32> to vector<16x1xf32>
    %459 = vector.broadcast %458 : vector<16x1xf32> to vector<16x256xf32>
    %460 = arith.mulf %457, %459 : vector<16x256xf32>
    %461 = arith.addf %451, %460 : vector<16x256xf32>
    %c254_i32 = arith.constant 254 : i32
    %462 = tpu.dynamic_rotate %288 by %c254_i32 dim 1 : vector<16x256xf32>, i32 -> vector<16x256xf32>
    %cst_120 = arith.constant 1.000000e+00 : f32
    %cst_121 = arith.constant 0.000000e+00 : f32
    %463 = vector.broadcast %cst_120 : f32 to vector<1x256xf32>
    %464 = vector.broadcast %cst_121 : f32 to vector<1x256xf32>
    %465 = arith.select %310, %463, %464 : vector<1x256xi1>, vector<1x256xf32>
    %466 = vector.broadcast %465 : vector<1x256xf32> to vector<16x256xf32>
    %467 = arith.mulf %462, %466 : vector<16x256xf32>
    %468 = vector.extract_strided_slice %289 {offsets = [0, 14], sizes = [16, 1], strides = [1, 1]} : vector<16x25xf32> to vector<16x1xf32>
    %469 = vector.broadcast %468 : vector<16x1xf32> to vector<16x256xf32>
    %470 = arith.mulf %467, %469 : vector<16x256xf32>
    %471 = arith.addf %461, %470 : vector<16x256xf32>
    %c-1_i32_122 = arith.constant -1 : i32
    %472 = vector.broadcast %c-1_i32_122 : i32 to vector<1x256xi32>
    %473 = arith.cmpi sge, %4, %472 : vector<1x256xi32>
    %c15_i32_123 = arith.constant 15 : i32
    %474 = vector.broadcast %c15_i32_123 : i32 to vector<1x256xi32>
    %475 = arith.cmpi slt, %4, %474 : vector<1x256xi32>
    %476 = arith.andi %473, %475 : vector<1x256xi1>
    %c242_i32 = arith.constant 242 : i32
    %477 = tpu.dynamic_rotate %288 by %c242_i32 dim 1 : vector<16x256xf32>, i32 -> vector<16x256xf32>
    %478 = arith.andi %476, %295 : vector<1x256xi1>
    %cst_124 = arith.constant 1.000000e+00 : f32
    %cst_125 = arith.constant 0.000000e+00 : f32
    %479 = vector.broadcast %cst_124 : f32 to vector<1x256xf32>
    %480 = vector.broadcast %cst_125 : f32 to vector<1x256xf32>
    %481 = arith.select %478, %479, %480 : vector<1x256xi1>, vector<1x256xf32>
    %482 = vector.broadcast %481 : vector<1x256xf32> to vector<16x256xf32>
    %483 = arith.mulf %477, %482 : vector<16x256xf32>
    %484 = vector.extract_strided_slice %289 {offsets = [0, 15], sizes = [16, 1], strides = [1, 1]} : vector<16x25xf32> to vector<16x1xf32>
    %485 = vector.broadcast %484 : vector<16x1xf32> to vector<16x256xf32>
    %486 = arith.mulf %483, %485 : vector<16x256xf32>
    %487 = arith.addf %471, %486 : vector<16x256xf32>
    %c241_i32_126 = arith.constant 241 : i32
    %488 = tpu.dynamic_rotate %288 by %c241_i32_126 dim 1 : vector<16x256xf32>, i32 -> vector<16x256xf32>
    %489 = arith.andi %476, %300 : vector<1x256xi1>
    %cst_127 = arith.constant 1.000000e+00 : f32
    %cst_128 = arith.constant 0.000000e+00 : f32
    %490 = vector.broadcast %cst_127 : f32 to vector<1x256xf32>
    %491 = vector.broadcast %cst_128 : f32 to vector<1x256xf32>
    %492 = arith.select %489, %490, %491 : vector<1x256xi1>, vector<1x256xf32>
    %493 = vector.broadcast %492 : vector<1x256xf32> to vector<16x256xf32>
    %494 = arith.mulf %488, %493 : vector<16x256xf32>
    %495 = vector.extract_strided_slice %289 {offsets = [0, 16], sizes = [16, 1], strides = [1, 1]} : vector<16x25xf32> to vector<16x1xf32>
    %496 = vector.broadcast %495 : vector<16x1xf32> to vector<16x256xf32>
    %497 = arith.mulf %494, %496 : vector<16x256xf32>
    %498 = arith.addf %487, %497 : vector<16x256xf32>
    %c240_i32_129 = arith.constant 240 : i32
    %499 = tpu.dynamic_rotate %288 by %c240_i32_129 dim 1 : vector<16x256xf32>, i32 -> vector<16x256xf32>
    %cst_130 = arith.constant 1.000000e+00 : f32
    %cst_131 = arith.constant 0.000000e+00 : f32
    %500 = vector.broadcast %cst_130 : f32 to vector<1x256xf32>
    %501 = vector.broadcast %cst_131 : f32 to vector<1x256xf32>
    %502 = arith.select %476, %500, %501 : vector<1x256xi1>, vector<1x256xf32>
    %503 = vector.broadcast %502 : vector<1x256xf32> to vector<16x256xf32>
    %504 = arith.mulf %499, %503 : vector<16x256xf32>
    %505 = vector.extract_strided_slice %289 {offsets = [0, 17], sizes = [16, 1], strides = [1, 1]} : vector<16x25xf32> to vector<16x1xf32>
    %506 = vector.broadcast %505 : vector<16x1xf32> to vector<16x256xf32>
    %507 = arith.mulf %504, %506 : vector<16x256xf32>
    %508 = arith.addf %498, %507 : vector<16x256xf32>
    %c239_i32_132 = arith.constant 239 : i32
    %509 = tpu.dynamic_rotate %288 by %c239_i32_132 dim 1 : vector<16x256xf32>, i32 -> vector<16x256xf32>
    %510 = arith.andi %476, %305 : vector<1x256xi1>
    %cst_133 = arith.constant 1.000000e+00 : f32
    %cst_134 = arith.constant 0.000000e+00 : f32
    %511 = vector.broadcast %cst_133 : f32 to vector<1x256xf32>
    %512 = vector.broadcast %cst_134 : f32 to vector<1x256xf32>
    %513 = arith.select %510, %511, %512 : vector<1x256xi1>, vector<1x256xf32>
    %514 = vector.broadcast %513 : vector<1x256xf32> to vector<16x256xf32>
    %515 = arith.mulf %509, %514 : vector<16x256xf32>
    %516 = vector.extract_strided_slice %289 {offsets = [0, 18], sizes = [16, 1], strides = [1, 1]} : vector<16x25xf32> to vector<16x1xf32>
    %517 = vector.broadcast %516 : vector<16x1xf32> to vector<16x256xf32>
    %518 = arith.mulf %515, %517 : vector<16x256xf32>
    %519 = arith.addf %508, %518 : vector<16x256xf32>
    %c238_i32 = arith.constant 238 : i32
    %520 = tpu.dynamic_rotate %288 by %c238_i32 dim 1 : vector<16x256xf32>, i32 -> vector<16x256xf32>
    %521 = arith.andi %476, %310 : vector<1x256xi1>
    %cst_135 = arith.constant 1.000000e+00 : f32
    %cst_136 = arith.constant 0.000000e+00 : f32
    %522 = vector.broadcast %cst_135 : f32 to vector<1x256xf32>
    %523 = vector.broadcast %cst_136 : f32 to vector<1x256xf32>
    %524 = arith.select %521, %522, %523 : vector<1x256xi1>, vector<1x256xf32>
    %525 = vector.broadcast %524 : vector<1x256xf32> to vector<16x256xf32>
    %526 = arith.mulf %520, %525 : vector<16x256xf32>
    %527 = vector.extract_strided_slice %289 {offsets = [0, 19], sizes = [16, 1], strides = [1, 1]} : vector<16x25xf32> to vector<16x1xf32>
    %528 = vector.broadcast %527 : vector<16x1xf32> to vector<16x256xf32>
    %529 = arith.mulf %526, %528 : vector<16x256xf32>
    %530 = arith.addf %519, %529 : vector<16x256xf32>
    %c-2_i32_137 = arith.constant -2 : i32
    %531 = vector.broadcast %c-2_i32_137 : i32 to vector<1x256xi32>
    %532 = arith.cmpi sge, %4, %531 : vector<1x256xi32>
    %c14_i32_138 = arith.constant 14 : i32
    %533 = vector.broadcast %c14_i32_138 : i32 to vector<1x256xi32>
    %534 = arith.cmpi slt, %4, %533 : vector<1x256xi32>
    %535 = arith.andi %532, %534 : vector<1x256xi1>
    %c226_i32 = arith.constant 226 : i32
    %536 = tpu.dynamic_rotate %288 by %c226_i32 dim 1 : vector<16x256xf32>, i32 -> vector<16x256xf32>
    %537 = arith.andi %535, %295 : vector<1x256xi1>
    %cst_139 = arith.constant 1.000000e+00 : f32
    %cst_140 = arith.constant 0.000000e+00 : f32
    %538 = vector.broadcast %cst_139 : f32 to vector<1x256xf32>
    %539 = vector.broadcast %cst_140 : f32 to vector<1x256xf32>
    %540 = arith.select %537, %538, %539 : vector<1x256xi1>, vector<1x256xf32>
    %541 = vector.broadcast %540 : vector<1x256xf32> to vector<16x256xf32>
    %542 = arith.mulf %536, %541 : vector<16x256xf32>
    %543 = vector.extract_strided_slice %289 {offsets = [0, 20], sizes = [16, 1], strides = [1, 1]} : vector<16x25xf32> to vector<16x1xf32>
    %544 = vector.broadcast %543 : vector<16x1xf32> to vector<16x256xf32>
    %545 = arith.mulf %542, %544 : vector<16x256xf32>
    %546 = arith.addf %530, %545 : vector<16x256xf32>
    %c225_i32 = arith.constant 225 : i32
    %547 = tpu.dynamic_rotate %288 by %c225_i32 dim 1 : vector<16x256xf32>, i32 -> vector<16x256xf32>
    %548 = arith.andi %535, %300 : vector<1x256xi1>
    %cst_141 = arith.constant 1.000000e+00 : f32
    %cst_142 = arith.constant 0.000000e+00 : f32
    %549 = vector.broadcast %cst_141 : f32 to vector<1x256xf32>
    %550 = vector.broadcast %cst_142 : f32 to vector<1x256xf32>
    %551 = arith.select %548, %549, %550 : vector<1x256xi1>, vector<1x256xf32>
    %552 = vector.broadcast %551 : vector<1x256xf32> to vector<16x256xf32>
    %553 = arith.mulf %547, %552 : vector<16x256xf32>
    %554 = vector.extract_strided_slice %289 {offsets = [0, 21], sizes = [16, 1], strides = [1, 1]} : vector<16x25xf32> to vector<16x1xf32>
    %555 = vector.broadcast %554 : vector<16x1xf32> to vector<16x256xf32>
    %556 = arith.mulf %553, %555 : vector<16x256xf32>
    %557 = arith.addf %546, %556 : vector<16x256xf32>
    %c224_i32 = arith.constant 224 : i32
    %558 = tpu.dynamic_rotate %288 by %c224_i32 dim 1 : vector<16x256xf32>, i32 -> vector<16x256xf32>
    %cst_143 = arith.constant 1.000000e+00 : f32
    %cst_144 = arith.constant 0.000000e+00 : f32
    %559 = vector.broadcast %cst_143 : f32 to vector<1x256xf32>
    %560 = vector.broadcast %cst_144 : f32 to vector<1x256xf32>
    %561 = arith.select %535, %559, %560 : vector<1x256xi1>, vector<1x256xf32>
    %562 = vector.broadcast %561 : vector<1x256xf32> to vector<16x256xf32>
    %563 = arith.mulf %558, %562 : vector<16x256xf32>
    %564 = vector.extract_strided_slice %289 {offsets = [0, 22], sizes = [16, 1], strides = [1, 1]} : vector<16x25xf32> to vector<16x1xf32>
    %565 = vector.broadcast %564 : vector<16x1xf32> to vector<16x256xf32>
    %566 = arith.mulf %563, %565 : vector<16x256xf32>
    %567 = arith.addf %557, %566 : vector<16x256xf32>
    %c223_i32 = arith.constant 223 : i32
    %568 = tpu.dynamic_rotate %288 by %c223_i32 dim 1 : vector<16x256xf32>, i32 -> vector<16x256xf32>
    %569 = arith.andi %535, %305 : vector<1x256xi1>
    %cst_145 = arith.constant 1.000000e+00 : f32
    %cst_146 = arith.constant 0.000000e+00 : f32
    %570 = vector.broadcast %cst_145 : f32 to vector<1x256xf32>
    %571 = vector.broadcast %cst_146 : f32 to vector<1x256xf32>
    %572 = arith.select %569, %570, %571 : vector<1x256xi1>, vector<1x256xf32>
    %573 = vector.broadcast %572 : vector<1x256xf32> to vector<16x256xf32>
    %574 = arith.mulf %568, %573 : vector<16x256xf32>
    %575 = vector.extract_strided_slice %289 {offsets = [0, 23], sizes = [16, 1], strides = [1, 1]} : vector<16x25xf32> to vector<16x1xf32>
    %576 = vector.broadcast %575 : vector<16x1xf32> to vector<16x256xf32>
    %577 = arith.mulf %574, %576 : vector<16x256xf32>
    %578 = arith.addf %567, %577 : vector<16x256xf32>
    %c222_i32 = arith.constant 222 : i32
    %579 = tpu.dynamic_rotate %288 by %c222_i32 dim 1 : vector<16x256xf32>, i32 -> vector<16x256xf32>
    %580 = arith.andi %535, %310 : vector<1x256xi1>
    %cst_147 = arith.constant 1.000000e+00 : f32
    %cst_148 = arith.constant 0.000000e+00 : f32
    %581 = vector.broadcast %cst_147 : f32 to vector<1x256xf32>
    %582 = vector.broadcast %cst_148 : f32 to vector<1x256xf32>
    %583 = arith.select %580, %581, %582 : vector<1x256xi1>, vector<1x256xf32>
    %584 = vector.broadcast %583 : vector<1x256xf32> to vector<16x256xf32>
    %585 = arith.mulf %579, %584 : vector<16x256xf32>
    %586 = vector.extract_strided_slice %289 {offsets = [0, 24], sizes = [16, 1], strides = [1, 1]} : vector<16x25xf32> to vector<16x1xf32>
    %587 = vector.broadcast %586 : vector<16x1xf32> to vector<16x256xf32>
    %588 = arith.mulf %585, %587 : vector<16x256xf32>
    %589 = arith.addf %578, %588 : vector<16x256xf32>
    %590 = vector.broadcast %290 : vector<16x1xf32> to vector<16x256xf32>
    %591 = arith.addf %589, %590 : vector<16x256xf32>
    %cst_149 = arith.constant 0.000000e+00 : f32
    %592 = vector.broadcast %cst_149 : f32 to vector<16x256xf32>
    %593 = arith.maximumf %591, %592 : vector<16x256xf32>
    %c0_150 = arith.constant 0 : index
    %c83 = arith.constant 83 : index
    %594 = vector.load %arg2[%c0_150, %c83] : memref<16x129xf32, #tpu.memory_space<vmem>>, vector<4x16xf32>
    %c0_151 = arith.constant 0 : index
    %c99 = arith.constant 99 : index
    %595 = vector.load %arg2[%c0_151, %c99] : memref<16x129xf32, #tpu.memory_space<vmem>>, vector<4x1xf32>
    %cst_152 = arith.constant dense<0.000000e+00> : vector<4x256xf32>
    %596 = tpu.matmul %594, %593, %cst_152 {dimension_numbers = #tpu.dot_dimension_numbers<[1], [0], [0], [1], [0, 0, 1, 1], [], []>} : vector<4x16xf32>, vector<16x256xf32>, vector<4x256xf32> -> vector<4x256xf32>
    %597 = vector.broadcast %595 : vector<4x1xf32> to vector<4x256xf32>
    %598 = arith.addf %596, %597 : vector<4x256xf32>
    %cst_153 = arith.constant dense<0.000000e+00> : vector<4xf32>
    %599 = vector.multi_reduction <add>, %281, %cst_153 [1] : vector<4x256xf32> to vector<4xf32>
    %600 = vector.shape_cast %599 : vector<4xf32> to vector<4x1xf32>
    %cst_154 = arith.constant 3.906250e-03 : f32
    %601 = vector.broadcast %cst_154 : f32 to vector<4x1xf32>
    %602 = arith.mulf %600, %601 : vector<4x1xf32>
    %cst_155 = arith.constant dense<0.000000e+00> : vector<4xf32>
    %603 = vector.multi_reduction <add>, %598, %cst_155 [1] : vector<4x256xf32> to vector<4xf32>
    %604 = vector.shape_cast %603 : vector<4xf32> to vector<4x1xf32>
    %cst_156 = arith.constant 3.906250e-03 : f32
    %605 = vector.broadcast %cst_156 : f32 to vector<4x1xf32>
    %606 = arith.mulf %604, %605 : vector<4x1xf32>
    %cst_157 = arith.constant dense<0.000000e+00> : vector<1xf32>
    %607 = vector.multi_reduction <add>, %602, %cst_157 [0] : vector<4x1xf32> to vector<1xf32>
    %608 = vector.shape_cast %607 : vector<1xf32> to vector<1x1xf32>
    %cst_158 = arith.constant dense<0.000000e+00> : vector<1xf32>
    %609 = vector.multi_reduction <add>, %606, %cst_158 [0] : vector<4x1xf32> to vector<1xf32>
    %610 = vector.shape_cast %609 : vector<1xf32> to vector<1x1xf32>
    %611 = arith.addf %608, %610 : vector<1x1xf32>
    %cst_159 = arith.constant 1.250000e-01 : f32
    %612 = vector.broadcast %cst_159 : f32 to vector<1x1xf32>
    %613 = arith.mulf %611, %612 : vector<1x1xf32>
    %614 = vector.broadcast %613 : vector<1x1xf32> to vector<4x1xf32>
    %615 = arith.subf %602, %614 : vector<4x1xf32>
    %616 = vector.broadcast %613 : vector<1x1xf32> to vector<4x1xf32>
    %617 = arith.subf %606, %616 : vector<4x1xf32>
    %618 = arith.mulf %615, %615 : vector<4x1xf32>
    %cst_160 = arith.constant dense<0.000000e+00> : vector<1xf32>
    %619 = vector.multi_reduction <add>, %618, %cst_160 [0] : vector<4x1xf32> to vector<1xf32>
    %620 = vector.shape_cast %619 : vector<1xf32> to vector<1x1xf32>
    %621 = arith.mulf %617, %617 : vector<4x1xf32>
    %cst_161 = arith.constant dense<0.000000e+00> : vector<1xf32>
    %622 = vector.multi_reduction <add>, %621, %cst_161 [0] : vector<4x1xf32> to vector<1xf32>
    %623 = vector.shape_cast %622 : vector<1xf32> to vector<1x1xf32>
    %624 = arith.addf %620, %623 : vector<1x1xf32>
    %cst_162 = arith.constant 1.250000e-01 : f32
    %625 = vector.broadcast %cst_162 : f32 to vector<1x1xf32>
    %626 = arith.mulf %624, %625 : vector<1x1xf32>
    %cst_163 = arith.constant 9.99999974E-6 : f32
    %627 = vector.broadcast %cst_163 : f32 to vector<1x1xf32>
    %628 = arith.addf %626, %627 : vector<1x1xf32>
    %629 = math.rsqrt %628 : vector<1x1xf32>
    %c0_164 = arith.constant 0 : index
    %c100 = arith.constant 100 : index
    %630 = vector.load %arg2[%c0_164, %c100] : memref<16x129xf32, #tpu.memory_space<vmem>>, vector<8x1xf32>
    %c0_165 = arith.constant 0 : index
    %c101 = arith.constant 101 : index
    %631 = vector.load %arg2[%c0_165, %c101] : memref<16x129xf32, #tpu.memory_space<vmem>>, vector<8x1xf32>
    %632 = vector.broadcast %629 : vector<1x1xf32> to vector<4x1xf32>
    %633 = arith.mulf %615, %632 : vector<4x1xf32>
    %634 = vector.extract_strided_slice %630 {offsets = [0, 0], sizes = [4, 1], strides = [1, 1]} : vector<8x1xf32> to vector<4x1xf32>
    %635 = arith.mulf %633, %634 : vector<4x1xf32>
    %636 = vector.extract_strided_slice %631 {offsets = [0, 0], sizes = [4, 1], strides = [1, 1]} : vector<8x1xf32> to vector<4x1xf32>
    %637 = arith.addf %635, %636 : vector<4x1xf32>
    %638 = vector.broadcast %629 : vector<1x1xf32> to vector<4x1xf32>
    %639 = arith.mulf %617, %638 : vector<4x1xf32>
    %640 = vector.extract_strided_slice %630 {offsets = [4, 0], sizes = [4, 1], strides = [1, 1]} : vector<8x1xf32> to vector<4x1xf32>
    %641 = arith.mulf %639, %640 : vector<4x1xf32>
    %642 = vector.extract_strided_slice %631 {offsets = [4, 0], sizes = [4, 1], strides = [1, 1]} : vector<8x1xf32> to vector<4x1xf32>
    %643 = arith.addf %641, %642 : vector<4x1xf32>
    %c0_166 = arith.constant 0 : index
    %c102 = arith.constant 102 : index
    %644 = vector.load %arg2[%c0_166, %c102] : memref<16x129xf32, #tpu.memory_space<vmem>>, vector<8x8xf32>
    %645 = vector.extract_strided_slice %644 {offsets = [0, 0], sizes = [8, 4], strides = [1, 1]} : vector<8x8xf32> to vector<8x4xf32>
    %cst_167 = arith.constant dense<0.000000e+00> : vector<8x1xf32>
    %646 = tpu.matmul %645, %637, %cst_167 {dimension_numbers = #tpu.dot_dimension_numbers<[1], [0], [0], [1], [0, 0, 1, 1], [], []>} : vector<8x4xf32>, vector<4x1xf32>, vector<8x1xf32> -> vector<8x1xf32>
    %647 = vector.extract_strided_slice %644 {offsets = [0, 4], sizes = [8, 4], strides = [1, 1]} : vector<8x8xf32> to vector<8x4xf32>
    %cst_168 = arith.constant dense<0.000000e+00> : vector<8x1xf32>
    %648 = tpu.matmul %647, %643, %cst_168 {dimension_numbers = #tpu.dot_dimension_numbers<[1], [0], [0], [1], [0, 0, 1, 1], [], []>} : vector<8x4xf32>, vector<4x1xf32>, vector<8x1xf32> -> vector<8x1xf32>
    %649 = arith.addf %646, %648 : vector<8x1xf32>
    %c0_169 = arith.constant 0 : index
    %c110 = arith.constant 110 : index
    %650 = vector.load %arg2[%c0_169, %c110] : memref<16x129xf32, #tpu.memory_space<vmem>>, vector<8x1xf32>
    %651 = arith.addf %649, %650 : vector<8x1xf32>
    %c0_170 = arith.constant 0 : index
    %c111 = arith.constant 111 : index
    %652 = vector.load %arg2[%c0_170, %c111] : memref<16x129xf32, #tpu.memory_space<vmem>>, vector<8x8xf32>
    %cst_171 = arith.constant dense<0.000000e+00> : vector<8x1xf32>
    %653 = tpu.matmul %652, %651, %cst_171 {dimension_numbers = #tpu.dot_dimension_numbers<[1], [0], [0], [1], [0, 0, 1, 1], [], []>} : vector<8x8xf32>, vector<8x1xf32>, vector<8x1xf32> -> vector<8x1xf32>
    %c0_172 = arith.constant 0 : index
    %c119 = arith.constant 119 : index
    %654 = vector.load %arg2[%c0_172, %c119] : memref<16x129xf32, #tpu.memory_space<vmem>>, vector<8x1xf32>
    %655 = arith.addf %653, %654 : vector<8x1xf32>
    %c0_173 = arith.constant 0 : index
    %c120 = arith.constant 120 : index
    %656 = vector.load %arg2[%c0_173, %c120] : memref<16x129xf32, #tpu.memory_space<vmem>>, vector<8x8xf32>
    %cst_174 = arith.constant dense<0.000000e+00> : vector<8x1xf32>
    %657 = tpu.matmul %656, %655, %cst_174 {dimension_numbers = #tpu.dot_dimension_numbers<[1], [0], [0], [1], [0, 0, 1, 1], [], []>} : vector<8x8xf32>, vector<8x1xf32>, vector<8x1xf32> -> vector<8x1xf32>
    %c0_175 = arith.constant 0 : index
    %c128 = arith.constant 128 : index
    %658 = vector.load %arg2[%c0_175, %c128] : memref<16x129xf32, #tpu.memory_space<vmem>>, vector<8x1xf32>
    %659 = arith.addf %657, %658 : vector<8x1xf32>
    %660 = arith.negf %659 : vector<8x1xf32>
    %661 = math.exp %660 : vector<8x1xf32>
    %cst_176 = arith.constant 1.000000e+00 : f32
    %662 = vector.broadcast %cst_176 : f32 to vector<8x1xf32>
    %663 = arith.addf %662, %661 : vector<8x1xf32>
    %664 = arith.divf %662, %663 : vector<8x1xf32>
    %665 = vector.extract_strided_slice %664 {offsets = [0, 0], sizes = [4, 1], strides = [1, 1]} : vector<8x1xf32> to vector<4x1xf32>
    %666 = vector.broadcast %665 : vector<4x1xf32> to vector<4x256xf32>
    %667 = arith.mulf %281, %666 : vector<4x256xf32>
    %668 = vector.extract_strided_slice %664 {offsets = [4, 0], sizes = [4, 1], strides = [1, 1]} : vector<8x1xf32> to vector<4x1xf32>
    %669 = vector.broadcast %668 : vector<4x1xf32> to vector<4x256xf32>
    %670 = arith.mulf %598, %669 : vector<4x256xf32>
    %671 = arith.addf %667, %670 : vector<4x256xf32>
    %672 = arith.addf %671, %1 : vector<4x256xf32>
    %c0_177 = arith.constant 0 : index
    %c0_178 = arith.constant 0 : index
    %c0_179 = arith.constant 0 : index
    %673 = vector.load %arg3[%c0_177, %c0_178, %c0_179] : memref<1x4x256xf32, #tpu.memory_space<vmem>>, vector<1x4x256xf32>
    %674 = vector.shape_cast %673 : vector<1x4x256xf32> to vector<4x256xf32>
    %675 = vector.shape_cast %672 : vector<4x256xf32> to vector<1x4x256xf32>
    tpu.vector_store %arg3[%c0_177, %c0_178, %c0_179], %675 {strides = array<i32>} : memref<1x4x256xf32, #tpu.memory_space<vmem>>, vector<1x4x256xf32>,
    return
  }
  func.func @transform_0(%arg0: i32) -> (i32, i32, i32) {
    %c0_i32 = arith.constant 0 : i32
    %c0_i32_0 = arith.constant 0 : i32
    %c0_i32_1 = arith.constant 0 : i32
    return %arg0, %c0_i32, %c0_i32_0 : i32, i32, i32
  }
  func.func @transform_1(%arg0: i32) -> (i32, i32) {
    %c0_i32 = arith.constant 0 : i32
    %c0_i32_0 = arith.constant 0 : i32
    %c0_i32_1 = arith.constant 0 : i32
    return %c0_i32, %c0_i32_0 : i32, i32
  }
  func.func @transform_2(%arg0: i32) -> (i32, i32, i32) {
    %c0_i32 = arith.constant 0 : i32
    %c0_i32_0 = arith.constant 0 : i32
    %c0_i32_1 = arith.constant 0 : i32
    return %arg0, %c0_i32, %c0_i32_0 : i32, i32, i32
  }
}

</mosaic_0001>

<bundles_post_ra>
// kernel: tpu_custom_call.1
= control target key start
LH: loop header
LB: loop body
LE: loop exit
PB: predicated region body
PF: predicated region fallthrough
CT: control target
= control target key end

     0   :  { %7 = vsyncpa [#allocation3], 0  ;;  %s5373_s0 = inlined_call_operand.hbm [shape: f32[2,4,256], index: 0, kind: input, shape index: {}]   ;;  %s5374_s1 = inlined_call_operand.hbm [shape: f32[16,129], index: 1, kind: input, shape index: {}]   ;;  %s5375_s2 = inlined_call_operand.hbm [shape: f32[2,4,256], index: 2, kind: output, shape index: {}]  }
   0x1   :  { %9 = vsyncpa [#allocation3 + $0x1], 0 }
   0x2   :  { %10 = vsyncpa [#allocation6], 0 }
   0x3   :  { %11 = vsyncpa [#allocation4], 0 }
   0x4   :  { %13 = vsyncpa [#allocation4 + $0x1], 0  ;;  %s3078_s9 = smov 0   ;;  %s3080_s10 = smov 0  }
   0x5   :  { %s3082_s11 = smov 0   ;;  %s3084_s12 = smov 0  }
   0x6 LB: > { %s3099_s13 = sadd.s32 4294967295, %s2959_s12   ;;  %s2529_s14 = sadd.s32 4294967294, %s2959_s12   ;;  %s2959_s12 = sphi %s3084_s12, %s5917_s12   ;;  %s2955_s11 = sphi %s3082_s11, %s5916_s11   ;;  %s2951_s10 = sphi %s3080_s10, %s5915_s10   ;;  %s2947_s9 = sphi %s3078_s9, %s5914_s9  }
   0x7   : > { %p39_p0 = scmp.ne.s32.totalorder %s2951_s10, %s2947_s9  ;;  %p5376_p1 = scmp.eq.s32.totalorder %s3099_s13, 0 }
   0x8   : > { %p90_p3 = scmp.eq.s32.totalorder %s2529_s14, 1  ;;  %p2530_p5 = scmp.ge.s32.totalorder %s2959_s12, 1 }
   0x9   : > { %p3108_p4 = por %p5376_p1, %p39_p0  ;;  %p97_p7 = scmp.lt.s32.totalorder %s2959_s12, 3 }
   0xa   : > { %p3113_p6 = por %p90_p3, %p39_p0  ;;  %s2961_s18 = smov [#allocation5]  }
   0xb   : > { %s5547_s15 = scalar_select %p3108_p4, 1, 0 }
   0xc   : > { %s5548_s16 = scalar_select %p3113_p6, 1, 0 }
   0xd   : > { %p3118_p8 = pnand %p2530_p5, %p97_p7  ;;  %s109_s19 = sshll.u32 %s2961_s18, 4  ;;  %s110_s19 = int_to_ptr.vmem [resolvable:$true] %s109_s19 }
   0xe   : > { %s3132_s21 = sadd.s32 1, %s2959_s12   ;;  %s26_s22 = sadd.s32 1, %s2955_s11 }
   0xf   : > { %s5549_s17 = scalar_select %p3118_p8, 1, 0 }
  0x10   : > { %p2600_p9 = pneg %p3118_p8  ;;  %s23_s23 = ssub.s32 %s2959_s12, %s3132_s21 }
  0x11   : > { %s2848_s24 = scalar_lea.vmem %s110_s19, 512  ;;  %p2856_p5 = scmp.lt.s32.totalorder %s110_s19, %s110_s19 }
  0x12   : > { %p3127_p11 = pnand %p2600_p9, %p5376_p1  ;;  %p2849_p13 = scmp.ne.s32.totalorder %s110_s19, %s2848_s24 }
  0x13   : > { %p2857_p7 = scmp.lt.s32.totalorder %s2848_s24, %s2848_s24 }
  0x14   : > { %p2839_p12 = pneg %p3127_p11 }
  0x15   : > { %p2858_p10 = por %p2857_p7, %p2856_p5 }
  0x16   : > { %p2851_p0 = pnand %p2849_p13, %p2839_p12 }
  0x18   : > { %p2852_p3 = pneg %p2851_p0 }
  0x1a   : > { %p2859_p2 = pnand %p2858_p10, %p2852_p3 }
  0x1c   : > { %2862 = shalt.err (!%p2859_p2)
}
  0x1d   : > { %s2962_s25 = smov 256   ;;  %s2963_s26 = smov 16  }
  0x1e   : > { %2603 = dma.hbm_to_vmem [thread:$0]  (!%p3127_p11), %s5374_s1, 512, %s110_s19, [#allocation6], %s2962_s25, %s2962_s25, %s2963_s26  }
  0x1f   : > { %p24_p9 = scmp.eq.s32.totalorder %s23_s23, 0  ;;  %p33_p12 = scmp.ne.s32.totalorder %s2955_s11, %s2951_s10 }
  0x20   : > { %p34_p10 = scmp.eq.s32.totalorder %s2959_s12, 0  ;;  %p2613_p2 = scmp.lt.s32.totalorder %s2959_s12, 2 }
  0x21   : > { %s3149_s29 = scalar_select %p24_p9, %s2955_s11, %s26_s22  }
  0x22   : > { %p35_p13 = por %p34_p10, %p33_p12  ;;  %p5551_p0 = scmp.eq.s32.totalorder %s3099_s13, 1 }
  0x23   : > { %s123_s3 = sand.u32 1, %s2955_s11   ;;  %s2562_s4 = sshll.u32 %s2959_s12, 7 }
  0x24   : > { %p3153_p3 = por %p5551_p0, %p33_p12  ;;  %s2533_s5 = sshll.u32 %s123_s3, 3 }
  0x25   : > { %s3162_s8 = scalar_lea.hbm %s5373_s0, %s2562_s4  ;;  %s127_s14 = scalar_lea.vmem [#allocation2], %s2533_s5 }
  0x26   : > { %s5552_s30 = scalar_select %p3153_p3, 1, 0 }
  0x27   : > { %s135_s18 = sshll.u32 %s127_s14, 4  ;;  %p3164_p11 = pnand %p2613_p2, %p35_p13  ;;  %s136_s18 = int_to_ptr.vmem [resolvable:$true] %s135_s18 }
  0x28   : > { %s124_s20 = scalar_lea.sflag [#allocation3], %s123_s3  ;;  %s2863_s22 = scalar_lea.hbm %s3162_s8, 128 }
  0x29   : > { %p2864_p5 = scmp.ne.s32.totalorder %s3162_s8, %s2863_s22  ;;  %p2865_p7 = pneg %p3164_p11 }
  0x2a   : > { %s2868_s25 = scalar_lea.hbm %s5373_s0, 256  ;;  %p2869_p10 = scmp.lt.s32.totalorder %s3162_s8, %s5373_s0 }
  0x2b   : > { %p2866_p9 = pnand %p2865_p7, %p2864_p5  ;;  %p2870_p2 = scmp.lt.s32.totalorder %s2868_s25, %s2863_s22 }
  0x2d   : > { %p2867_p12 = pneg %p2866_p9  ;;  %p2871_p13 = por %p2870_p2, %p2869_p10 }
  0x2f   : > { %p2872_p0 = pnand %p2871_p13, %p2867_p12 }
  0x31   : > { %2875 = shalt.err (!%p2872_p0)
}
  0x32   : > { %s2876_s28 = scalar_lea.vmem %s136_s18, 128  ;;  %s2964_s3 = smov [#allocation2]  }
  0x33   : > { %p2877_p1 = scmp.ne.s32.totalorder %s136_s18, %s2876_s28  ;;  %s2881_s4 = sshll.u32 %s2964_s3, 4  ;;  %s2882_s4 = int_to_ptr.vmem [resolvable:$false] %s2881_s4 }
  0x34   : > { %s2883_s5 = scalar_lea.vmem %s2882_s4, 256  ;;  %p2884_p5 = scmp.lt.s32.totalorder %s136_s18, %s2882_s4 }
  0x35   : > { %p2879_p6 = pnand %p2877_p1, %p2865_p7  ;;  %p2885_p9 = scmp.lt.s32.totalorder %s2883_s5, %s2876_s28 }
  0x37   : > { %p2880_p3 = pneg %p2879_p6  ;;  %p2886_p4 = por %p2885_p9, %p2884_p5 }
  0x39   : > { %p2887_p8 = pnand %p2886_p4, %p2880_p3 }
  0x3b   : > { %2890 = shalt.err (!%p2887_p8)
}
  0x3c   : > { %2607 = dma.hbm_to_vmem [thread:$0]  (!%p3164_p11), %s3162_s8, 128, %s136_s18, %s124_s20  }
  0x3d   : > { %p5554_p12 = scmp.ne.s32.totalorder %s5549_s17, 0 }
  0x3f   : > { %144 = sbr.rel (%p5554_p12) target bundleno = 2538 (0x9ea), region = 28 }
  0x44   : > { %s3185_s6 = sand.u32 1, %s2951_s10   ;;  %p5555_p1 = scmp.ne.s32.totalorder %s5547_s15, 0 }
  0x45   : > { %s5418_s7 = sshll.u32 %s3185_s6, 3  ;;  %s147_s14 = scalar_lea.sflag [#allocation3], %s3185_s6 }
  0x46   : > { %s3191_s22 = scalar_lea.vmem [#allocation2], %s5418_s7 }
  0x47   : > { %2934 = dma.done.wait (%p5555_p1), %s147_s14, 128  }
  0x48   : > { %2936 = vsyncadd (%p5555_p1), %s147_s14, 4294967168  ;;  %p5556_p4 = scmp.eq.s32.totalorder %s3099_s13, 0 }
  0x4a   : > { %2938 = dma.done.wait (%p5556_p4), [#allocation6], 512   ;;  %p5557_p6 = pmov %p5556_p4 }
  0x4b   : > { %v5382_v0 = vmov 0   ;;  %v2966_v1 = vmov 2   ;;  %v3202_v2 = vld [vmem:[#allocation5] sm:$0xf]  ;;  %v3206_v3 = vld [vmem:[%s3191_s22] sm:$0xff]  ;;  %s2967_s15 = smov 17   ;;  %v176_v41 = vlaneseq }
  0x4c   : > { %2940 = vsyncadd (%p5557_p6), [#allocation6], 4294966784  ;;  %2748 = vset.pattern.permute.xlu0 %v5382_v0  ;;  %2750 = vset.pattern.permute.xlu1 %v2966_v1  ;;  %v5383_v4 = vmov 0.0   ;;  %v2969_v5 = vmov 1   ;;  %s2970_s17 = smov 16   ;;  %v3217_v6 = vcombine.high %v3206_v3, %v3206_v3  ;;  %v2971_v7 = vmov 4  }
  0x4d   : > { %220 = vperm.xlu0 %2748, %v3202_v2   ;;  %205 = vrot.lane.b32.xlu1 %v3206_v3, %s2967_s15  ;;  %s2972_s8 = smov 15   ;;  %v2973_v8 = vmov 3   ;;  %v2974_v9 = vmov 14   ;;  %v2975_v10 = vmov 5   ;;  %s2976_s18 = smov 1   ;;  %v2977_v11 = vmov 6  }
  0x4e   : > { %570 = vmatprep.mubr.f32.mxu0 %v5383_v4  ;;  %946 = vmatprep.mubr.f32.mxu1 %v5383_v4  ;;  %5558 = vst [vmem:[#allocation11_spill] sm:$0xff] %v3217_v6  ;;  %v2978_v12 = vmov 7   ;;  %s5434_s19 = smov 127   ;;  %v2980_v13 = vmov 8   ;;  %s5442_s20 = smov 113   ;;  %v2982_v14 = vmov 9  }
  0x4f   : > { %v3245_v15 = vld [vmem:[#allocation5 + $0x10] sm:$0xff]  ;;  %s5427_s23 = smov 112   ;;  %v3252_v16 = vld [vmem:[#allocation5] sm:$0xff]  ;;  %v2984_v17 = vmov 15   ;;  %s5452_s24 = smov 111   ;;  %v2986_v18 = vmov 16  }
  0x50   : > { %s2987_s25 = smov 118   ;;  %v2988_v19 = vmov 18   ;;  %v2989_v20 = vmov 42   ;;  %v2990_v21 = vmov 20   ;;  %v2991_v22 = vmov 17   ;;  %s3006_s26 = smov 103  }
  0x51   : > { %2749 = vset.pattern.permute.xlu0 %v2969_v5  ;;  %231 = vrot.lane.b32.xlu1 %v3206_v3, %s2970_s17  ;;  %v2992_v23 = vmov 45   ;;  %v2993_v24 = vmov 19   ;;  %v2994_v25 = vmov 21   ;;  %v2995_v26 = vmov 43   ;;  %v871_v57 = vld [vmem:[#allocation5] sm:$0xf] }
  0x52   : > { %243 = vperm.xlu0 %2749, %v3202_v2   ;;  %v2996_v27 = vmov 23   ;;  %v2997_v28 = vmov 48   ;;  %v2998_v29 = vmov 44   ;;  %v2999_v30 = vmov 24   ;;  %s3008_s27 = smov 76   ;;  %s3035_s28 = smov 31  }
  0x53   : > { %v3000_v31 = vmov 46   ;;  %v3001_v32 = vmov 50   ;;  %v3002_v34 = vmov 22   ;;  %v3003_v37 = vmov 47   ;;  %s5423_s3 = smov 34   ;;  %s5421_s4 = smov 33  }
  0x54   : > { %v3004_v43 = vmov 49   ;;  %v3304_v45 = vand.u32 127, %v176_v41  ;;  %v3005_v52 = vmov 51   ;;  %v5563_v58 = vmov 0  ;;  %s5443_s5 = smov 14   ;;  %s3039_s14 = smov 32  }
  0x55   : > { %207 = vrot.lane.b32.xlu1 %v3217_v6, %s2967_s15  ;;  %v5566_v59 = vmov 0  ;;  %v3007_v60 = vmov 839922192   ;;  %s5419_s7 = smov 97   ;;  %p5911_p3 = scmp.ne.s32.totalorder %s5552_s30, 0 }
  0x56   : > { %233 = vrot.lane.b32.xlu0 %v3217_v6, %s2970_s17  ;;  %v178_v48 = vadd.s32 128, %v3304_v45  ;;  %v3312_v49 = vshra.s32 %v3304_v45, 4  ;;  %v3321_v54 = vand.u32 15, %v3304_v45  ;;  %v318_v61 = vunpack.c.l.s4 %v3007_v60 }
  0x57   : > { %2751 = vset.pattern.permute.xlu0 %v2971_v7  ;;  %vm5477_vm12 = vcmp.lt.s32.totalorder %v3304_v45, 16  ;;  %v321_v7 = vshrl.u32 %v176_v41, 7  ;;  %vm5474_vm14 = vcmp.lt.s32.totalorder %v3304_v45, 17 }
  0x58   : > { %5559 = vst [vmem:[#allocation12_spill] sm:$0xff] %v3312_v49  ;;  %v3316_v51 = vshra.s32 %v178_v48, 4  ;;  %5561 = vst [vmem:[#allocation14_spill] sm:$0xff] %v3321_v54  ;;  %v3324_v55 = vand.u32 15, %v178_v48  ;;  %vm196_vm0 = vcmp.ge.s32.totalorder %v3312_v49, 1  ;;  %vm198_vm1 = vcmp.lt.s32.totalorder %v3312_v49, 17 }
  0x59   : > { %272 = vperm.xlu1 %2750, %v3202_v2   ;;  %vm5482_vm4 = vcmp.ge.s32.totalorder %v3321_v54, 1  ;;  %vm3331_vm5 = vmand %vm196_vm0, %vm198_vm1  ;;  %vm5381_vm8 = vcmp.lt.s32.totalorder %v3321_v54, 15  ;;  %v319_v5 = vunpack.c.0.s8 %v318_v61  ;;  %vm5470_vm0 = vcmp.lt.s32.totalorder %v3304_v45, 15 }
  0x5a   : > { %315 = vperm.xlu0 %2751, %v3202_v2   ;;  %5560 = vst [vmem:[#allocation13_spill] sm:$0xff] %v3316_v51  ;;  %5562 = vst [vmem:[#allocation15_spill] sm:$0xff] %v3324_v55  ;;  %vm197_vm2 = vcmp.ge.s32.totalorder %v3316_v51, 1  ;;  %vm199_vm3 = vcmp.lt.s32.totalorder %v3316_v51, 17  ;;  %v5564_v58 = vsel %vm3331_vm5, 4294967295, %v5563_v58  ;;  %vm5380_vm6 = vcmp.ge.s32.totalorder %v3324_v55, 1 }
  0x5b   : > { %5565 = vst [vmem:[#allocation16_spill] sm:$0xff] %v5564_v58  ;;  %vm3336_vm7 = vmand %vm197_vm2, %vm199_vm3  ;;  %vm193_vm10 = vcmp.lt.s32.totalorder %v3324_v55, 15  ;;  %vm375_vm1 = vcmp.ge.s32.totalorder %v3312_v49, 4294967295  ;;  %vm377_vm2 = vcmp.lt.s32.totalorder %v3312_v49, 15  ;;  %vm5466_vm3 = vcmp.lt.s32.totalorder %v3304_v45, 1 }
  0x5c   : > { %v5567_v59 = vsel %vm3336_vm7, 4294967295, %v5566_v59  ;;  %vm3349_vm9 = vmand %vm3331_vm5, %vm5482_vm4 }
  0x5d   : > { %258 = vrot.lane.b32.xlu1 %v3206_v3, %s2972_s8  ;;  %5568 = vst [vmem:[#allocation17_spill] sm:$0xff] %v5567_v59  ;;  %vm213_vm11 = vmand %vm3336_vm7, %vm5380_vm6 }
  0x5e   : > { %2752 = vset.pattern.permute.xlu0 %v2973_v8  ;;  %2759 = vset.pattern.permute.xlu1 %v2974_v9  ;;  %vm3363_vm13 = vmand %vm3331_vm5, %vm5381_vm8 }
  0x5f   : > { %299 = vperm.xlu0 %2752, %v3202_v2   ;;  %vm266_vm15 = vmand %vm3336_vm7, %vm193_vm10 }
  0x61   : > { %260 = vrot.lane.b32.xlu1 %v3217_v6, %s2972_s8 }
  0x63   : > { %2753 = vset.pattern.permute.xlu0 %v2975_v10  ;;  %v3380_v10 = vsel %vm3336_vm7, 1.0, %v5383_v4 }
  0x64   : > { %360 = vperm.xlu0 %2753, %v3202_v2  }
  0x65   : > { %287 = vrot.lane.b32.xlu1 %v3206_v3, %s2976_s18 }
  0x68   : > { %2754 = vset.pattern.permute.xlu0 %v2977_v11 }
  0x69   : > { %395 = vperm.xlu0 %2754, %v3202_v2   ;;  %289 = vrot.lane.b32.xlu1 %v3217_v6, %s2976_s18 }
  0x6d   : > { %2755 = vset.pattern.permute.xlu0 %v2978_v12  ;;  %348 = vrot.lane.b32.xlu1 %v3206_v3, %s5434_s19  ;;  %v3390_v12 = vsel %vm3349_vm9, 1.0, %v5383_v4  ;;  %vm3428_vm9 = vmand %vm375_vm1, %vm377_vm2  ;;  %vm5469_vm1 = vcmp.lt.s32.totalorder %v3304_v45, 127 }
  0x6e   : > { %422 = vperm.xlu0 %2755, %v3202_v2  }
  0x71   : > { %350 = vrot.lane.b32.xlu1 %v3217_v6, %s5434_s19 }
  0x72   : > { %2756 = vset.pattern.permute.xlu0 %v2980_v13  ;;  %v3393_v13 = vsel %vm213_vm11, 1.0, %v5383_v4  ;;  %vm376_vm11 = vcmp.ge.s32.totalorder %v3316_v51, 4294967295 }
  0x73   : > { %451 = vperm.xlu0 %2756, %v3202_v2  }
  0x75   : > { %381 = vrot.lane.b32.xlu1 %v3206_v3, %s5442_s20 }
  0x77   : > { %2757 = vset.pattern.permute.xlu0 %v2982_v14 }
  0x78   : > { %467 = vperm.xlu0 %2757, %v3202_v2  }
  0x79   : > { %383 = vrot.lane.b32.xlu1 %v3217_v6, %s5442_s20 }
  0x7c   : > { %2758 = vset.pattern.permute.xlu0 %v2974_v9  ;;  %v3371_v9 = vsel %vm3331_vm5, 1.0, %v5383_v4 }
  0x7d   : > { %487 = vperm.xlu0 %2758, %v3245_v15   ;;  %410 = vrot.lane.b32.xlu1 %v3206_v3, %s5427_s23 }
  0x81   : > { %2761 = vset.pattern.permute.xlu0 %v2984_v17  ;;  %412 = vrot.lane.b32.xlu1 %v3217_v6, %s5427_s23 }
  0x82   : > { %604 = vperm.xlu0 %2761, %v3252_v16  }
  0x85   : > { %437 = vrot.lane.b32.xlu1 %v3206_v3, %s5452_s24 }
  0x86   : > { %2762 = vset.pattern.permute.xlu0 %v2986_v18  ;;  %v3404_v18 = vsel %vm3363_vm13, 1.0, %v5383_v4  ;;  %vm378_vm13 = vcmp.lt.s32.totalorder %v3316_v51, 15 }
  0x87   : > { %636 = vperm.xlu0 %2762, %v3245_v15   ;;  %vm3479_vm2 = vmand %vm376_vm11, %vm378_vm13  ;;  %vm5465_vm11 = vcmp.lt.s32.totalorder %v3304_v45, 113 }
  0x88   : > { %vm389_vm13 = vmand %vm3479_vm2, %vm5380_vm6 }
  0x89   : > { %439 = vrot.lane.b32.xlu1 %v3217_v6, %s5452_s24 }
  0x8b   : > { %632 = vperm.xlu0 %2762, %v3252_v16  }
  0x8d   : > { %490 = vrot.lane.b32.xlu1 %v3252_v16, %s2987_s25 }
  0x8f   : > { %2764 = vset.pattern.permute.xlu0 %v2988_v19  ;;  %v3407_v19 = vsel %vm266_vm15, 1.0, %v5383_v4  ;;  %vm388_vm15 = vmand %vm3428_vm9, %vm5482_vm4 }
  0x90   : > { %700 = vperm.xlu0 %2764, %v3245_v15  }
  0x91   : > { %492 = vrot.lane.b32.xlu1 %v3245_v15, %s2987_s25  ;;  %s5455_s25 = smov 114  }
  0x94   : > { %696 = vperm.xlu0 %2764, %v3252_v16  }
  0x95   : > { %482 = vperm.xlu1 %2759, %v3252_v16  }
  0x98   : > { %2766 = vset.pattern.permute.xlu0 %v2989_v20  ;;  %v3409_v20 = vsub.s32 %v319_v5, %v321_v7 }
  0x99   : > { %226 = vperm.xlu0 %2766, %v3202_v2   ;;  %2760 = vset.pattern.permute.xlu1 %v2984_v17 }
  0x9a   : > { %608 = vperm.xlu1 %2760, %v3245_v15  }
  0x9d   : > { %2769 = vset.pattern.permute.xlu0 %v2990_v21 }
  0x9e   : > { %748 = vperm.xlu0 %2769, %v3245_v15   ;;  %2763 = vset.pattern.permute.xlu1 %v2991_v22 }
  0x9f   : > { %668 = vperm.xlu1 %2763, %v3245_v15  }
  0xa2   : > { %744 = vperm.xlu0 %2769, %v3252_v16  }
  0xa3   : > { %664 = vperm.xlu1 %2763, %v3252_v16  }
  0xa6   : > { %2773 = vset.pattern.permute.xlu0 %v2992_v23 }
  0xa7   : > { %307 = vperm.xlu0 %2773, %v3202_v2   ;;  %2765 = vset.pattern.permute.xlu1 %v2993_v24 }
  0xa8   : > { %716 = vperm.xlu1 %2765, %v3245_v15  }
  0xab   : > { %2774 = vset.pattern.permute.xlu0 %v2994_v25 }
  0xac   : > { %776 = vperm.xlu0 %2774, %v3252_v16   ;;  %2767 = vset.pattern.permute.xlu1 %v2995_v26  ;;  %v5573_v26 = vmov 0 }
  0xad   : > { %251 = vperm.xlu1 %2767, %v3202_v2   ;;  %v5574_v26 = vsel %vm3428_vm9, 4294967295, %v5573_v26 }
  0xae   : > { %5575 = vst [vmem:[#allocation18_spill] sm:$0xff] %v5574_v26 }
  0xb0   : > { %2776 = vset.pattern.permute.xlu0 %v2996_v27 }
  0xb1   : > { %844 = vperm.xlu0 %2776, %v3245_v15   ;;  %2768 = vset.pattern.permute.xlu1 %v2993_v24 }
  0xb2   : > { %712 = vperm.xlu1 %2768, %v3252_v16  }
  0xb5   : > { %2779 = vset.pattern.permute.xlu0 %v2997_v28 }
  0xb6   : > { %403 = vperm.xlu0 %2779, %v3202_v2   ;;  %2770 = vset.pattern.permute.xlu1 %v2998_v29  ;;  %v3443_v29 = vsel %vm5482_vm4, 1.0, %v5383_v4 }
  0xb7   : > { %280 = vperm.xlu1 %2770, %v3202_v2  }
  0xba   : > { %2780 = vset.pattern.permute.xlu0 %v2999_v30 }
  0xbb   : > { %860 = vperm.xlu0 %2780, %v3245_v15   ;;  %2771 = vset.pattern.permute.xlu1 %v3000_v31 }
  0xbc   : > { %332 = vperm.xlu1 %2771, %v3202_v2  }
  0xbf   : > { %2783 = vset.pattern.permute.xlu0 %v3001_v32  ;;  %v3286_v33 = vpop.permute.xlu1 %205 }
  0xc0   : > { %459 = vperm.xlu0 %2783, %v3202_v2   ;;  %2772 = vset.pattern.permute.xlu1 %v2994_v25 }
  0xc1   : > { %780 = vperm.xlu1 %2772, %v3245_v15  }
  0xc3   : > { %v3289_v35 = vpop.permute.xlu1 %231 }
  0xc4   : > { %961 = vrot.lane.b32.xlu0 %v3252_v16, %s3008_s27 }
  0xc5   : > { %2775 = vset.pattern.permute.xlu1 %v3002_v34 }
  0xc6   : > { %812 = vperm.xlu1 %2775, %v3245_v15  }
  0xc7   : > { %v3295_v38 = vpop.permute.xlu1 %207 }
  0xc8   : > { %v3292_v36 = vpop.permute.xlu0 %220  ;;  %v210_v22 = vsel %vm5474_vm14, %v3286_v33, %v3295_v38  ;;  %v211_v23 = vsel %vm5474_vm14, %v3295_v38, %v3286_v33 }
  0xc9   : > { %v3457_v33 = vmul.f32 %v3390_v12, %v211_v23  ;;  %v3460_v34 = vmul.f32 %v3393_v13, %v210_v22  ;;  %v3532_v23 = vsel %vm389_vm13, 1.0, %v5383_v4  ;;  %vm444_vm13 = vmand %vm3428_vm9, %vm5381_vm8 }
  0xca   : > { %808 = vperm.xlu1 %2775, %v3252_v16   ;;  %5580 = vst [vmem:[#allocation21_spill] sm:$0xff] %v3532_v23 }
  0xcd   : > { %v3297_v39 = vpop.permute.xlu0 %243 }
  0xce   : > { %2777 = vset.pattern.permute.xlu1 %v3003_v37 }
  0xcf   : > { %368 = vperm.xlu1 %2777, %v3202_v2  }
  0xd1   : > { %v234_v42 = vpop.permute.xlu0 %233 }
  0xd2   : > { %v236_v14 = vsel %vm5477_vm12, %v3289_v35, %v234_v42  ;;  %v237_v17 = vsel %vm5477_vm12, %v234_v42, %v3289_v35 }
  0xd3   : > { %2778 = vset.pattern.permute.xlu1 %v2996_v27  ;;  %v3433_v27 = vmul.f32 %v3371_v9, %v237_v17  ;;  %v3436_v28 = vmul.f32 %v3380_v10, %v236_v14 }
  0xd4   : > { %840 = vperm.xlu1 %2778, %v3252_v16   ;;  %v3300_v40 = vpop.permute.xlu1 %272 }
  0xd5   : > { %v3307_v47 = vpop.permute.xlu0 %315 }
  0xd6   : > { %v323_v42 = vrot.slane %v3307_v47, %v3409_v20  ;;  %v3496_v47 = vsel %vm5381_vm8, 1.0, %v5383_v4  ;;  %vm5417_vm8 = vcmp.lt.s32.totalorder %v3304_v45, 111 }
  0xd8   : > { %2781 = vset.pattern.permute.xlu1 %v3004_v43  ;;  %v3302_v44 = vpop.permute.xlu1 %258  ;;  %v5576_v43 = vmov 0 }
  0xd9   : > { %430 = vperm.xlu1 %2781, %v3202_v2   ;;  %v5577_v43 = vsel %vm3479_vm2, 4294967295, %v5576_v43 }
  0xda   : > { %v3318_v53 = vpop.permute.xlu0 %299  ;;  %5578 = vst [vmem:[#allocation19_spill] sm:$0xff] %v5577_v43 }
  0xdc   : > { %v261_v46 = vpop.permute.xlu1 %260 }
  0xdd   : > { %2782 = vset.pattern.permute.xlu1 %v2999_v30  ;;  %v263_v24 = vsel %vm5470_vm0, %v3302_v44, %v261_v46  ;;  %v264_v25 = vsel %vm5470_vm0, %v261_v46, %v3302_v44  ;;  %v3448_v30 = vsel %vm5380_vm6, 1.0, %v5383_v4  ;;  %v246_v44 = vmul.f32 %v3297_v39, %v3433_v27  ;;  %vm445_vm6 = vmand %vm3479_vm2, %vm193_vm10 }
  0xde   : > { %856 = vperm.xlu1 %2782, %v3252_v16   ;;  %v3463_v35 = vmul.f32 %v3404_v18, %v264_v25  ;;  %v3466_v37 = vmul.f32 %v3407_v19, %v263_v24  ;;  %v247_v46 = vmul.f32 %v3297_v39, %v3436_v28  ;;  %v3505_v39 = vsel %vm388_vm15, 1.0, %v5383_v4 }
  0xdf   : > { %v3340_v62 = vpop.permute.xlu0 %360  ;;  %5579 = vst [vmem:[#allocation20_spill] sm:$0xff] %v3505_v39  ;;  %vm5463_vm15 = vcmp.lt.s32.totalorder %v3304_v45, 112 }
  0xe0   : > { %v3314_v50 = vpop.permute.xlu1 %287  ;;  %v275_v60 = vmul.f32 %v3300_v40, %v3463_v35  ;;  %v276_v61 = vmul.f32 %v3300_v40, %v3466_v37 }
  0xe2   : > { %2784 = vset.pattern.permute.xlu1 %v3005_v52  ;;  %v3501_v52 = vsel %vm193_vm10, 1.0, %v5383_v4 }
  0xe3   : > { %473 = vperm.xlu1 %2784, %v3202_v2   ;;  %v325_v2 = vmul.f32 %v323_v42, %v3206_v3 }
  0xe4   : > { %v290_v56 = vpop.permute.xlu1 %289  ;;  %v3383_v11 = vpop.permute.xlu0 %395 }
  0xe5   : > { %v292_v31 = vsel %vm5466_vm3, %v3314_v50, %v290_v56  ;;  %v293_v32 = vsel %vm5466_vm3, %v290_v56, %v3314_v50  ;;  %v223_v56 = vmul.f32 %v3292_v36, %v3457_v33 }
  0xe6   : > { %v3488_v48 = vmul.f32 %v3443_v29, %v293_v32  ;;  %v3491_v50 = vmul.f32 %v3448_v30, %v292_v31 }
  0xe7   : > { %877 = vrot.lane.b32.xlu1 %v871_v57, %s3006_s26  ;;  %v224_v57 = vmul.f32 %v3292_v36, %v3460_v34  ;;  %v248_v7 = vadd.f32 %v246_v44, %v223_v56  ;;  %v327_v44 = vcombine.high %v325_v2, %v325_v2  ;;  %s3041_s26 = smov 30  }
  0xe8   : > { %v3342_v63 = vpop.permute.xlu1 %348  ;;  %v302_v14 = vmul.f32 %v3318_v53, %v3488_v48  ;;  %v303_v17 = vmul.f32 %v3318_v53, %v3491_v50 }
  0xe9   : > { %v3468_v38 = vpop.permute.xlu0 %422  ;;  %v249_v40 = vadd.f32 %v247_v46, %v224_v57  ;;  %v277_v25 = vadd.f32 %v275_v60, %v248_v7  ;;  %v3552_v46 = vsel %vm3479_vm2, 1.0, %v5383_v4 }
  0xea   : > { %5582 = vst [vmem:[#allocation23_spill] sm:$0xff] %v3552_v46 }
  0xeb   : > { %v278_v31 = vadd.f32 %v276_v61, %v249_v40  ;;  %v304_v56 = vadd.f32 %v302_v14, %v277_v25  ;;  %v3588_v25 = vsel %vm444_vm13, 1.0, %v5383_v4  ;;  %vm5457_vm13 = vcmask 31744   ;;  %963 = vrot.lane.b32.xlu1 %v3245_v15, %s3008_s27  ;;  %s3042_s27 = smov 18  }
  0xec   : > { %v351_v8 = vpop.permute.xlu1 %350  ;;  %5583 = vst [vmem:[#allocation24_spill] sm:$0xff] %v3588_v25 }
  0xed   : > { %v353_v5 = vsel %vm5469_vm1, %v3342_v63, %v351_v8  ;;  %v354_v36 = vsel %vm5469_vm1, %v351_v8, %v3342_v63  ;;  %v3541_v8 = vsel %vm3428_vm9, 1.0, %v5383_v4  ;;  %v305_v57 = vadd.f32 %v303_v17, %v278_v31 }
  0xee   : > { %v452_v22 = vpop.permute.xlu0 %451  ;;  %5581 = vst [vmem:[#allocation22_spill] sm:$0xff] %v3541_v8  ;;  %v3544_v32 = vmul.f32 %v3496_v47, %v353_v5  ;;  %v3547_v53 = vmul.f32 %v3501_v52, %v354_v36  ;;  %v329_v17 = vadd.f32 %v325_v2, %v304_v56  ;;  %v3591_v31 = vsel %vm445_vm6, 1.0, %v5383_v4 }
  0xef   : > { %5584 = vst [vmem:[#allocation25_spill] sm:$0xff] %v3591_v31  ;;  %vm5458_vm6 = vcmask 1043456  }
  0xf0   : > { %v382_v21 = vpop.permute.xlu1 %381  ;;  %v363_v5 = vmul.f32 %v3340_v62, %v3544_v32  ;;  %v364_v36 = vmul.f32 %v3340_v62, %v3547_v53 }
  0xf4   : > { %v384_v41 = vpop.permute.xlu1 %383 }
  0xf5   : > { %v386_v24 = vsel %vm5465_vm11, %v382_v21, %v384_v41  ;;  %v387_v63 = vsel %vm5465_vm11, %v384_v41, %v382_v21 }
  0xf6   : > { %v3559_v60 = vmul.f32 %v3505_v39, %v386_v24  ;;  %v3562_v61 = vmul.f32 %v3532_v23, %v387_v63  ;;  %v330_v24 = vadd.f32 %v327_v44, %v305_v57 }
  0xf8   : > { %v411_v1 = vpop.permute.xlu1 %410  ;;  %v398_v62 = vmul.f32 %v3383_v11, %v3559_v60  ;;  %v399_v63 = vmul.f32 %v3383_v11, %v3562_v61 }
  0xfc   : > { %v413_v42 = vpop.permute.xlu1 %412 }
  0xfd   : > { %v415_v21 = vsel %vm5463_vm15, %v411_v1, %v413_v42  ;;  %v416_v41 = vsel %vm5463_vm15, %v413_v42, %v411_v1  ;;  %v468_v1 = vpop.permute.xlu0 %467  ;;  %v365_v42 = vadd.f32 %v363_v5, %v329_v17 }
  0xfe   : > { %v3573_v7 = vmul.f32 %v3541_v8, %v415_v21  ;;  %v3576_v40 = vmul.f32 %v3552_v46, %v416_v41  ;;  %v366_v21 = vadd.f32 %v364_v36, %v330_v24 }
  0xff   : > { %v400_v57 = vadd.f32 %v398_v62, %v365_v42 }
 0x100   : > { %v438_v14 = vpop.permute.xlu1 %437  ;;  %v425_v41 = vmul.f32 %v3468_v38, %v3573_v7  ;;  %v426_v2 = vmul.f32 %v3468_v38, %v3576_v40  ;;  %v401_v36 = vadd.f32 %v399_v63, %v366_v21  ;;  %v5585_v21 = vmov 0.0  }
 0x101   : > { %v3601_v0 = vpop.permute.xlu0 %487 }
 0x102   : > { %v428_v24 = vadd.f32 %v426_v2, %v401_v36  ;;  %v427_v43 = vadd.f32 %v425_v41, %v400_v57 }
 0x104   : > { %v440_v44 = vpop.permute.xlu1 %439 }
 0x105   : > { %v442_v56 = vsel %vm5417_vm8, %v438_v14, %v440_v44  ;;  %v443_v11 = vsel %vm5417_vm8, %v440_v44, %v438_v14  ;;  %v3611_v14 = vpop.permute.xlu0 %604 }
 0x106   : > { %v3604_v4 = vmul.f32 %v3588_v25, %v442_v56  ;;  %v3607_v5 = vmul.f32 %v3591_v31, %v443_v11 }
 0x108   : > { %v454_v17 = vmul.f32 %v452_v22, %v3604_v4  ;;  %v491_v38 = vpop.permute.xlu1 %490  ;;  %v455_v6 = vmul.f32 %v452_v22, %v3607_v5 }
 0x109   : > { %v3619_v22 = vpop.permute.xlu0 %636 }
 0x10a   : > { %v457_v26 = vadd.f32 %v455_v6, %v428_v24  ;;  %v456_v59 = vadd.f32 %v454_v17, %v427_v43 }
 0x10c   : > { %v471_v62 = vadd.f32 %v468_v1, %v457_v26  ;;  %v470_v42 = vadd.f32 %v468_v1, %v456_v59  ;;  %v493_v44 = vpop.permute.xlu1 %492 }
 0x10d   : > { %v3625_v59 = vpop.permute.xlu0 %632 }
 0x10e   : > { %2540 = vmatprep.subr.msk.mxu0 %vm5458_vm6, %v471_v62 }
 0x10f   : > { %2541 = vmatpush1.msk.msra.mxu0 %vm5458_vm6, %v470_v42 }
 0x110   : > { %2542 = vmatmul.mubr.msk.f32.vlgmr.msra.gmra.mxu0 %vm5457_vm13, %v491_v38  ;;  %v3616_v63 = vpop.permute.xlu1 %482 }
 0x111   : > { %576 = vmatprep.mubr.f32.mxu0 %v5585_v21  ;;  %v3629_v43 = vpop.permute.xlu0 %700 }
 0x112   : > { %5587 = vst [vmem:[#allocation27_spill] sm:$0xff] %v3629_v43 }
 0x114   : > { %2543 = vmatmul.mubr.msk.f32.gmra.mxu0 %vm5457_vm13, %v493_v44 }
 0x115   : > { %v3622_v6 = vpop.permute.xlu1 %608  ;;  %2020 = vmatprep.mubr.f32.mxu0 %v5585_v21  ;;  %v3635_v2 = vpop.permute.xlu0 %696 }
 0x119   : > { %v227_v11 = vpop.permute.xlu0 %226 }
 0x11a   : > { %v3627_v26 = vpop.permute.xlu1 %668  ;;  %v229_v51 = vmul.f32 %v227_v11, %v3457_v33  ;;  %v230_v49 = vmul.f32 %v227_v11, %v3460_v34 }
 0x11b   : > { %5586 = vst [vmem:[#allocation26_spill] sm:$0xff] %v3627_v26 }
 0x11d   : > { %v3639_v36 = vpop.permute.xlu0 %748 }
 0x11e   : > { %v3631_v1 = vpop.permute.xlu1 %664  ;;  %5588 = vst [vmem:[#allocation28_spill] sm:$0xff] %v3639_v36 }
 0x121   : > { %v3641_v38 = vpop.permute.xlu0 %744 }
 0x123   : > { %v3633_v41 = vpop.permute.xlu1 %716 }
 0x125   : > { %v308_v62 = vpop.permute.xlu0 %307 }
 0x126   : > { %v311_v33 = vmul.f32 %v308_v62, %v3491_v50 }
 0x128   : > { %v252_v56 = vpop.permute.xlu1 %251 }
 0x129   : > { %v3645_v44 = vpop.permute.xlu0 %776  ;;  %v254_v58 = vmul.f32 %v252_v56, %v3433_v27  ;;  %v255_v55 = vmul.f32 %v252_v56, %v3436_v28 }
 0x12b   : > { %v256_v36 = vadd.f32 %v254_v58, %v229_v51 }
 0x12d   : > { %v3637_v57 = vpop.permute.xlu1 %712  ;;  %v3657_v26 = vpop.permute.xlu0 %844 }
 0x12e   : > { %5591 = vst [vmem:[#allocation31_spill] sm:$0xff] %v3657_v26 }
 0x132   : > { %v281_v17 = vpop.permute.xlu1 %280 }
 0x133   : > { %v283_v21 = vmul.f32 %v281_v17, %v3463_v35  ;;  %v284_v25 = vmul.f32 %v281_v17, %v3466_v37  ;;  %v404_v37 = vpop.permute.xlu0 %403 }
 0x135   : > { %v285_v27 = vadd.f32 %v283_v21, %v256_v36 }
 0x137   : > { %v333_v24 = vpop.permute.xlu1 %332 }
 0x138   : > { %v340_v54 = vrot.slane %v333_v24, %v3409_v20  ;;  %v310_v20 = vmul.f32 %v308_v62, %v3488_v48  ;;  %v3667_v48 = vpop.permute.xlu0 %860 }
 0x139   : > { %5592 = vst [vmem:[#allocation32_spill] sm:$0xff] %v3667_v48 }
 0x13a   : > { %v342_v43 = vmul.f32 %v340_v54, %v3206_v3  ;;  %v312_v35 = vadd.f32 %v310_v20, %v285_v27  ;;  %v406_v54 = vmul.f32 %v404_v37, %v3559_v60 }
 0x13c   : > { %v3643_v42 = vpop.permute.xlu1 %780  ;;  %v344_v34 = vcombine.high %v342_v43, %v342_v43  ;;  %v346_v24 = vadd.f32 %v342_v43, %v312_v35 }
 0x13d   : > { %5589 = vst [vmem:[#allocation29_spill] sm:$0xff] %v3643_v42  ;;  %v257_v42 = vadd.f32 %v255_v55, %v230_v49  ;;  %v407_v55 = vmul.f32 %v404_v37, %v3562_v61 }
 0x13f   : > { %v286_v28 = vadd.f32 %v284_v25, %v257_v42 }
 0x141   : > { %v3654_v31 = vpop.permute.xlu1 %812  ;;  %v313_v11 = vadd.f32 %v311_v33, %v286_v28 }
 0x142   : > { %5590 = vst [vmem:[#allocation30_spill] sm:$0xff] %v3654_v31 }
 0x143   : > { %v347_v51 = vadd.f32 %v344_v34, %v313_v11 }
 0x145   : > { %v3659_v56 = vpop.permute.xlu1 %808 }
 0x14a   : > { %v369_v17 = vpop.permute.xlu1 %368 }
 0x14b   : > { %v371_v49 = vmul.f32 %v369_v17, %v3544_v32  ;;  %v372_v3 = vmul.f32 %v369_v17, %v3547_v53  ;;  %v460_v32 = vpop.permute.xlu0 %459 }
 0x14c   : > { %v462_v61 = vmul.f32 %v460_v32, %v3604_v4  ;;  %v463_v62 = vmul.f32 %v460_v32, %v3607_v5  ;;  %v3014_v32 = vmov 61  }
 0x14d   : > { %v373_v58 = vadd.f32 %v371_v49, %v346_v24  ;;  %v374_v25 = vadd.f32 %v372_v3, %v347_v51  ;;  %v3009_v51 = vmov 56   ;;  %v3010_v3 = vmov 57  }
 0x14e   : > { %2785 = vset.pattern.permute.xlu0 %v3009_v51  ;;  %2786 = vset.pattern.permute.xlu1 %v3009_v51  ;;  %v3020_v51 = vmov 67  }
 0x14f   : > { %v3669_v50 = vpop.permute.xlu1 %840  ;;  %v408_v21 = vadd.f32 %v406_v54, %v373_v58  ;;  %v409_v36 = vadd.f32 %v407_v55, %v374_v25  ;;  %v3011_v55 = vmov 58   ;;  %v3012_v58 = vmov 59  }
 0x150   : > { %5593 = vst [vmem:[#allocation33_spill] sm:$0xff] %v3669_v50  ;;  %v3026_v50 = vmov 73  }
 0x154   : > { %v431_v43 = vpop.permute.xlu1 %430 }
 0x155   : > { %v433_v53 = vmul.f32 %v431_v43, %v3573_v7  ;;  %v434_v60 = vmul.f32 %v431_v43, %v3576_v40 }
 0x157   : > { %v435_v42 = vadd.f32 %v433_v53, %v408_v21  ;;  %v436_v27 = vadd.f32 %v434_v60, %v409_v36  ;;  %v3013_v36 = vmov 60   ;;  %v3015_v53 = vmov 62  }
 0x159   : > { %v3677_v28 = vadd.f32 %v462_v61, %v435_v42  ;;  %v3679_v20 = vadd.f32 %v463_v62, %v436_v27  ;;  %v3787_v62 = vpop.permute.xlu0 %961  ;;  %v3016_v42 = vmov 63   ;;  %v3017_v27 = vmov 64  }
 0x15a   : > { %5600 = vst [vmem:[#allocation40_spill] sm:$0xff] %v3787_v62 }
 0x15b   : > { %5594 = vst [vmem:[#allocation34_spill] sm:$0xff] %v3677_v28  ;;  %5595 = vst [vmem:[#allocation35_spill] sm:$0xff] %v3679_v20 }
 0x1d0   : > { %v572_v33 = vpop.f32.mrf.mxu0 }
 0x1d1   : > { %v573_v34 = vadd.f32 %v572_v33, %v3616_v63 }
 0x1d2   : > { %v574_v35 = vpop.f32.mrf.mxu0 }
 0x1d3   : > { %v3682_v11 = vmax.f32 %v573_v34, 0.0  ;;  %v575_v7 = vadd.f32 %v574_v35, %v3616_v63  ;;  %v3018_v35 = vmov 65  }
 0x1d4   : > { %v578_v4 = vpop.f32.mrf.mxu0 }
 0x1d5   : > { %v3685_v37 = vmax.f32 %v575_v7, 0.0  ;;  %587 = vrot.lane.b32.xlu1 %v3682_v11, %s2967_s15  ;;  %v579_v40 = vadd.f32 %v578_v4, %v3601_v0 }
 0x1d6   : > { %v580_v63 = vpop.f32.mrf.mxu0 }
 0x1d7   : > { %591 = vrot.lane.b32.xlu0 %v3685_v37, %s2967_s15  ;;  %v3708_v5 = vmax.f32 %v579_v40, 0.0  ;;  %v581_v17 = vadd.f32 %v580_v63, %v3601_v0  ;;  %v3757_v0 = vpop.permute.xlu1 %856 }
 0x1d8   : > { %5596 = vst [vmem:[#allocation36_spill] sm:$0xff] %v3757_v0 }
 0x1d9   : > { %615 = vrot.lane.b32.xlu1 %v3682_v11, %s2970_s17  ;;  %v3721_v24 = vmax.f32 %v581_v17, 0.0  ;;  %v3019_v17 = vmov 66  }
 0x1db   : > { %619 = vrot.lane.b32.xlu0 %v3685_v37, %s2970_s17  ;;  %v3761_v49 = vpop.permute.xlu1 %473 }
 0x1dc   : > { %5597 = vst [vmem:[#allocation37_spill] sm:$0xff] %v3761_v49 }
 0x1dd   : > { %647 = vrot.lane.b32.xlu1 %v3682_v11, %s2972_s8 }
 0x1df   : > { %683 = vrot.lane.b32.xlu0 %v3685_v37, %s2976_s18  ;;  %v3765_v54 = vpop.permute.xlu1 %877 }
 0x1e0   : > { %5598 = vst [vmem:[#allocation38_spill] sm:$0xff] %v3765_v54  ;;  %v3024_v54 = vmov 71  }
 0x1e1   : > { %679 = vrot.lane.b32.xlu1 %v3682_v11, %s2976_s18 }
 0x1e3   : > { %763 = vrot.lane.b32.xlu0 %v3685_v37, %s5442_s20  ;;  %v3769_v25 = vpop.permute.xlu1 %963 }
 0x1e4   : > { %5599 = vst [vmem:[#allocation39_spill] sm:$0xff] %v3769_v25 }
 0x1e5   : > { %727 = vrot.lane.b32.xlu1 %v3682_v11, %s5434_s19 }
 0x1e7   : > { %795 = vrot.lane.b32.xlu0 %v3685_v37, %s5427_s23 }
 0x1e9   : > { %759 = vrot.lane.b32.xlu1 %v3682_v11, %s5442_s20 }
 0x1eb   : > { %681 = vrot.lane.b32.xlu0 %v3708_v5, %s2976_s18 }
 0x1ed   : > { %791 = vrot.lane.b32.xlu1 %v3682_v11, %s5427_s23 }
 0x1ef   : > { %729 = vrot.lane.b32.xlu0 %v3708_v5, %s5434_s19 }
 0x1f1   : > { %823 = vrot.lane.b32.xlu1 %v3682_v11, %s5452_s24 }
 0x1f3   : > { %761 = vrot.lane.b32.xlu0 %v3708_v5, %s5442_s20 }
 0x1f5   : > { %651 = vrot.lane.b32.xlu1 %v3685_v37, %s2972_s8 }
 0x1f7   : > { %653 = vrot.lane.b32.xlu0 %v3721_v24, %s2972_s8 }
 0x1f9   : > { %731 = vrot.lane.b32.xlu1 %v3685_v37, %s5434_s19 }
 0x1fb   : > { %797 = vrot.lane.b32.xlu0 %v3721_v24, %s5427_s23 }
 0x1fd   : > { %827 = vrot.lane.b32.xlu1 %v3685_v37, %s5452_s24 }
 0x1ff   : > { %829 = vrot.lane.b32.xlu0 %v3721_v24, %s5452_s24 }
 0x201   : > { %589 = vrot.lane.b32.xlu1 %v3708_v5, %s2967_s15 }
 0x203   : > { %958 = vperm.xlu0 %2785, %v3245_v15  }
 0x205   : > { %617 = vrot.lane.b32.xlu1 %v3708_v5, %s2970_s17 }
 0x207   : > { %2788 = vset.pattern.permute.xlu0 %v3010_v3 }
 0x208   : > { %1096 = vperm.xlu0 %2788, %v3252_v16  }
 0x209   : > { %649 = vrot.lane.b32.xlu1 %v3708_v5, %s2972_s8 }
 0x20c   : > { %2789 = vset.pattern.permute.xlu0 %v3011_v55 }
 0x20d   : > { %793 = vrot.lane.b32.xlu1 %v3708_v5, %s5427_s23  ;;  %1133 = vperm.xlu0 %2789, %v3245_v15  }
 0x211   : > { %825 = vrot.lane.b32.xlu1 %v3708_v5, %s5452_s24  ;;  %1129 = vperm.xlu0 %2789, %v3252_v16  }
 0x215   : > { %593 = vrot.lane.b32.xlu1 %v3721_v24, %s2967_s15  ;;  %2791 = vset.pattern.permute.xlu0 %v3013_v36 }
 0x216   : > { %1205 = vperm.xlu0 %2791, %v3245_v15  }
 0x219   : > { %621 = vrot.lane.b32.xlu1 %v3721_v24, %s2970_s17 }
 0x21a   : > { %1201 = vperm.xlu0 %2791, %v3252_v16  }
 0x21d   : > { %685 = vrot.lane.b32.xlu1 %v3721_v24, %s2976_s18 }
 0x21e   : > { %2793 = vset.pattern.permute.xlu0 %v3014_v32 }
 0x21f   : > { %1238 = vperm.xlu0 %2793, %v3252_v16  }
 0x221   : > { %733 = vrot.lane.b32.xlu1 %v3721_v24, %s5434_s19 }
 0x223   : > { %2795 = vset.pattern.permute.xlu0 %v3016_v42  ;;  %v3022_v42 = vmov 69  }
 0x224   : > { %1311 = vperm.xlu0 %2795, %v3245_v15  }
 0x225   : > { %765 = vrot.lane.b32.xlu1 %v3721_v24, %s5442_s20 }
 0x228   : > { %1307 = vperm.xlu0 %2795, %v3252_v16  }
 0x229   : > { %954 = vperm.xlu1 %2786, %v3252_v16  }
 0x22c   : > { %2797 = vset.pattern.permute.xlu0 %v3017_v27 }
 0x22d   : > { %2787 = vset.pattern.permute.xlu1 %v3010_v3  ;;  %1339 = vperm.xlu0 %2797, %v3252_v16  }
 0x22e   : > { %1100 = vperm.xlu1 %2787, %v3245_v15  }
 0x231   : > { %2799 = vset.pattern.permute.xlu0 %v3019_v17 }
 0x232   : > { %2790 = vset.pattern.permute.xlu1 %v3012_v58  ;;  %1412 = vperm.xlu0 %2799, %v3245_v15   ;;  %v3021_v58 = vmov 68  }
 0x233   : > { %1168 = vperm.xlu1 %2790, %v3245_v15  }
 0x236   : > { %1408 = vperm.xlu0 %2799, %v3252_v16  }
 0x237   : > { %1164 = vperm.xlu1 %2790, %v3252_v16  }
 0x23a   : > { %2801 = vset.pattern.permute.xlu0 %v3020_v51 }
 0x23b   : > { %2792 = vset.pattern.permute.xlu1 %v3014_v32  ;;  %1443 = vperm.xlu0 %2801, %v3252_v16  }
 0x23c   : > { %1242 = vperm.xlu1 %2792, %v3245_v15  }
 0x23f   : > { %2803 = vset.pattern.permute.xlu0 %v3022_v42 }
 0x240   : > { %2794 = vset.pattern.permute.xlu1 %v3015_v53  ;;  %1495 = vperm.xlu0 %2803, %v3245_v15  }
 0x241   : > { %1279 = vperm.xlu1 %2794, %v3245_v15  }
 0x244   : > { %1491 = vperm.xlu0 %2803, %v3252_v16  }
 0x245   : > { %1275 = vperm.xlu1 %2794, %v3252_v16  }
 0x247   : > { %v3773_v21 = vpop.permute.xlu1 %587 }
 0x249   : > { %2796 = vset.pattern.permute.xlu1 %v3017_v27  ;;  %v592_v34 = vpop.permute.xlu0 %591 }
 0x24a   : > { %1343 = vperm.xlu1 %2796, %v3245_v15   ;;  %v595_v42 = vsel %vm5474_vm14, %v3773_v21, %v592_v34  ;;  %v597_v48 = vsel %vm5474_vm14, %v592_v34, %v3773_v21 }
 0x24b   : > { %v3777_v43 = vpop.permute.xlu1 %615  ;;  %v600_v20 = vmul.f32 %v595_v42, %v3393_v13  ;;  %v599_v21 = vmul.f32 %v597_v48, %v3390_v12 }
 0x24d   : > { %v620_v40 = vpop.permute.xlu0 %619  ;;  %v612_v34 = vmul.f32 %v3611_v14, %v600_v20  ;;  %v611_v20 = vmul.f32 %v3611_v14, %v599_v21 }
 0x24e   : > { %2798 = vset.pattern.permute.xlu1 %v3018_v35  ;;  %v3023_v35 = vmov 70   ;;  %v625_v49 = vsel %vm5477_vm12, %v620_v40, %v3777_v43 }
 0x24f   : > { %v3781_v60 = vpop.permute.xlu1 %647  ;;  %1375 = vperm.xlu1 %2798, %v3245_v15   ;;  %2805 = vset.pattern.permute.xlu0 %v3023_v35  ;;  %v627_v26 = vmul.f32 %v625_v49, %v3371_v9  ;;  %v3025_v49 = vmov 72  }
 0x250   : > { %1523 = vperm.xlu0 %2805, %v3252_v16  }
 0x251   : > { %v684_v3 = vpop.permute.xlu0 %683 }
 0x253   : > { %v3785_v61 = vpop.permute.xlu1 %679  ;;  %1371 = vperm.xlu1 %2798, %v3252_v16  }
 0x254   : > { %2807 = vset.pattern.permute.xlu0 %v3025_v49  ;;  %v689_v48 = vsel %vm5466_vm3, %v684_v3, %v3785_v61 }
 0x255   : > { %v764_v32 = vpop.permute.xlu0 %763  ;;  %1599 = vperm.xlu0 %2807, %v3245_v15   ;;  %v691_v14 = vmul.f32 %v689_v48, %v3443_v29 }
 0x257   : > { %v3791_v33 = vpop.permute.xlu1 %727  ;;  %2800 = vset.pattern.permute.xlu1 %v3020_v51  ;;  %v623_v51 = vsel %vm5477_vm12, %v3777_v43, %v620_v40 }
 0x258   : > { %1447 = vperm.xlu1 %2800, %v3245_v15   ;;  %v628_v28 = vmul.f32 %v623_v51, %v3380_v10 }
 0x259   : > { %v3813_v27 = vpop.permute.xlu0 %795  ;;  %1595 = vperm.xlu0 %2807, %v3252_v16  }
 0x25a   : > { %v640_v43 = vmul.f32 %v3625_v59, %v628_v28  ;;  %v639_v28 = vmul.f32 %v3625_v59, %v627_v26 }
 0x25b   : > { %v3794_v7 = vpop.permute.xlu1 %759 }
 0x25c   : > { %2802 = vset.pattern.permute.xlu1 %v3021_v58  ;;  %v644_v42 = vadd.f32 %v640_v43, %v612_v34  ;;  %v769_v43 = vsel %vm5465_vm11, %v764_v32, %v3794_v7 }
 0x25d   : > { %1479 = vperm.xlu1 %2802, %v3245_v15   ;;  %v3822_v58 = vpop.permute.xlu0 %681  ;;  %v772_v34 = vmul.f32 %v769_v43, %v3532_v23  ;;  %2809 = vset.pattern.permute.xlu0 %v3026_v50 }
 0x25f   : > { %v3797_v4 = vpop.permute.xlu1 %791 }
 0x261   : > { %1475 = vperm.xlu1 %2802, %v3252_v16   ;;  %v3849_v40 = vpop.permute.xlu0 %729 }
 0x263   : > { %v3801_v63 = vpop.permute.xlu1 %823 }
 0x265   : > { %2804 = vset.pattern.permute.xlu1 %v3023_v35  ;;  %v3872_v59 = vpop.permute.xlu0 %761 }
 0x266   : > { %1527 = vperm.xlu1 %2804, %v3245_v15  }
 0x267   : > { %v652_v55 = vpop.permute.xlu1 %651 }
 0x268   : > { %v655_v25 = vsel %vm5470_vm0, %v3781_v60, %v652_v55 }
 0x269   : > { %v660_v0 = vmul.f32 %v655_v25, %v3407_v19  ;;  %v687_v25 = vsel %vm5466_vm3, %v3785_v61, %v684_v3  ;;  %v719_v61 = vmul.f32 %v3637_v57, %v3682_v11  ;;  %v3894_v11 = vmul.f32 %v3633_v41, %v3708_v5 }
 0x26a   : > { %2806 = vset.pattern.permute.xlu1 %v3024_v54  ;;  %v657_v54 = vsel %vm5470_vm0, %v652_v55, %v3781_v60  ;;  %v692_v31 = vmul.f32 %v687_v25, %v3448_v30 }
 0x26b   : > { %v3807_v36 = vpop.permute.xlu1 %731  ;;  %1562 = vperm.xlu1 %2806, %v3245_v15   ;;  %v659_v60 = vmul.f32 %v657_v54, %v3404_v18  ;;  %v672_v55 = vmul.f32 %v3631_v1, %v660_v0  ;;  %v767_v0 = vsel %vm5465_vm11, %v3794_v7, %v764_v32  ;;  %v720_v7 = vmul.f32 %v3637_v57, %v3685_v37  ;;  %v3905_v57 = vld [vmem:[#allocation5 + $0x10] sm:$0xff] }
 0x26c   : > { %v704_v25 = vmul.f32 %v3635_v2, %v692_v31  ;;  %v771_v21 = vmul.f32 %v767_v0, %v3505_v39  ;;  %v3898_v32 = vmul.f32 %v3633_v41, %v3721_v24  ;;  %v3027_v31 = vmov 74   ;;  %v654_v24 = vpop.permute.xlu0 %653  ;;  %v3924_v0 = vld [vmem:[#allocation5] sm:$0xff] }
 0x26d   : > { %v671_v26 = vmul.f32 %v3631_v1, %v659_v60  ;;  %v676_v54 = vadd.f32 %v672_v55, %v644_v42  ;;  %v737_v1 = vsel %vm5469_vm1, %v3807_v36, %v3791_v33  ;;  %v703_v41 = vmul.f32 %v3635_v2, %v691_v14  ;;  %1627 = vperm.xlu0 %2809, %v3924_v0  }
 0x26e   : > { %v740_v37 = vmul.f32 %v737_v1, %v3501_v52  ;;  %v3917_v42 = vmul.f32 %v3645_v44, %v771_v21 }
 0x26f   : > { %v3811_v53 = vpop.permute.xlu1 %827  ;;  %1558 = vperm.xlu1 %2806, %v3252_v16   ;;  %v799_v16 = vsel %vm5463_vm15, %v3797_v4, %v3813_v27  ;;  %v708_v55 = vadd.f32 %v704_v25, %v676_v54 }
 0x270   : > { %v803_v48 = vmul.f32 %v799_v16, %v3541_v8  ;;  %v752_v43 = vmul.f32 %v3641_v38, %v740_v37 }
 0x271   : > { %v724_v54 = vadd.f32 %v720_v7, %v708_v55  ;;  %v3029_v55 = vmov 76  }
 0x273   : > { %v3816_v17 = vpop.permute.xlu1 %589  ;;  %2808 = vset.pattern.permute.xlu1 %v3026_v50  ;;  %v801_v50 = vsel %vm5463_vm15, %v3813_v27, %v3797_v4 }
 0x274   : > { %1631 = vperm.xlu1 %2808, %v3245_v15   ;;  %v643_v15 = vadd.f32 %v639_v28, %v611_v20 }
 0x276   : > { %v675_v60 = vadd.f32 %v671_v26, %v643_v15  ;;  %v784_v26 = vmul.f32 %v3645_v44, %v772_v34 }
 0x277   : > { %v3831_v62 = vpop.permute.xlu1 %617 }
 0x278   : > { %2810 = vset.pattern.permute.xlu1 %v3027_v31  ;;  %v3028_v31 = vmov 75  }
 0x279   : > { %1663 = vperm.xlu1 %2810, %v3905_v57   ;;  %2811 = vset.pattern.permute.xlu0 %v3028_v31 }
 0x27a   : > { %1695 = vperm.xlu0 %2811, %v3905_v57  }
 0x27b   : > { %v650_v51 = vpop.permute.xlu1 %649 }
 0x27c   : > { %v656_v20 = vsel %vm5470_vm0, %v650_v51, %v654_v24  ;;  %v658_v2 = vsel %vm5470_vm0, %v654_v24, %v650_v51  ;;  %v735_v51 = vsel %vm5469_vm1, %v3791_v33, %v3807_v36  ;;  %v804_v33 = vmul.f32 %v801_v50, %v3552_v46 }
 0x27d   : > { %1659 = vperm.xlu1 %2810, %v3924_v0   ;;  %v661_v25 = vmul.f32 %v658_v2, %v3404_v18  ;;  %v662_v4 = vmul.f32 %v656_v20, %v3407_v19  ;;  %v3950_v36 = vmul.f32 %v3659_v56, %v803_v48  ;;  %v739_v16 = vmul.f32 %v735_v51, %v3496_v47 }
 0x27e   : > { %1691 = vperm.xlu0 %2811, %v3924_v0  }
 0x27f   : > { %v3859_v35 = vpop.permute.xlu1 %793  ;;  %v751_v51 = vmul.f32 %v3641_v38, %v739_v16  ;;  %v3030_v38 = vmov 77  }
 0x281   : > { %2812 = vset.pattern.permute.xlu1 %v3029_v55 }
 0x282   : > { %1732 = vperm.xlu1 %2812, %v3905_v57   ;;  %2813 = vset.pattern.permute.xlu0 %v3029_v55 }
 0x283   : > { %v3880_v3 = vpop.permute.xlu1 %825  ;;  %1728 = vperm.xlu0 %2813, %v3924_v0  }
 0x286   : > { %2814 = vset.pattern.permute.xlu1 %v3030_v38 }
 0x287   : > { %v594_v5 = vpop.permute.xlu1 %593  ;;  %1775 = vperm.xlu1 %2814, %v3905_v57  }
 0x288   : > { %v596_v49 = vsel %vm5474_vm14, %v3816_v17, %v594_v5  ;;  %v598_v28 = vsel %vm5474_vm14, %v594_v5, %v3816_v17  ;;  %v707_v17 = vadd.f32 %v703_v41, %v675_v60  ;;  %v756_v60 = vadd.f32 %v752_v43, %v724_v54 }
 0x289   : > { %v601_v15 = vmul.f32 %v598_v28, %v3390_v12  ;;  %v602_v44 = vmul.f32 %v596_v49, %v3393_v13  ;;  %v816_v54 = vmul.f32 %v3659_v56, %v804_v33  ;;  %v831_v43 = vsel %vm5417_vm8, %v3801_v63, %v3811_v53 }
 0x28a   : > { %v723_v34 = vadd.f32 %v719_v61, %v707_v17  ;;  %v5601_v61 = vld [vmem:[#allocation26_spill] sm:$0xff] }
 0x28b   : > { %v622_v14 = vpop.permute.xlu1 %621  ;;  %v613_v37 = vmul.f32 %v3622_v6, %v601_v15  ;;  %v614_v5 = vmul.f32 %v3622_v6, %v602_v44  ;;  %v673_v28 = vmul.f32 %v5601_v61, %v661_v25  ;;  %v674_v48 = vmul.f32 %v5601_v61, %v662_v4  ;;  %1771 = vperm.xlu1 %2814, %v3924_v0  }
 0x28c   : > { %v624_v27 = vsel %vm5477_vm12, %v3831_v62, %v622_v14  ;;  %v626_v1 = vsel %vm5477_vm12, %v622_v14, %v3831_v62  ;;  %v798_v62 = vpop.permute.xlu0 %797  ;;  %v5602_v14 = vld [vmem:[#allocation27_spill] sm:$0xff] }
 0x28d   : > { %v629_v21 = vmul.f32 %v626_v1, %v3371_v9  ;;  %v630_v7 = vmul.f32 %v624_v27, %v3380_v10  ;;  %v755_v27 = vadd.f32 %v751_v51, %v723_v34  ;;  %v800_v34 = vsel %vm5463_vm15, %v3859_v35, %v798_v62  ;;  %v5606_v51 = vld [vmem:[#allocation29_spill] sm:$0xff] }
 0x28e   : > { %v805_v55 = vmul.f32 %v800_v34, %v3541_v8 }
 0x28f   : > { %v641_v41 = vmul.f32 %v3619_v22, %v629_v21  ;;  %v642_v24 = vmul.f32 %v3619_v22, %v630_v7  ;;  %v686_v49 = vpop.permute.xlu1 %685 }
 0x290   : > { %v688_v20 = vsel %vm5466_vm3, %v3822_v58, %v686_v49  ;;  %v690_v2 = vsel %vm5466_vm3, %v686_v49, %v3822_v58  ;;  %v833_v58 = vsel %vm5417_vm8, %v3811_v53, %v3801_v63  ;;  %v788_v53 = vadd.f32 %v784_v26, %v756_v60  ;;  %v830_v33 = vpop.permute.xlu0 %829 }
 0x291   : > { %v645_v6 = vadd.f32 %v641_v41, %v613_v37  ;;  %v646_v50 = vadd.f32 %v642_v24, %v614_v5  ;;  %v693_v17 = vmul.f32 %v690_v2, %v3443_v29  ;;  %v694_v22 = vmul.f32 %v688_v20, %v3448_v30  ;;  %v5603_v5 = vld [vmem:[#allocation28_spill] sm:$0xff] }
 0x292   : > { %v802_v37 = vsel %vm5463_vm15, %v798_v62, %v3859_v35  ;;  %v834_v26 = vsel %vm5417_vm8, %v830_v33, %v3880_v3  ;;  %v5604_v35 = vld [vmem:[#allocation25_spill] sm:$0xff]  ;;  %v5605_v2 = vld [vmem:[#allocation24_spill] sm:$0xff] }
 0x293   : > { %v677_v15 = vadd.f32 %v673_v28, %v645_v6  ;;  %v678_v44 = vadd.f32 %v674_v48, %v646_v50  ;;  %v705_v25 = vmul.f32 %v5602_v14, %v693_v17  ;;  %v706_v56 = vmul.f32 %v5602_v14, %v694_v22  ;;  %v734_v4 = vpop.permute.xlu1 %733  ;;  %v5607_v14 = vld [vmem:[#allocation33_spill] sm:$0xff] }
 0x294   : > { %v736_v1 = vsel %vm5469_vm1, %v3849_v40, %v734_v4  ;;  %v738_v63 = vsel %vm5469_vm1, %v734_v4, %v3849_v40  ;;  %v832_v40 = vsel %vm5417_vm8, %v3880_v3, %v830_v33  ;;  %v836_v62 = vmul.f32 %v833_v58, %v5604_v35  ;;  %v5608_v4 = vld [vmem:[#allocation30_spill] sm:$0xff] }
 0x295   : > { %v709_v21 = vadd.f32 %v705_v25, %v677_v15  ;;  %v710_v7 = vadd.f32 %v706_v56, %v678_v44  ;;  %v741_v31 = vmul.f32 %v736_v1, %v3496_v47  ;;  %v742_v16 = vmul.f32 %v738_v63, %v3501_v52 }
 0x296   : > { %v835_v6 = vmul.f32 %v831_v43, %v5605_v2  ;;  %v837_v50 = vmul.f32 %v832_v40, %v5605_v2  ;;  %v838_v17 = vmul.f32 %v834_v26, %v5604_v35  ;;  %v820_v22 = vadd.f32 %v816_v54, %v788_v53  ;;  %v5610_v26 = vld [vmem:[#allocation32_spill] sm:$0xff] }
 0x297   : > { %v725_v60 = vadd.f32 %v3894_v11, %v709_v21  ;;  %v753_v41 = vmul.f32 %v5603_v5, %v741_v31  ;;  %v754_v24 = vmul.f32 %v5603_v5, %v742_v16  ;;  %v766_v49 = vpop.permute.xlu1 %765  ;;  %v726_v61 = vadd.f32 %v3898_v32, %v710_v7  ;;  %v5609_v21 = vld [vmem:[#allocation31_spill] sm:$0xff] }
 0x298   : > { %v768_v28 = vsel %vm5465_vm11, %v3872_v59, %v766_v49  ;;  %v770_v3 = vsel %vm5465_vm11, %v766_v49, %v3872_v59  ;;  %v787_v11 = vadd.f32 %v3917_v42, %v755_v27  ;;  %v806_v32 = vmul.f32 %v802_v37, %v3552_v46 }
 0x299   : > { %v773_v48 = vmul.f32 %v768_v28, %v3505_v39  ;;  %v774_v20 = vmul.f32 %v770_v3, %v3532_v23  ;;  %v757_v59 = vadd.f32 %v753_v41, %v725_v60  ;;  %v758_v15 = vadd.f32 %v754_v24, %v726_v61  ;;  %v5611_v41 = vld [vmem:[#allocation36_spill] sm:$0xff] }
 0x29a   : > { %v3031_v44 = vmov 78   ;;  %v848_v25 = vmul.f32 %v5607_v14, %v836_v62  ;;  %v819_v56 = vadd.f32 %v3950_v36, %v787_v11  ;;  %v3032_v43 = vmov 79   ;;  %v5612_v11 = vld [vmem:[#allocation35_spill] sm:$0xff] }
 0x29b   : > { %v785_v42 = vmul.f32 %v5606_v51, %v773_v48  ;;  %v786_v58 = vmul.f32 %v5606_v51, %v774_v20  ;;  %2815 = vset.pattern.permute.xlu0 %v3031_v44  ;;  %2816 = vset.pattern.permute.xlu1 %v3032_v43  ;;  %v817_v38 = vmul.f32 %v5608_v4, %v805_v55  ;;  %v3033_v40 = vmov 80   ;;  %v5613_v55 = vld [vmem:[#allocation37_spill] sm:$0xff]  ;;  %v5614_v20 = vld [vmem:[#allocation34_spill] sm:$0xff] }
 0x29c   : > { %1812 = vperm.xlu0 %2815, %v3905_v57   ;;  %v818_v54 = vmul.f32 %v5608_v4, %v806_v32  ;;  %1847 = vperm.xlu1 %2816, %v3905_v57   ;;  %v847_v63 = vmul.f32 %v5607_v14, %v835_v6  ;;  %v852_v53 = vadd.f32 %v848_v25, %v820_v22  ;;  %vm5462_vm8 = vcmask 130048   ;;  %v5617_v22 = vld [vmem:[#allocation40_spill] sm:$0xff] }
 0x29d   : > { %v790_v27 = vadd.f32 %v786_v58, %v758_v15  ;;  %v789_v1 = vadd.f32 %v785_v42, %v757_v59  ;;  %v850_v7 = vmul.f32 %v5609_v21, %v838_v17  ;;  %v849_v36 = vmul.f32 %v5609_v21, %v837_v50  ;;  %v5615_v50 = vld [vmem:[#allocation38_spill] sm:$0xff]  ;;  %v5618_v59 = vld [vmem:[#allocation39_spill] sm:$0xff] }
 0x29e   : > { %v851_v16 = vadd.f32 %v847_v63, %v819_v56  ;;  %v864_v24 = vadd.f32 %v5611_v41, %v852_v53  ;;  %v477_v32 = vadd.f32 %v5613_v55, %v5612_v11  ;;  %v3034_v48 = vmov 81  }
 0x29f   : > { %v822_v33 = vadd.f32 %v818_v54, %v790_v27  ;;  %v821_v31 = vadd.f32 %v817_v38, %v789_v1  ;;  %v476_v6 = vadd.f32 %v5613_v55, %v5614_v20  ;;  %v5616_v17 = vmov 0.0  }
 0x2a0   : > { %1808 = vperm.xlu0 %2815, %v3924_v0   ;;  %2818 = vset.pattern.permute.xlu1 %v3033_v40  ;;  %v863_v49 = vadd.f32 %v5611_v41, %v851_v16  ;;  %v868_v28 = vmax.f32 %v864_v24, 0.0 }
 0x2a1   : > { %v854_v34 = vadd.f32 %v850_v7, %v822_v33  ;;  %v853_v37 = vadd.f32 %v849_v36, %v821_v31  ;;  %1884 = vperm.xlu1 %2818, %v3905_v57  }
 0x2a2   : > { %v867_v3 = vmax.f32 %v863_v49, 0.0 }
 0x2a3   : > { %v866_v60 = vadd.f32 %v5610_v26, %v854_v34  ;;  %v865_v5 = vadd.f32 %v5610_v26, %v853_v37 }
 0x2a4   : > { %2817 = vset.pattern.permute.xlu0 %v3032_v43  ;;  %v955_v15 = vpop.permute.xlu1 %954 }
 0x2a5   : > { %v870_v61 = vmax.f32 %v866_v60, 0.0  ;;  %v869_v62 = vmax.f32 %v865_v5, 0.0  ;;  %1843 = vperm.xlu0 %2817, %v3924_v0   ;;  %1880 = vperm.xlu1 %2818, %v3924_v0  }
 0x2a7   : > { %910 = vmatprep.subr.mxu1 %v870_v61 }
 0x2a8   : > { %911 = vmatpush1.msra.mxu1 %v869_v62 }
 0x2a9   : > { %912 = vmatprep.subr.mxu1 %v868_v28  ;;  %2819 = vset.pattern.permute.xlu0 %v3034_v48  ;;  %v4069_v44 = vpop.permute.xlu1 %1100 }
 0x2aa   : > { %913 = vmatpush1.msra.mxu1 %v867_v3  ;;  %1921 = vperm.xlu0 %2819, %v3905_v57   ;;  %v4061_v57 = vpop.permute.xlu0 %958  ;;  %5620 = vst [vmem:[#allocation27_spill] sm:$0xff] %v4069_v44 }
 0x2ab   : > { %2544 = vmatmul.mubr.msk.f32.vlgmr.msra.gmra.mxu1 %vm5462_vm8, %v5615_v50  ;;  %2545 = vmatprep.subr.msk.mxu1 %vm5458_vm6, %v477_v32 }
 0x2ac   : > { %2546 = vmatpush1.msk.msra.mxu1 %vm5458_vm6, %v476_v6  ;;  %1039 = vmatprep.mubr.f32.mxu1 %v5616_v17 }
 0x2ad   : > { %2577 = vmatprep.subr.mxu1 %v5616_v17 }
 0x2ae   : > { %v4063_v51 = vpop.permute.xlu0 %1096  ;;  %v4073_v25 = vpop.permute.xlu1 %1168 }
 0x2af   : > { %2547 = vmatmul.mubr.msk.f32.vlgmr.msra.gmra.mxu1 %vm5457_vm13, %v5617_v22  ;;  %5622 = vst [vmem:[#allocation29_spill] sm:$0xff] %v4073_v25 }
 0x2b0   : > { %1045 = vmatprep.mubr.f32.mxu1 %v5616_v17 }
 0x2b2   : > { %v4065_v42 = vpop.permute.xlu0 %1133  ;;  %v4081_v38 = vpop.permute.xlu1 %1164 }
 0x2b3   : > { %2548 = vmatmul.mubr.msk.f32.gmra.mxu1 %vm5457_vm13, %v5618_v59  ;;  %5619 = vst [vmem:[#allocation26_spill] sm:$0xff] %v4065_v42  ;;  %v5671_v42 = vld [vmem:[#allocation15_spill] sm:$0xff] }
 0x2b4   : > { %vm1057_vm1 = vcmp.ge.s32.totalorder %v5671_v42, 2 }
 0x2b6   : > { %v4067_v58 = vpop.permute.xlu0 %1129 }
 0x2b7   : > { %v4087_v53 = vpop.permute.xlu1 %1242 }
 0x2b8   : > { %5625 = vst [vmem:[#allocation31_spill] sm:$0xff] %v4087_v53  ;;  %v5668_v53 = vld [vmem:[#allocation14_spill] sm:$0xff] }
 0x2b9   : > { %vm1056_vm11 = vcmp.ge.s32.totalorder %v5668_v53, 2 }
 0x2ba   : > { %v4071_v14 = vpop.permute.xlu0 %1205 }
 0x2bb   : > { %5621 = vst [vmem:[#allocation28_spill] sm:$0xff] %v4071_v14 }
 0x2bc   : > { %v4099_v21 = vpop.permute.xlu1 %1279 }
 0x2bd   : > { %5627 = vst [vmem:[#allocation36_spill] sm:$0xff] %v4099_v21  ;;  %v5667_v21 = vld [vmem:[#allocation13_spill] sm:$0xff] }
 0x2be   : > { %v4075_v56 = vpop.permute.xlu0 %1201  ;;  %vm1069_vm8 = vcmp.ge.s32.totalorder %v5667_v21, 2  ;;  %vm1071_vm15 = vcmp.lt.s32.totalorder %v5667_v21, 18 }
 0x2bf   : > { %vm4338_vm0 = vmand %vm1069_vm8, %vm1071_vm15  ;;  %vm5499_vm8 = vcmp.lt.s32.totalorder %v3304_v45, 34 }
 0x2c0   : > { %v4107_v31 = vpop.permute.xlu1 %1275  ;;  %vm1088_vm15 = vmand %vm4338_vm0, %vm1057_vm1 }
 0x2c2   : > { %v4083_v54 = vpop.permute.xlu0 %1238 }
 0x2c5   : > { %v4115_v16 = vpop.permute.xlu1 %1343 }
 0x2c6   : > { %v4093_v33 = vpop.permute.xlu0 %1311  ;;  %5628 = vst [vmem:[#allocation35_spill] sm:$0xff] %v4115_v16  ;;  %v5665_v16 = vld [vmem:[#allocation12_spill] sm:$0xff] }
 0x2c7   : > { %5626 = vst [vmem:[#allocation32_spill] sm:$0xff] %v4093_v33  ;;  %vm1068_vm13 = vcmp.ge.s32.totalorder %v5665_v16, 2  ;;  %vm1070_vm6 = vcmp.lt.s32.totalorder %v5665_v16, 18 }
 0x2c8   : > { %vm4333_vm3 = vmand %vm1068_vm13, %vm1070_vm6  ;;  %vm5675_vm13 = vcmp.ge.s32.totalorder %v5671_v42, 1 }
 0x2c9   : > { %vm1087_vm14 = vmand %vm4333_vm3, %vm1056_vm11 }
 0x2ca   : > { %v4101_v7 = vpop.permute.xlu0 %1307  ;;  %v4127_v26 = vpop.permute.xlu1 %1375  ;;  %vm1120_vm6 = vmand %vm4333_vm3, %vm5482_vm4  ;;  %vm5496_vm4 = vcmp.lt.s32.totalorder %v3304_v45, 33 }
 0x2cb   : > { %5630 = vst [vmem:[#allocation34_spill] sm:$0xff] %v4127_v26  ;;  %vm1121_vm12 = vmand %vm4338_vm0, %vm5675_vm13  ;;  %v4384_v35 = vsel %vm1120_vm6, 1.0, %v5616_v17  ;;  %vm1152_vm13 = vcmp.lt.s32.totalorder %v3304_v45, 32 }
 0x2cc   : > { %5678 = vst [vmem:[#allocation69_spill] sm:$0xff] %v4384_v35  ;;  %v4387_v2 = vsel %vm1121_vm12, 1.0, %v5616_v17  ;;  %vm5504_vm12 = vcmp.lt.s32.totalorder %v5668_v53, 14 }
 0x2cd   : > { %5679 = vst [vmem:[#allocation70_spill] sm:$0xff] %v4387_v2 }
 0x2ce   : > { %v4113_v36 = vpop.permute.xlu0 %1339  ;;  %v4137_v41 = vpop.permute.xlu1 %1371 }
 0x2d2   : > { %v4121_v40 = vpop.permute.xlu0 %1412 }
 0x2d3   : > { %5629 = vst [vmem:[#allocation37_spill] sm:$0xff] %v4121_v40  ;;  %v4143_v24 = vpop.permute.xlu1 %1447 }
 0x2d4   : > { %5631 = vst [vmem:[#allocation38_spill] sm:$0xff] %v4143_v24 }
 0x2d6   : > { %v4135_v5 = vpop.permute.xlu0 %1408 }
 0x2d8   : > { %v4155_v61 = vpop.permute.xlu1 %1479 }
 0x2d9   : > { %5632 = vst [vmem:[#allocation40_spill] sm:$0xff] %v4155_v61 }
 0x2da   : > { %v4145_v49 = vpop.permute.xlu0 %1443 }
 0x2dc   : > { %v4163_v28 = vpop.permute.xlu1 %1475 }
 0x2de   : > { %v4157_v62 = vpop.permute.xlu0 %1495 }
 0x2df   : > { %5633 = vst [vmem:[#allocation39_spill] sm:$0xff] %v4157_v62 }
 0x2e1   : > { %v4171_v11 = vpop.permute.xlu1 %1527 }
 0x2e2   : > { %v4165_v3 = vpop.permute.xlu0 %1491  ;;  %5634 = vst [vmem:[#allocation41_spill] sm:$0xff] %v4171_v11 }
 0x2e6   : > { %v4177_v55 = vpop.permute.xlu0 %1523  ;;  %v4183_v48 = vpop.permute.xlu1 %1562 }
 0x2e7   : > { %5635 = vst [vmem:[#allocation42_spill] sm:$0xff] %v4177_v55  ;;  %5636 = vst [vmem:[#allocation43_spill] sm:$0xff] %v4183_v48 }
 0x2ea   : > { %v4186_v6 = vpop.permute.xlu0 %1599  ;;  %v4194_v22 = vpop.permute.xlu1 %1558 }
 0x2eb   : > { %5637 = vst [vmem:[#allocation44_spill] sm:$0xff] %v4186_v6  ;;  %5639 = vst [vmem:[#allocation46_spill] sm:$0xff] %v4194_v22 }
 0x2ee   : > { %v4200_v59 = vpop.permute.xlu0 %1595 }
 0x2ef   : > { %5640 = vst [vmem:[#allocation47_spill] sm:$0xff] %v4200_v59 }
 0x36b   : > { %v4077_v43 = vpop.f32.mrf.mxu1 }
 0x36c   : > { %5623 = vst [vmem:[#allocation33_spill] sm:$0xff] %v4077_v43 }
 0x36d   : > { %v4079_v4 = vpop.f32.mrf.mxu1 }
 0x36e   : > { %5624 = vst [vmem:[#allocation30_spill] sm:$0xff] %v4079_v4  ;;  %v5432_v4 = vmov 82  }
 0x36f   : > { %v1041_v27 = vpop.f32.mrf.mxu1  ;;  %2820 = vset.pattern.permute.xlu1 %v5432_v4 }
 0x370   : > { %v1042_v1 = vadd.f32 %v1041_v27, %v955_v15  ;;  %v4208_v27 = vpop.permute.xlu0 %1627 }
 0x371   : > { %v1043_v34 = vpop.f32.mrf.mxu1  ;;  %5642 = vst [vmem:[#allocation49_spill] sm:$0xff] %v4208_v27 }
 0x372   : > { %v4085_v63 = vmax.f32 %v1042_v1, 0.0  ;;  %v1044_v37 = vadd.f32 %v1043_v34, %v955_v15  ;;  %v4202_v15 = vpop.permute.xlu1 %1631 }
 0x373   : > { %v1047_v32 = vpop.f32.mrf.mxu1  ;;  %5641 = vst [vmem:[#allocation48_spill] sm:$0xff] %v4202_v15 }
 0x374   : > { %1179 = vrot.lane.b32.xlu0 %v4085_v63, %s3035_s28  ;;  %1074 = vrot.lane.b32.xlu1 %v4085_v63, %s5423_s3  ;;  %v4129_v60 = vmax.f32 %v1044_v37, 0.0  ;;  %v1048_v20 = vadd.f32 %v1047_v32, %v4061_v57  ;;  %v4220_v34 = vpop.permute.xlu0 %1695 }
 0x375   : > { %5644 = vst [vmem:[#allocation51_spill] sm:$0xff] %v4220_v34  ;;  %v1049_v6 = vpop.f32.mrf.mxu1 }
 0x376   : > { %v4192_v50 = vmax.f32 %v1048_v20, 0.0  ;;  %v4214_v1 = vpop.permute.xlu1 %1663  ;;  %v1050_v48 = vadd.f32 %v1049_v6, %v4061_v57 }
 0x377   : > { %5643 = vst [vmem:[#allocation50_spill] sm:$0xff] %v4214_v1 }
 0x378   : > { %1290 = vrot.lane.b32.xlu0 %v4085_v63, %s2967_s15  ;;  %1107 = vrot.lane.b32.xlu1 %v4085_v63, %s5421_s4  ;;  %5638 = vst [vmem:[#allocation45_spill] sm:$0xff] %v4192_v50  ;;  %v4228_v32 = vpop.permute.xlu0 %1691 }
 0x379   : > { %5646 = vst [vmem:[#allocation53_spill] sm:$0xff] %v4228_v32 }
 0x37a   : > { %v4222_v37 = vpop.permute.xlu1 %1659 }
 0x37b   : > { %5645 = vst [vmem:[#allocation52_spill] sm:$0xff] %v4222_v37 }
 0x37c   : > { %1386 = vrot.lane.b32.xlu0 %v4085_v63, %s5443_s5  ;;  %1144 = vrot.lane.b32.xlu1 %v4085_v63, %s3039_s14  ;;  %v4241_v43 = vpop.permute.xlu0 %1728 }
 0x37d   : > { %5648 = vst [vmem:[#allocation55_spill] sm:$0xff] %v4241_v43 }
 0x37e   : > { %v4230_v20 = vpop.permute.xlu1 %1732 }
 0x37f   : > { %5647 = vst [vmem:[#allocation54_spill] sm:$0xff] %v4230_v20 }
 0x380   : > { %1573 = vrot.lane.b32.xlu0 %v4085_v63, %s5455_s25  ;;  %1216 = vrot.lane.b32.xlu1 %v4085_v63, %s3041_s26  ;;  %v4249_v4 = vpop.permute.xlu0 %1812 }
 0x381   : > { %5650 = vst [vmem:[#allocation57_spill] sm:$0xff] %v4249_v4 }
 0x382   : > { %v4243_v34 = vpop.permute.xlu1 %1775 }
 0x383   : > { %5649 = vst [vmem:[#allocation56_spill] sm:$0xff] %v4243_v34 }
 0x384   : > { %1674 = vrot.lane.b32.xlu0 %v4085_v63, %s5452_s24  ;;  %1253 = vrot.lane.b32.xlu1 %v4085_v63, %s3042_s27  ;;  %v4261_v34 = vpop.permute.xlu0 %1808 }
 0x385   : > { %5653 = vst [vmem:[#allocation59_spill] sm:$0xff] %v4261_v34 }
 0x386   : > { %v4251_v20 = vpop.permute.xlu1 %1771 }
 0x387   : > { %5651 = vst [vmem:[#allocation58_spill] sm:$0xff] %v4251_v20  ;;  %v4373_v20 = vsel %vm1088_vm15, 1.0, %v5616_v17  ;;  %vm1229_vm15 = vmand %vm4333_vm3, %vm5504_vm12 }
 0x388   : > { %1786 = vrot.lane.b32.xlu0 %v4085_v63, %s5419_s7  ;;  %1322 = vrot.lane.b32.xlu1 %v4085_v63, %s2970_s17  ;;  %s5438_s7 = smov 2   ;;  %v4269_v4 = vpop.permute.xlu0 %1843  ;;  %5677 = vst [vmem:[#allocation68_spill] sm:$0xff] %v4373_v20  ;;  %vm1193_vm12 = vmand %vm4338_vm0, %vm193_vm10 }
 0x389   : > { %5656 = vst [vmem:[#allocation61_spill] sm:$0xff] %v4269_v4 }
 0x38a   : > { %v4263_v1 = vpop.permute.xlu1 %1847 }
 0x38b   : > { %5654 = vst [vmem:[#allocation60_spill] sm:$0xff] %v4263_v1 }
 0x38c   : > { %1078 = vrot.lane.b32.xlu0 %v4129_v60, %s5423_s3  ;;  %1354 = vrot.lane.b32.xlu1 %v4085_v63, %s2972_s8  ;;  %s5429_s3 = smov 110   ;;  %v4282_v1 = vpop.permute.xlu0 %1921 }
 0x38d   : > { %5660 = vst [vmem:[#allocation63_spill] sm:$0xff] %v4282_v1 }
 0x38e   : > { %v4271_v15 = vpop.permute.xlu1 %1884 }
 0x38f   : > { %5657 = vst [vmem:[#allocation62_spill] sm:$0xff] %v4271_v15  ;;  %v4286_v15 = vmax.f32 %v1050_v48, 0.0 }
 0x390   : > { %1111 = vrot.lane.b32.xlu0 %v4129_v60, %s5421_s4  ;;  %1423 = vrot.lane.b32.xlu1 %v4085_v63, %s5438_s7  ;;  %s5425_s4 = smov 126  }
 0x392   : > { %v4284_v11 = vpop.permute.xlu1 %1880 }
 0x393   : > { %5661 = vst [vmem:[#allocation64_spill] sm:$0xff] %v4284_v11 }
 0x394   : > { %1220 = vrot.lane.b32.xlu0 %v4129_v60, %s3041_s26  ;;  %1458 = vrot.lane.b32.xlu1 %v4085_v63, %s2976_s18 }
 0x398   : > { %1326 = vrot.lane.b32.xlu0 %v4129_v60, %s2970_s17  ;;  %1506 = vrot.lane.b32.xlu1 %v4085_v63, %s5434_s19 }
 0x39c   : > { %1427 = vrot.lane.b32.xlu0 %v4129_v60, %s5438_s7  ;;  %1538 = vrot.lane.b32.xlu1 %v4085_v63, %s5425_s4  ;;  %s5450_s4 = smov 96  }
 0x3a0   : > { %1510 = vrot.lane.b32.xlu0 %v4129_v60, %s5434_s19  ;;  %1610 = vrot.lane.b32.xlu1 %v4085_v63, %s5442_s20 }
 0x3a4   : > { %1614 = vrot.lane.b32.xlu0 %v4129_v60, %s5442_s20  ;;  %1642 = vrot.lane.b32.xlu1 %v4085_v63, %s5427_s23  ;;  %s3048_s23 = smov 98  }
 0x3a8   : > { %1710 = vrot.lane.b32.xlu0 %v4129_v60, %s5429_s3  ;;  %1706 = vrot.lane.b32.xlu1 %v4085_v63, %s5429_s3  ;;  %s3049_s3 = smov 95  }
 0x3ac   : > { %1827 = vrot.lane.b32.xlu0 %v4129_v60, %s5450_s4  ;;  %1749 = vrot.lane.b32.xlu1 %v4085_v63, %s3048_s23 }
 0x3b0   : > { %1181 = vrot.lane.b32.xlu0 %v4192_v50, %s3035_s28  ;;  %1823 = vrot.lane.b32.xlu1 %v4085_v63, %s5450_s4 }
 0x3b4   : > { %1218 = vrot.lane.b32.xlu0 %v4192_v50, %s3041_s26  ;;  %1858 = vrot.lane.b32.xlu1 %v4085_v63, %s3049_s3 }
 0x3b8   : > { %1292 = vrot.lane.b32.xlu0 %v4192_v50, %s2967_s15  ;;  %1148 = vrot.lane.b32.xlu1 %v4129_v60, %s3039_s14 }
 0x3bc   : > { %1324 = vrot.lane.b32.xlu0 %v4192_v50, %s2970_s17  ;;  %1183 = vrot.lane.b32.xlu1 %v4129_v60, %s3035_s28 }
 0x3c0   : > { %1388 = vrot.lane.b32.xlu0 %v4192_v50, %s5443_s5  ;;  %1257 = vrot.lane.b32.xlu1 %v4129_v60, %s3042_s27 }
 0x3c4   : > { %1425 = vrot.lane.b32.xlu0 %v4192_v50, %s5438_s7  ;;  %1294 = vrot.lane.b32.xlu1 %v4129_v60, %s2967_s15  ;;  %s5655_s7 = smov 110  }
 0x3c8   : > { %1508 = vrot.lane.b32.xlu0 %v4192_v50, %s5434_s19  ;;  %1358 = vrot.lane.b32.xlu1 %v4129_v60, %s2972_s8  ;;  %s5652_s19 = smov 126  }
 0x3cc   : > { %1575 = vrot.lane.b32.xlu0 %v4192_v50, %s5455_s25  ;;  %1390 = vrot.lane.b32.xlu1 %v4129_v60, %s5443_s5  ;;  %s5659_s5 = smov 112  }
 0x3d0   : > { %1612 = vrot.lane.b32.xlu0 %v4192_v50, %s5442_s20  ;;  %1462 = vrot.lane.b32.xlu1 %v4129_v60, %s2976_s18  ;;  %s5658_s20 = smov 97  }
 0x3d4   : > { %1676 = vrot.lane.b32.xlu0 %v4192_v50, %s5452_s24  ;;  %1542 = vrot.lane.b32.xlu1 %v4129_v60, %s5652_s19 }
 0x3d8   : > { %1708 = vrot.lane.b32.xlu0 %v4192_v50, %s5655_s7  ;;  %1577 = vrot.lane.b32.xlu1 %v4129_v60, %s5455_s25  ;;  %s5664_s25 = smov 33  }
 0x3dc   : > { %1788 = vrot.lane.b32.xlu0 %v4192_v50, %s5658_s20  ;;  %1646 = vrot.lane.b32.xlu1 %v4129_v60, %s5659_s5 }
 0x3e0   : > { %1825 = vrot.lane.b32.xlu0 %v4192_v50, %s5450_s4  ;;  %1678 = vrot.lane.b32.xlu1 %v4129_v60, %s5452_s24  ;;  %s3051_s4 = smov 94   ;;  %s5662_s24 = smov 34  }
 0x3e4   : > { %1150 = vrot.lane.b32.xlu0 %v4286_v15, %s3039_s14  ;;  %1753 = vrot.lane.b32.xlu1 %v4129_v60, %s3048_s23 }
 0x3e6   : > { %v4292_v62 = vpop.permute.xlu0 %1179  ;;  %v1075_v57 = vpop.permute.xlu1 %1074 }
 0x3e8   : > { %1259 = vrot.lane.b32.xlu0 %v4286_v15, %s3042_s27  ;;  %1790 = vrot.lane.b32.xlu1 %v4129_v60, %s5658_s20 }
 0x3ea   : > { %v4298_v6 = vpop.permute.xlu0 %1290  ;;  %v1108_v1 = vpop.permute.xlu1 %1107 }
 0x3ec   : > { %1897 = vrot.lane.b32.xlu0 %v4192_v50, %s3051_s4  ;;  %1862 = vrot.lane.b32.xlu1 %v4129_v60, %s3049_s3 }
 0x3ee   : > { %v4304_v48 = vpop.permute.xlu0 %1386  ;;  %v4306_v61 = vpop.permute.xlu1 %1144 }
 0x3f0   : > { %1360 = vrot.lane.b32.xlu0 %v4286_v15, %s2972_s8  ;;  %1076 = vrot.lane.b32.xlu1 %v4192_v50, %s5662_s24 }
 0x3f2   : > { %v4312_v24 = vpop.permute.xlu0 %1573  ;;  %v4314_v40 = vpop.permute.xlu1 %1216 }
 0x3f3   : > { %5663 = vst [vmem:[#allocation65_spill] sm:$0xff] %v4312_v24 }
 0x3f4   : > { %1464 = vrot.lane.b32.xlu0 %v4286_v15, %s2976_s18  ;;  %1109 = vrot.lane.b32.xlu1 %v4192_v50, %s5664_s25 }
 0x3f6   : > { %v4322_v26 = vpop.permute.xlu0 %1674  ;;  %v4324_v33 = vpop.permute.xlu1 %1253 }
 0x3f7   : > { %5666 = vst [vmem:[#allocation12_spill] sm:$0xff] %v4322_v26 }
 0x3f8   : > { %1544 = vrot.lane.b32.xlu0 %v4286_v15, %s5652_s19  ;;  %1146 = vrot.lane.b32.xlu1 %v4192_v50, %s3039_s14  ;;  %s3060_s14 = smov 9  }
 0x3fa   : > { %v4342_v25 = vpop.permute.xlu0 %1786  ;;  %v4344_v11 = vpop.permute.xlu1 %1322 }
 0x3fb   : > { %5674 = vst [vmem:[#allocation66_spill] sm:$0xff] %v4342_v25  ;;  %v4370_v25 = vsel %vm1087_vm14, 1.0, %v5616_v17  ;;  %vm5500_vm14 = vcmp.lt.s32.totalorder %v5671_v42, 14 }
 0x3fc   : > { %1648 = vrot.lane.b32.xlu0 %v4286_v15, %s5659_s5  ;;  %1255 = vrot.lane.b32.xlu1 %v4192_v50, %s3042_s27  ;;  %5676 = vst [vmem:[#allocation67_spill] sm:$0xff] %v4370_v25  ;;  %vm1230_vm6 = vmand %vm4338_vm0, %vm5500_vm14 }
 0x3fe   : > { %v1079_v4 = vpop.permute.xlu0 %1078  ;;  %v4363_v34 = vpop.permute.xlu1 %1354 }
 0x3ff   : > { %v1083_v32 = vsel %vm5499_vm8, %v1075_v57, %v1079_v4  ;;  %v1085_v43 = vsel %vm5499_vm8, %v1079_v4, %v1075_v57  ;;  %vm5689_vm8 = vcmp.lt.s32.totalorder %v5668_v53, 15 }
 0x400   : > { %1917 = vperm.xlu0 %2819, %v3924_v0   ;;  %1356 = vrot.lane.b32.xlu1 %v4192_v50, %s2972_s8  ;;  %v1091_v26 = vmul.f32 %v4370_v25, %v1085_v43  ;;  %v1092_v37 = vmul.f32 %v4373_v20, %v1083_v32  ;;  %v5680_v43 = vmov 82   ;;  %vm4485_vm14 = vmand %vm4333_vm3, %vm5689_vm8  ;;  %s5703_s8 = smov 2  }
 0x401   : > { %vm1267_vm8 = vmand %vm3336_vm7, %vm1057_vm1 }
 0x402   : > { %v1112_v46 = vpop.permute.xlu0 %1111  ;;  %v4391_v8 = vpop.permute.xlu1 %1423  ;;  %v1103_v32 = vmul.f32 %v4063_v51, %v1091_v26  ;;  %v1104_v20 = vmul.f32 %v4063_v51, %v1092_v37 }
 0x403   : > { %v1116_v4 = vsel %vm5496_vm4, %v1108_v1, %v1112_v46  ;;  %v1118_v57 = vsel %vm5496_vm4, %v1112_v46, %v1108_v1  ;;  %vm5522_vm4 = vcmp.lt.s32.totalorder %v3304_v45, 30 }
 0x404   : > { %v1124_v27 = vmul.f32 %v4384_v35, %v1118_v57  ;;  %v1125_v59 = vmul.f32 %v4387_v2, %v1116_v4  ;;  %1755 = vrot.lane.b32.xlu0 %v4286_v15, %s3048_s23  ;;  %1460 = vrot.lane.b32.xlu1 %v4192_v50, %s2976_s18  ;;  %v4474_v2 = vsel %vm4333_vm3, 1.0, %v5616_v17  ;;  %v4479_v35 = vsel %vm4338_vm0, 1.0, %v5616_v17  ;;  %vm4522_vm0 = vmand %vm3331_vm5, %vm1056_vm11  ;;  %s5706_s18 = smov 127  }
 0x405   : > { %2821 = vset.pattern.permute.xlu0 %v5680_v43  ;;  %5687 = vst [vmem:[#allocation77_spill] sm:$0xff] %v4474_v2  ;;  %5688 = vst [vmem:[#allocation78_spill] sm:$0xff] %v4479_v35  ;;  %vm1187_vm3 = vcmp.lt.s32.totalorder %v3304_v45, 31 }
 0x406   : > { %v1136_v25 = vmul.f32 %v4067_v58, %v1124_v27  ;;  %v1137_v46 = vmul.f32 %v4067_v58, %v1125_v59  ;;  %v4408_v1 = vpop.permute.xlu1 %1458  ;;  %v1221_v58 = vpop.permute.xlu0 %1220 }
 0x407   : > { %v1227_v44 = vsel %vm5522_vm4, %v1221_v58, %v4314_v40 }
 0x408   : > { %v4410_v57 = vadd.f32 %v1136_v25, %v1103_v32  ;;  %v4412_v4 = vadd.f32 %v1137_v46, %v1104_v20  ;;  %1864 = vrot.lane.b32.xlu0 %v4286_v15, %s3049_s3  ;;  %1540 = vrot.lane.b32.xlu1 %v4192_v50, %s5652_s19  ;;  %s5717_s19 = smov 114  }
 0x40a   : > { %v4418_v43 = vpop.permute.xlu1 %1506  ;;  %v1327_v26 = vpop.permute.xlu0 %1326 }
 0x40c   : > { %1899 = vrot.lane.b32.xlu0 %v4129_v60, %s3051_s4  ;;  %1644 = vrot.lane.b32.xlu1 %v4192_v50, %s5659_s5  ;;  %s3059_s5 = smov 26  }
 0x40e   : > { %v4424_v51 = vpop.permute.xlu1 %1538  ;;  %v4439_v37 = vpop.permute.xlu0 %1427 }
 0x40f   : > { %5681 = vst [vmem:[#allocation71_spill] sm:$0xff] %v4424_v51 }
 0x410   : > { %1933 = vperm.xlu0 %2821, %v3924_v0   ;;  %1751 = vrot.lane.b32.xlu1 %v4192_v50, %s3048_s23  ;;  %s5724_s23 = smov 113  }
 0x412   : > { %v4429_v25 = vpop.permute.xlu1 %1610  ;;  %v4445_v20 = vpop.permute.xlu0 %1510 }
 0x414   : > { %1860 = vrot.lane.b32.xlu1 %v4192_v50, %s3049_s3  ;;  %s3056_s3 = smov 28  }
 0x416   : > { %v4433_v59 = vpop.permute.xlu1 %1642  ;;  %v4461_v50 = vpop.permute.xlu0 %1614 }
 0x417   : > { %5682 = vst [vmem:[#allocation72_spill] sm:$0xff] %v4433_v59  ;;  %v4497_v59 = vsel %vm1230_vm6, 1.0, %v5616_v17  ;;  %vm5523_vm6 = vcmp.lt.s32.totalorder %v3304_v45, 2 }
 0x418   : > { %1080 = vrot.lane.b32.xlu1 %v4286_v15, %s5662_s24  ;;  %5693 = vst [vmem:[#allocation80_spill] sm:$0xff] %v4497_v59  ;;  %s5737_s24 = smov 111  }
 0x41a   : > { %v4437_v27 = vpop.permute.xlu1 %1706  ;;  %v4514_v23 = vpop.permute.xlu0 %1710 }
 0x41b   : > { %5683 = vst [vmem:[#allocation73_spill] sm:$0xff] %v4437_v27  ;;  %v1225_v27 = vsel %vm5522_vm4, %v4314_v40, %v1221_v58  ;;  %5694 = vst [vmem:[#allocation81_spill] sm:$0xff] %v4514_v23  ;;  %v4529_v40 = vsel %vm4485_vm14, 1.0, %v5616_v17  ;;  %vm5700_vm14 = vcmp.lt.s32.totalorder %v3304_v45, 16 }
 0x41c   : > { %1113 = vrot.lane.b32.xlu1 %v4286_v15, %s5664_s25  ;;  %v1234_v39 = vmul.f32 %v4497_v59, %v1225_v27  ;;  %s3061_s25 = smov 8  }
 0x41e   : > { %v4443_v0 = vpop.permute.xlu1 %1749  ;;  %v1246_v59 = vmul.f32 %v4083_v54, %v1234_v39 }
 0x41f   : > { %5684 = vst [vmem:[#allocation74_spill] sm:$0xff] %v4443_v0  ;;  %v4490_v0 = vsel %vm1229_vm15, 1.0, %v5616_v17  ;;  %vm5701_vm15 = vmmov %vm5700_vm14 }
 0x420   : > { %1185 = vrot.lane.b32.xlu1 %v4286_v15, %s3035_s28  ;;  %5692 = vst [vmem:[#allocation79_spill] sm:$0xff] %v4490_v0  ;;  %v1233_v23 = vmul.f32 %v4490_v0, %v1227_v44  ;;  %v4573_v0 = vpop.permute.xlu0 %1827  ;;  %s3055_s28 = smov 27  }
 0x422   : > { %v4449_v32 = vpop.permute.xlu1 %1823 }
 0x423   : > { %5685 = vst [vmem:[#allocation75_spill] sm:$0xff] %v4449_v32 }
 0x424   : > { %1222 = vrot.lane.b32.xlu1 %v4286_v15, %s3041_s26  ;;  %s5909_s26 = sshll.u32 %s3185_s6, 3 }
 0x426   : > { %v4455_v46 = vpop.permute.xlu1 %1858 }
 0x427   : > { %5686 = vst [vmem:[#allocation76_spill] sm:$0xff] %v4455_v46 }
 0x428   : > { %1296 = vrot.lane.b32.xlu1 %v4286_v15, %s2967_s15 }
 0x42a   : > { %v1149_v32 = vpop.permute.xlu1 %1148 }
 0x42b   : > { %v1153_v14 = vsel %vm1152_vm13, %v4306_v61, %v1149_v32  ;;  %v1155_v21 = vsel %vm1152_vm13, %v1149_v32, %v4306_v61  ;;  %v1432_v61 = vsel %vm5523_vm6, %v4391_v8, %v4439_v37 }
 0x42c   : > { %v1159_v24 = vmul.f32 %v4474_v2, %v1155_v21  ;;  %v1160_v22 = vmul.f32 %v4479_v35, %v1153_v14  ;;  %1328 = vrot.lane.b32.xlu1 %v4286_v15, %s2970_s17  ;;  %v4532_v21 = vsel %vm1193_vm12, 1.0, %v5616_v17  ;;  %vm1261_vm12 = vcmp.lt.s32.totalorder %v3304_v45, 18  ;;  %s5702_s17 = smov 14  }
 0x42d   : > { %5698 = vst [vmem:[#allocation16_spill] sm:$0xff] %v4532_v21 }
 0x42e   : > { %v1184_v58 = vpop.permute.xlu1 %1183  ;;  %v1171_v35 = vmul.f32 %v4081_v38, %v1159_v24  ;;  %v1172_v2 = vmul.f32 %v4081_v38, %v1160_v22  ;;  %v1330_v38 = vsel %vm5700_vm14, %v4344_v11, %v1327_v26  ;;  %v1332_v22 = vsel %vm5701_vm15, %v1327_v26, %v4344_v11 }
 0x42f   : > { %v1188_v46 = vsel %vm1187_vm3, %v4292_v62, %v1184_v58  ;;  %v1190_v55 = vsel %vm1187_vm3, %v1184_v58, %v4292_v62  ;;  %v4562_v62 = vsel %vm4522_vm0, 1.0, %v5616_v17  ;;  %v1245_v26 = vmul.f32 %v4083_v54, %v1233_v23 }
 0x430   : > { %v1196_v51 = vmul.f32 %v4529_v40, %v1190_v55  ;;  %v1197_v24 = vmul.f32 %v4532_v21, %v1188_v46  ;;  %1392 = vrot.lane.b32.xlu1 %v4286_v15, %s5702_s17  ;;  %v4565_v55 = vsel %vm1267_vm8, 1.0, %v5616_v17  ;;  %v1175_v44 = vadd.f32 %v1171_v35, %v4410_v57 }
 0x431   : > { %v1176_v58 = vadd.f32 %v1172_v2, %v4412_v4  ;;  %v1334_v23 = vmul.f32 %v1332_v22, %v3371_v9  ;;  %v1335_v39 = vmul.f32 %v1330_v38, %v3380_v10  ;;  %vm5704_vm0 = vcmp.lt.s32.totalorder %v3304_v45, 17 }
 0x432   : > { %v1258_v27 = vpop.permute.xlu1 %1257  ;;  %v1208_v46 = vmul.f32 %v4075_v56, %v1196_v51  ;;  %v1209_v11 = vmul.f32 %v4075_v56, %v1197_v24  ;;  %vm5705_vm8 = vmmov %vm5704_vm0  ;;  %vm5524_vm14 = vcmp.lt.s32.totalorder %v3304_v45, 14  ;;  %vm5707_vm15 = vcmp.lt.s32.totalorder %v5668_v53, 14 }
 0x433   : > { %v1262_v32 = vsel %vm1261_vm12, %v4324_v33, %v1258_v27  ;;  %v1264_v35 = vsel %vm1261_vm12, %v1258_v27, %v4324_v33 }
 0x434   : > { %v1270_v2 = vmul.f32 %v4562_v62, %v1264_v35  ;;  %v1271_v57 = vmul.f32 %v4565_v55, %v1262_v32  ;;  %v1212_v4 = vadd.f32 %v1208_v46, %v1175_v44  ;;  %v1213_v56 = vadd.f32 %v1209_v11, %v1176_v58  ;;  %1429 = vrot.lane.b32.xlu1 %v4286_v15, %s5703_s8  ;;  %v4608_v11 = vpop.permute.xlu0 %1181 }
 0x436   : > { %v1282_v54 = vmul.f32 %v4107_v31, %v1270_v2  ;;  %v1283_v51 = vmul.f32 %v4107_v31, %v1271_v57  ;;  %v1295_v24 = vpop.permute.xlu1 %1294  ;;  %v1249_v21 = vadd.f32 %v1245_v26, %v1212_v4  ;;  %v1250_v33 = vadd.f32 %v1246_v59, %v1213_v56 }
 0x437   : > { %v1298_v27 = vsel %vm5704_vm0, %v4298_v6, %v1295_v24  ;;  %v1300_v38 = vsel %vm5705_vm8, %v1295_v24, %v4298_v6  ;;  %v4601_v31 = vsel %vm1056_vm11, 1.0, %v5616_v17  ;;  %v4606_v59 = vsel %vm1057_vm1, 1.0, %v5616_v17  ;;  %vm4617_vm0 = vmand %vm3331_vm5, %vm5707_vm15 }
 0x438   : > { %v1302_v22 = vmul.f32 %v1300_v38, %v3390_v12  ;;  %v1303_v44 = vmul.f32 %v1298_v27, %v3393_v13  ;;  %v1286_v58 = vadd.f32 %v1282_v54, %v1249_v21  ;;  %v1287_v46 = vadd.f32 %v1283_v51, %v1250_v33  ;;  %1512 = vrot.lane.b32.xlu1 %v4286_v15, %s5706_s18 }
 0x439   : > { %v1346_v21 = vmul.f32 %v4113_v36, %v1334_v23  ;;  %v1347_v26 = vmul.f32 %v4113_v36, %v1335_v39  ;;  %vm5710_vm8 = vcmp.lt.s32.totalorder %v5671_v42, 14  ;;  %v1434_v36 = vsel %vm5523_vm6, %v4439_v37, %v4391_v8  ;;  %vm4750_vm6 = vmand %vm3428_vm9, %vm1056_vm11 }
 0x43a   : > { %v1314_v32 = vmul.f32 %v4101_v7, %v1302_v22  ;;  %v1315_v35 = vmul.f32 %v4101_v7, %v1303_v44  ;;  %v1359_v2 = vpop.permute.xlu1 %1358  ;;  %vm1400_vm4 = vmand %vm3336_vm7, %vm5710_vm8  ;;  %vm5711_vm5 = vcmp.lt.s32.totalorder %v3304_v45, 15  ;;  %v4647_v39 = vmul.f32 %v4165_v3, %v4085_v63 }
 0x43b   : > { %v1362_v7 = vsel %vm5711_vm5, %v4363_v34, %v1359_v2  ;;  %vm5712_vm15 = vmmov %vm5711_vm5  ;;  %v4651_v8 = vmul.f32 %v4165_v3, %v4129_v60  ;;  %vm5713_vm7 = vcmp.lt.s32.totalorder %v5668_v53, 14  ;;  %v4666_v54 = vsel %vm4617_vm0, 1.0, %v5616_v17 }
 0x43c   : > { %v1364_v57 = vsel %vm5712_vm15, %v1359_v2, %v4363_v34  ;;  %v1367_v4 = vmul.f32 %v1362_v7, %v3407_v19  ;;  %v1318_v56 = vadd.f32 %v1314_v32, %v1286_v58  ;;  %v1319_v23 = vadd.f32 %v1315_v35, %v1287_v46  ;;  %vm4657_vm8 = vmand %vm3428_vm9, %vm5713_vm7  ;;  %1579 = vrot.lane.b32.xlu1 %v4286_v15, %s5717_s19  ;;  %v4683_v46 = vpop.permute.xlu0 %1218 }
 0x43d   : > { %v1366_v14 = vmul.f32 %v1364_v57, %v3404_v18  ;;  %v4669_v51 = vsel %vm1400_vm4, 1.0, %v5616_v17  ;;  %vm5718_vm5 = vcmp.lt.s32.totalorder %v5671_v42, 14  ;;  %v1438_v44 = vmul.f32 %v4601_v31, %v1434_v36  ;;  %vm5725_vm0 = vmmov %vm5713_vm7 }
 0x43e   : > { %vm4675_vm15 = vmand %vm3479_vm2, %vm5718_vm5  ;;  %v1379_v33 = vmul.f32 %v4137_v41, %v1367_v4  ;;  %v1391_v27 = vpop.permute.xlu1 %1390  ;;  %v1350_v38 = vadd.f32 %v1346_v21, %v1318_v56  ;;  %v1351_v22 = vadd.f32 %v1347_v26, %v1319_v23  ;;  %v1439_v58 = vmul.f32 %v4606_v59, %v1432_v61 }
 0x43f   : > { %v1378_v24 = vmul.f32 %v4137_v41, %v1366_v14  ;;  %v1395_v6 = vsel %vm5524_vm14, %v4304_v48, %v1391_v27  ;;  %v1397_v32 = vsel %vm5524_vm14, %v1391_v27, %v4304_v48  ;;  %v4696_v2 = vsel %vm4657_vm8, 1.0, %v5616_v17 }
 0x440   : > { %v1403_v35 = vmul.f32 %v4666_v54, %v1397_v32  ;;  %v1404_v41 = vmul.f32 %v4669_v51, %v1395_v6  ;;  %v1383_v26 = vadd.f32 %v1379_v33, %v1351_v22  ;;  %5722 = vst [vmem:[#allocation17_spill] sm:$0xff] %v4696_v2  ;;  %v4701_v61 = vsel %vm4675_vm15, 1.0, %v5616_v17  ;;  %1616 = vrot.lane.b32.xlu1 %v4286_v15, %s5724_s23  ;;  %v4736_v27 = vpop.permute.xlu0 %1292  ;;  %s2435_s23 = scalar_lea.sflag [#allocation4], %s3185_s6 }
 0x441   : > { %v1382_v21 = vadd.f32 %v1378_v24, %v1350_v38  ;;  %5723 = vst [vmem:[#allocation18_spill] sm:$0xff] %v4701_v61  ;;  %vm1546_vm4 = vcmp.lt.s32.totalorder %v3304_v45, 126  ;;  %v4709_v48 = vsel %vm5725_vm0, 1.0, %v5616_v17  ;;  %vm5726_vm7 = vcmp.lt.s32.totalorder %v3304_v45, 127  ;;  %v5741_v38 = vld [vmem:[#allocation65_spill] sm:$0xff] }
 0x442   : > { %v1514_v36 = vsel %vm5726_vm7, %v4418_v43, %v4445_v20  ;;  %vm5727_vm8 = vmmov %vm5726_vm7  ;;  %vm5525_vm5 = vcmp.lt.s32.totalorder %v3304_v45, 110  ;;  %v1415_v57 = vmul.f32 %v4135_v5, %v1403_v35  ;;  %v1416_v14 = vmul.f32 %v4135_v5, %v1404_v41  ;;  %v1463_v4 = vpop.permute.xlu1 %1462  ;;  %v5735_v35 = vld [vmem:[#allocation71_spill] sm:$0xff] }
 0x443   : > { %v1516_v7 = vsel %vm5727_vm8, %v4445_v20, %v4418_v43  ;;  %v1450_v56 = vmul.f32 %v4145_v49, %v1438_v44  ;;  %v1451_v23 = vmul.f32 %v4145_v49, %v1439_v58  ;;  %vm5728_vm15 = vcmp.lt.s32.totalorder %v3304_v45, 1 }
 0x444   : > { %v1466_v34 = vsel %vm5728_vm15, %v4408_v1, %v1463_v4  ;;  %vm5729_vm0 = vmmov %vm5728_vm15  ;;  %vm1743_vm7 = vcmp.ge.s32.totalorder %v5665_v16, 4294967294  ;;  %vm1745_vm8 = vcmp.lt.s32.totalorder %v5665_v16, 14  ;;  %v1419_v20 = vadd.f32 %v1415_v57, %v1382_v21  ;;  %1895 = vrot.lane.b32.xlu1 %v4085_v63, %s3051_s4 }
 0x445   : > { %v1468_v3 = vsel %vm5729_vm0, %v1463_v4, %v4408_v1  ;;  %v1471_v5 = vmul.f32 %v1466_v34, %v3448_v30  ;;  %v1420_v24 = vadd.f32 %v1416_v14, %v1383_v26  ;;  %v1518_v49 = vmul.f32 %v1514_v36, %v3496_v47  ;;  %v5738_v4 = vld [vmem:[#allocation20_spill] sm:$0xff] }
 0x446   : > { %v1470_v43 = vmul.f32 %v1468_v3, %v3443_v29  ;;  %v1519_v33 = vmul.f32 %v1516_v7, %v3501_v52  ;;  %vm5730_vm15 = vcmp.lt.s32.totalorder %v5671_v42, 14  ;;  %vm1581_vm0 = vcmp.lt.s32.totalorder %v3304_v45, 114  ;;  %v1543_v63 = vpop.permute.xlu1 %1542  ;;  %v5736_v7 = vld [vmem:[#allocation42_spill] sm:$0xff] }
 0x447   : > { %v4743_v1 = vsel %vm5730_vm15, 1.0, %v5616_v17  ;;  %v1483_v44 = vmul.f32 %v4163_v28, %v1471_v5  ;;  %vm1587_vm15 = vmand %vm3479_vm2, %vm1057_vm1  ;;  %v1454_v58 = vadd.f32 %v1450_v56, %v1419_v20  ;;  %v1455_v6 = vadd.f32 %v1451_v23, %v1420_v24  ;;  %v5739_v23 = vld [vmem:[#allocation21_spill] sm:$0xff]  ;;  %v4792_v20 = vpop.permute.xlu0 %1324  ;;  %v5740_v24 = vld [vmem:[#allocation46_spill] sm:$0xff] }
 0x448   : > { %v1482_v22 = vmul.f32 %v4163_v28, %v1470_v43  ;;  %vm5733_vm14 = vcmp.lt.s32.totalorder %v3304_v45, 113  ;;  %v1547_v28 = vsel %vm1546_vm4, %v5735_v35, %v1543_v63  ;;  %v1549_v60 = vsel %vm1546_vm4, %v1543_v63, %v5735_v35  ;;  %1680 = vrot.lane.b32.xlu1 %v4286_v15, %s5737_s24 }
 0x449   : > { %v1618_v37 = vsel %vm5733_vm14, %v4429_v25, %v4461_v50  ;;  %vm5734_vm9 = vmmov %vm5733_vm14  ;;  %v1553_v41 = vmul.f32 %v4709_v48, %v1547_v28  ;;  %v1554_v21 = vmul.f32 %v4743_v1, %v1549_v60  ;;  %v1487_v36 = vadd.f32 %v1483_v44, %v1455_v6  ;;  %v5742_v6 = vld [vmem:[#allocation81_spill] sm:$0xff]  ;;  %v5745_v60 = vld [vmem:[#allocation47_spill] sm:$0xff] }
 0x44a   : > { %v1620_v32 = vsel %vm5734_vm9, %v4461_v50, %v4429_v25  ;;  %v1486_v26 = vadd.f32 %v1482_v22, %v1454_v58  ;;  %v1530_v57 = vmul.f32 %v5736_v7, %v1518_v49  ;;  %v1531_v14 = vmul.f32 %v5736_v7, %v1519_v33  ;;  %v1578_v3 = vpop.permute.xlu1 %1577  ;;  %v5744_v28 = vld [vmem:[#allocation13_spill] sm:$0xff]  ;;  %vm4824_vm14 = vmand %vm1743_vm7, %vm1745_vm8 }
 0x44b   : > { %v4783_v50 = vsel %vm4750_vm6, 1.0, %v5616_v17  ;;  %v4786_v25 = vsel %vm1587_vm15, 1.0, %v5616_v17  ;;  %v1622_v56 = vmul.f32 %v1618_v37, %v5738_v4  ;;  %v1623_v34 = vmul.f32 %v1620_v32, %v5739_v23  ;;  %v5743_v37 = vld [vmem:[#allocation73_spill] sm:$0xff]  ;;  %vm4851_vm8 = vmand %vm4824_vm14, %vm1056_vm11 }
 0x44c   : > { %v1502_v43 = vadd.f32 %v4647_v39, %v1486_v26  ;;  %v1503_v5 = vadd.f32 %v4651_v8, %v1487_v36  ;;  %v1565_v49 = vmul.f32 %v5740_v24, %v1553_v41  ;;  %v1566_v33 = vmul.f32 %v5740_v24, %v1554_v21  ;;  %1712 = vrot.lane.b32.xlu1 %v4286_v15, %s5655_s7  ;;  %s5768_s7 = smov 96  }
 0x44d   : > { %v1582_v22 = vsel %vm1581_vm0, %v5741_v38, %v1578_v3  ;;  %v1584_v44 = vsel %vm1581_vm0, %v1578_v3, %v5741_v38  ;;  %v1715_v32 = vsel %vm5525_vm5, %v5743_v37, %v5742_v6  ;;  %v1717_v35 = vsel %vm5525_vm5, %v5742_v6, %v5743_v37  ;;  %v5757_v38 = vld [vmem:[#allocation23_spill] sm:$0xff]  ;;  %v5760_v6 = vld [vmem:[#allocation52_spill] sm:$0xff] }
 0x44e   : > { %v1590_v63 = vmul.f32 %v4783_v50, %v1582_v22  ;;  %v1591_v39 = vmul.f32 %v4786_v25, %v1584_v44  ;;  %v1534_v58 = vadd.f32 %v1530_v57, %v1502_v43  ;;  %v1535_v8 = vadd.f32 %v1531_v14, %v1503_v5  ;;  %v1647_v26 = vpop.permute.xlu1 %1646  ;;  %v5746_v57 = vld [vmem:[#allocation49_spill] sm:$0xff]  ;;  %v5750_v5 = vld [vmem:[#allocation72_spill] sm:$0xff] }
 0x44f   : > { %vm1744_vm2 = vcmp.ge.s32.totalorder %v5744_v28, 4294967294  ;;  %vm1746_vm6 = vcmp.lt.s32.totalorder %v5744_v28, 14  ;;  %v1634_v14 = vmul.f32 %v5746_v57, %v1622_v56  ;;  %v1635_v3 = vmul.f32 %v5746_v57, %v1623_v34  ;;  %v5756_v34 = vld [vmem:[#allocation22_spill] sm:$0xff] }
 0x450   : > { %v1602_v41 = vmul.f32 %v5745_v60, %v1590_v63  ;;  %v1603_v21 = vmul.f32 %v5745_v60, %v1591_v39  ;;  %v1569_v36 = vadd.f32 %v1565_v49, %v1534_v58  ;;  %v1570_v7 = vadd.f32 %v1566_v33, %v1535_v8  ;;  %vm4834_vm5 = vmand %vm1744_vm2, %vm1746_vm6  ;;  %v4843_v58 = vpop.permute.xlu0 %1388  ;;  %1792 = vrot.lane.b32.xlu1 %v4286_v15, %s5658_s20  ;;  %v5775_v8 = vld [vmem:[#allocation53_spill] sm:$0xff]  ;;  %s3052_s20 = smov 45  }
 0x451   : > { %v5747_v43 = vmov 0  ;;  %vm5751_vm15 = vcmp.lt.s32.totalorder %v3304_v45, 112  ;;  %v5753_v56 = vmov 0  ;;  %v1723_v63 = vmul.f32 %v4696_v2, %v1715_v32  ;;  %vm1763_vm2 = vmand %vm4834_vm5, %vm1057_vm1  ;;  %v5805_v2 = vld [vmem:[#allocation67_spill] sm:$0xff] }
 0x452   : > { %v5748_v43 = vsel %vm4824_vm14, 4294967295, %v5747_v43  ;;  %v1650_v24 = vsel %vm5751_vm15, %v5750_v5, %v1647_v26  ;;  %vm5752_vm9 = vmmov %vm5751_vm15  ;;  %v5754_v56 = vsel %vm4834_vm5, 4294967295, %v5753_v56  ;;  %v1606_v22 = vadd.f32 %v1602_v41, %v1569_v36 }
 0x453   : > { %5749 = vst [vmem:[#allocation19_spill] sm:$0xff] %v5748_v43  ;;  %v1652_v49 = vsel %vm5752_vm9, %v1647_v26, %v5750_v5  ;;  %5755 = vst [vmem:[#allocation71_spill] sm:$0xff] %v5754_v56  ;;  %v1654_v33 = vmul.f32 %v1650_v24, %v5756_v34  ;;  %v1607_v44 = vadd.f32 %v1603_v21, %v1570_v7  ;;  %vm1831_vm7 = vcmp.lt.s32.totalorder %v3304_v45, 96  ;;  %v5762_v21 = vld [vmem:[#allocation12_spill] sm:$0xff]  ;;  %v5766_v5 = vld [vmem:[#allocation25_spill] sm:$0xff] }
 0x454   : > { %v1655_v16 = vmul.f32 %v1652_v49, %v5757_v38  ;;  %v1724_v39 = vmul.f32 %v4701_v61, %v1717_v35  ;;  %v1679_v35 = vpop.permute.xlu1 %1678  ;;  %v1638_v28 = vadd.f32 %v1634_v14, %v1606_v22  ;;  %v4864_v41 = vsel %vm4824_vm14, 1.0, %v5616_v17  ;;  %v5765_v7 = vld [vmem:[#allocation24_spill] sm:$0xff]  ;;  %1829 = vrot.lane.b32.xlu1 %v4286_v15, %s5768_s7  ;;  %v5785_v43 = vld [vmem:[#allocation66_spill] sm:$0xff] }
 0x455   : > { %v1666_v37 = vmul.f32 %v5760_v6, %v1654_v33  ;;  %v1639_v60 = vadd.f32 %v1635_v3, %v1607_v44  ;;  %5761 = vst [vmem:[#allocation42_spill] sm:$0xff] %v4864_v41  ;;  %vm5763_vm11 = vcmp.lt.s32.totalorder %v3304_v45, 111  ;;  %vm1757_vm15 = vcmp.lt.s32.totalorder %v3304_v45, 98  ;;  %v5774_v44 = vld [vmem:[#allocation55_spill] sm:$0xff] }
 0x456   : > { %v1667_v32 = vmul.f32 %v5760_v6, %v1655_v16  ;;  %v1682_v26 = vsel %vm5763_vm11, %v5762_v21, %v1679_v35  ;;  %vm5764_vm6 = vmmov %vm5763_vm11  ;;  %v4878_v49 = vsel %vm4834_vm5, 1.0, %v5616_v17  ;;  %v4885_v33 = vsel %vm4851_vm8, 1.0, %v5616_v17 }
 0x457   : > { %v1684_v36 = vsel %vm5764_vm6, %v1679_v35, %v5762_v21  ;;  %v1686_v57 = vmul.f32 %v1682_v26, %v5765_v7  ;;  %v1670_v3 = vadd.f32 %v1666_v37, %v1638_v28  ;;  %5767 = vst [vmem:[#allocation20_spill] sm:$0xff] %v4878_v49  ;;  %5769 = vst [vmem:[#allocation21_spill] sm:$0xff] %v4885_v33  ;;  %v4888_v16 = vsel %vm1763_vm2, 1.0, %v5616_v17  ;;  %v5778_v26 = vld [vmem:[#allocation74_spill] sm:$0xff] }
 0x458   : > { %v1687_v14 = vmul.f32 %v1684_v36, %v5766_v5  ;;  %v1671_v24 = vadd.f32 %v1667_v32, %v1639_v60  ;;  %5770 = vst [vmem:[#allocation46_spill] sm:$0xff] %v4888_v16  ;;  %vm1794_vm1 = vcmp.lt.s32.totalorder %v3304_v45, 97  ;;  %vm5771_vm9 = vcmp.ge.s32.totalorder %v5668_v53, 1  ;;  %v1754_v28 = vpop.permute.xlu1 %1753  ;;  %v5777_v60 = vld [vmem:[#allocation75_spill] sm:$0xff]  ;;  %1901 = vrot.lane.b32.xlu1 %v4286_v15, %s3051_s4  ;;  %v5810_v7 = vld [vmem:[#allocation70_spill] sm:$0xff]  ;;  %s3057_s4 = smov 22  }
 0x459   : > { %vm4895_vm11 = vmand %vm4824_vm14, %vm5771_vm9  ;;  %v1735_v6 = vmul.f32 %v5774_v44, %v1723_v63  ;;  %v1736_v37 = vmul.f32 %v5774_v44, %v1724_v39  ;;  %v1698_v32 = vmul.f32 %v5775_v8, %v1686_v57  ;;  %vm5776_vm8 = vcmp.ge.s32.totalorder %v5671_v42, 1  ;;  %v4915_v39 = vpop.permute.xlu0 %1425 }
 0x45a   : > { %v1699_v35 = vmul.f32 %v5775_v8, %v1687_v14  ;;  %vm1800_vm2 = vmand %vm4834_vm5, %vm5776_vm8  ;;  %v1832_v21 = vsel %vm1831_vm7, %v5777_v60, %v4573_v0  ;;  %v1834_v63 = vsel %vm1831_vm7, %v4573_v0, %v5777_v60  ;;  %v1758_v36 = vsel %vm1757_vm15, %v5778_v26, %v1754_v28 }
 0x45b   : > { %v1760_v57 = vsel %vm1757_vm15, %v1754_v28, %v5778_v26  ;;  %v1766_v14 = vmul.f32 %v4885_v33, %v1758_v36  ;;  %v1702_v8 = vadd.f32 %v1698_v32, %v1670_v3  ;;  %v4930_v0 = vsel %vm4895_vm11, 1.0, %v5616_v17  ;;  %vm1872_vm11 = vmand %vm4834_vm5, %vm193_vm10 }
 0x45c   : > { %v1767_v44 = vmul.f32 %v4888_v16, %v1760_v57  ;;  %v1703_v61 = vadd.f32 %v1699_v35, %v1671_v24  ;;  %5779 = vst [vmem:[#allocation65_spill] sm:$0xff] %v4930_v0  ;;  %v4933_v60 = vsel %vm1800_vm2, 1.0, %v5616_v17  ;;  %vm1866_vm6 = vcmp.lt.s32.totalorder %v3304_v45, 95  ;;  %v5784_v24 = vld [vmem:[#allocation58_spill] sm:$0xff]  ;;  %v1791_v22 = vpop.permute.xlu1 %1790  ;;  %v5806_v16 = vld [vmem:[#allocation68_spill] sm:$0xff] }
 0x45d   : > { %5780 = vst [vmem:[#allocation81_spill] sm:$0xff] %v4933_v60  ;;  %vm5781_vm9 = vcmp.lt.s32.totalorder %v5668_v53, 15  ;;  %v1778_v32 = vmul.f32 %v5784_v24, %v1766_v14  ;;  %v1739_v28 = vadd.f32 %v1735_v6, %v1702_v8  ;;  %v1838_v36 = vmul.f32 %v4864_v41, %v1832_v21  ;;  %v4960_v6 = vpop.permute.xlu0 %1508 }
 0x45e   : > { %vm4940_vm8 = vmand %vm4824_vm14, %vm5781_vm9  ;;  %v1779_v35 = vmul.f32 %v5784_v24, %v1767_v44  ;;  %v1740_v26 = vadd.f32 %v1736_v37, %v1703_v61  ;;  %v1839_v57 = vmul.f32 %v4878_v49, %v1834_v63  ;;  %v1795_v53 = vsel %vm1794_vm1, %v5785_v43, %v1791_v22  ;;  %v2834_v61 = vld [vmem:[#allocation5 + $0x10] sm:$0xff] }
 0x45f   : > { %v1797_v14 = vsel %vm1794_vm1, %v1791_v22, %v5785_v43  ;;  %v1803_v44 = vmul.f32 %v4930_v0, %v1795_v53  ;;  %v1782_v56 = vadd.f32 %v1778_v32, %v1739_v28  ;;  %1937 = vperm.xlu1 %2820, %v2834_v61   ;;  %v4965_v37 = vsel %vm4940_vm8, 1.0, %v5616_v17  ;;  %v5788_v63 = vld [vmem:[#allocation59_spill] sm:$0xff]  ;;  %v5789_v22 = vld [vmem:[#allocation61_spill] sm:$0xff]  ;;  %v5790_v28 = vld [vmem:[#allocation76_spill] sm:$0xff] }
 0x460   : > { %v1804_v24 = vmul.f32 %v4933_v60, %v1797_v14  ;;  %v1783_v42 = vadd.f32 %v1779_v35, %v1740_v26  ;;  %5786 = vst [vmem:[#allocation73_spill] sm:$0xff] %v4965_v37  ;;  %v4968_v21 = vsel %vm1872_vm11, 1.0, %v5616_v17  ;;  %v1863_v8 = vpop.permute.xlu1 %1862  ;;  %v1850_v32 = vmul.f32 %v5789_v22, %v1838_v36  ;;  %v5791_v36 = vld [vmem:[#allocation64_spill] sm:$0xff] }
 0x461   : > { %5787 = vst [vmem:[#allocation13_spill] sm:$0xff] %v4968_v21  ;;  %v1815_v43 = vmul.f32 %v5788_v63, %v1803_v44  ;;  %v1851_v35 = vmul.f32 %v5789_v22, %v1839_v57  ;;  %v1867_v26 = vsel %vm1866_vm6, %v5790_v28, %v1863_v8  ;;  %v1869_v3 = vsel %vm1866_vm6, %v1863_v8, %v5790_v28  ;;  %v4984_v0 = vpop.permute.xlu0 %1575 }
 0x462   : > { %v1816_v53 = vmul.f32 %v5788_v63, %v1804_v24  ;;  %v1875_v14 = vmul.f32 %v4965_v37, %v1867_v26  ;;  %v1876_v61 = vmul.f32 %v4968_v21, %v1869_v3  ;;  %v2835_v24 = vld [vmem:[#allocation5] sm:$0xf]  ;;  %v3053_v49 = vmov 41   ;;  %v5804_v37 = vld [vmem:[#allocation78_spill] sm:$0xff] }
 0x463   : > { %v1819_v44 = vadd.f32 %v1815_v43, %v1782_v56  ;;  %1952 = vrot.lane.b32.xlu1 %v2835_v24, %s3052_s20  ;;  %v3054_v56 = vmov 99   ;;  %v5794_v26 = vmov 0   ;;  %vm5801_vm10 = vcmp.lt.s32.totalorder %v3304_v45, 34  ;;  %v5803_v21 = vld [vmem:[#allocation77_spill] sm:$0xff] }
 0x464   : > { %v1820_v17 = vadd.f32 %v1816_v53, %v1783_v42  ;;  %v1887_v63 = vmul.f32 %v5791_v36, %v1875_v14  ;;  %v1888_v57 = vmul.f32 %v5791_v36, %v1876_v61  ;;  %v1077_v22 = vpop.permute.xlu1 %1076  ;;  %2822 = vset.pattern.permute.xlu1 %v3053_v49  ;;  %2823 = vset.pattern.permute.xlu0 %v3054_v56  ;;  %vm5802_vm2 = vmmov %vm5801_vm10  ;;  %vm5807_vm9 = vcmp.lt.s32.totalorder %v3304_v45, 33 }
 0x465   : > { %v1854_v41 = vadd.f32 %v1850_v32, %v1819_v44  ;;  %1949 = vperm.xlu0 %2823, %v2835_v24   ;;  %v4990_v43 = vpop.permute.xlu0 %1612  ;;  %vm5820_vm8 = vcmp.lt.s32.totalorder %v3304_v45, 15 }
 0x466   : > { %v1855_v60 = vadd.f32 %v1851_v35, %v1820_v17  ;;  %vm5821_vm11 = vmmov %vm5820_vm8 }
 0x467   : > { %v4986_v8 = vadd.f32 %v1887_v63, %v1854_v41  ;;  %874 = vperm.xlu1 %2822, %v2835_v24  }
 0x468   : > { %v4988_v28 = vadd.f32 %v1888_v57, %v1855_v60  ;;  %v1110_v42 = vpop.permute.xlu1 %1109 }
 0x469   : > { %5792 = vst [vmem:[#allocation47_spill] sm:$0xff] %v4986_v8  ;;  %2824 = vset.pattern.permute.xlu0 %v5794_v26  ;;  %v4993_v49 = vpop.permute.xlu0 %1676 }
 0x46a   : > { %5793 = vst [vmem:[#allocation49_spill] sm:$0xff] %v4988_v28  ;;  %5795 = vst [vmem:[#allocation72_spill] sm:$0xff] %v4993_v49 }
 0x46c   : > { %v1147_v53 = vpop.permute.xlu1 %1146 }
 0x46d   : > { %v4995_v32 = vpop.permute.xlu0 %1708 }
 0x46e   : > { %5796 = vst [vmem:[#allocation22_spill] sm:$0xff] %v4995_v32 }
 0x470   : > { %v1256_v3 = vpop.permute.xlu1 %1255 }
 0x471   : > { %v4999_v60 = vpop.permute.xlu0 %1788 }
 0x472   : > { %5797 = vst [vmem:[#allocation52_spill] sm:$0xff] %v4999_v60 }
 0x474   : > { %v1357_v17 = vpop.permute.xlu1 %1356 }
 0x475   : > { %v5005_v61 = vpop.permute.xlu0 %1825 }
 0x476   : > { %5798 = vst [vmem:[#allocation12_spill] sm:$0xff] %v5005_v61 }
 0x478   : > { %v4997_v41 = vpop.permute.xlu1 %1460 }
 0x479   : > { %v1151_v24 = vpop.permute.xlu0 %1150 }
 0x47a   : > { %v1154_v63 = vsel %vm1152_vm13, %v1147_v53, %v1151_v24  ;;  %v1156_v57 = vsel %vm1152_vm13, %v1151_v24, %v1147_v53  ;;  %vm5808_vm13 = vmmov %vm5807_vm9 }
 0x47b   : > { %v1161_v61 = vmul.f32 %v5803_v21, %v1156_v57  ;;  %v1162_v60 = vmul.f32 %v5804_v37, %v1154_v63  ;;  %v5813_v63 = vld [vmem:[#allocation26_spill] sm:$0xff] }
 0x47c   : > { %v5001_v35 = vpop.permute.xlu1 %1540 }
 0x47d   : > { %v1260_v28 = vpop.permute.xlu0 %1259 }
 0x480   : > { %v5003_v14 = vpop.permute.xlu1 %1644 }
 0x481   : > { %v5031_v37 = vpop.permute.xlu0 %1897 }
 0x484   : > { %v5007_v44 = vpop.permute.xlu1 %1751 }
 0x485   : > { %5799 = vst [vmem:[#allocation55_spill] sm:$0xff] %v5007_v44  ;;  %v5809_v44 = vld [vmem:[#allocation69_spill] sm:$0xff] }
 0x488   : > { %v5009_v36 = vpop.permute.xlu1 %1860 }
 0x489   : > { %5800 = vst [vmem:[#allocation53_spill] sm:$0xff] %v5009_v36 }
 0x48c   : > { %v1081_v56 = vpop.permute.xlu1 %1080 }
 0x48d   : > { %v1084_v26 = vsel %vm5801_vm10, %v1077_v22, %v1081_v56  ;;  %v1086_v8 = vsel %vm5802_vm2, %v1081_v56, %v1077_v22  ;;  %v5811_v56 = vld [vmem:[#allocation29_spill] sm:$0xff]  ;;  %vm5824_vm10 = vcmp.lt.s32.totalorder %v3304_v45, 17 }
 0x48e   : > { %v1093_v36 = vmul.f32 %v5805_v2, %v1086_v8  ;;  %v1094_v33 = vmul.f32 %v5806_v16, %v1084_v26  ;;  %v1173_v49 = vmul.f32 %v5811_v56, %v1161_v61  ;;  %v1174_v21 = vmul.f32 %v5811_v56, %v1162_v60  ;;  %v5812_v2 = vld [vmem:[#allocation27_spill] sm:$0xff]  ;;  %vm5825_vm2 = vmmov %vm5824_vm10 }
 0x490   : > { %v1114_v32 = vpop.permute.xlu1 %1113  ;;  %v1105_v8 = vmul.f32 %v5812_v2, %v1093_v36  ;;  %v1106_v16 = vmul.f32 %v5812_v2, %v1094_v33 }
 0x491   : > { %v1117_v53 = vsel %vm5807_vm9, %v1110_v42, %v1114_v32  ;;  %v1119_v24 = vsel %vm5808_vm13, %v1114_v32, %v1110_v42  ;;  %v1263_v42 = vsel %vm1261_vm12, %v1256_v3, %v1260_v28  ;;  %vm5827_vm9 = vcmp.lt.s32.totalorder %v3304_v45, 16 }
 0x492   : > { %v1126_v5 = vmul.f32 %v5809_v44, %v1119_v24  ;;  %v1127_v22 = vmul.f32 %v5810_v7, %v1117_v53  ;;  %v1265_v7 = vsel %vm1261_vm12, %v1260_v28, %v1256_v3  ;;  %v5814_v44 = vld [vmem:[#allocation16_spill] sm:$0xff]  ;;  %vm5828_vm13 = vmmov %vm5827_vm9 }
 0x493   : > { %v1272_v2 = vmul.f32 %v4562_v62, %v1265_v7 }
 0x494   : > { %v1138_v57 = vmul.f32 %v5813_v63, %v1126_v5  ;;  %v1139_v26 = vmul.f32 %v5813_v63, %v1127_v22  ;;  %v1186_v38 = vpop.permute.xlu1 %1185  ;;  %v5815_v22 = vld [vmem:[#allocation28_spill] sm:$0xff]  ;;  %v1273_v63 = vmul.f32 %v4565_v55, %v1263_v42  ;;  %v5822_v42 = vld [vmem:[#allocation31_spill] sm:$0xff] }
 0x495   : > { %v1189_v32 = vsel %vm1187_vm3, %v4608_v11, %v1186_v38  ;;  %v1191_v60 = vsel %vm1187_vm3, %v1186_v38, %v4608_v11  ;;  %vm5816_vm3 = vcmp.lt.s32.totalorder %v3304_v45, 30  ;;  %v1361_v38 = vpop.permute.xlu0 %1360 }
 0x496   : > { %v1142_v33 = vadd.f32 %v1138_v57, %v1105_v8  ;;  %v1143_v61 = vadd.f32 %v1139_v26, %v1106_v16  ;;  %v1198_v5 = vmul.f32 %v4529_v40, %v1191_v60  ;;  %v1199_v36 = vmul.f32 %v5814_v44, %v1189_v32  ;;  %vm5817_vm12 = vmmov %vm5816_vm3  ;;  %v5819_v8 = vld [vmem:[#allocation80_spill] sm:$0xff] }
 0x497   : > { %v1363_v57 = vsel %vm5820_vm8, %v1357_v17, %v1361_v38  ;;  %v1365_v62 = vsel %vm5821_vm11, %v1361_v38, %v1357_v17  ;;  %vm5833_vm8 = vcmp.lt.s32.totalorder %v3304_v45, 14 }
 0x498   : > { %v1177_v53 = vadd.f32 %v1173_v49, %v1142_v33  ;;  %v1178_v24 = vadd.f32 %v1174_v21, %v1143_v61  ;;  %v1210_v56 = vmul.f32 %v5815_v22, %v1198_v5  ;;  %v1211_v28 = vmul.f32 %v5815_v22, %v1199_v36  ;;  %v1223_v3 = vpop.permute.xlu1 %1222  ;;  %v5818_v49 = vld [vmem:[#allocation79_spill] sm:$0xff]  ;;  %v5823_v33 = vld [vmem:[#allocation36_spill] sm:$0xff]  ;;  %vm5834_vm11 = vmmov %vm5833_vm8 }
 0x499   : > { %v1226_v11 = vsel %vm5816_vm3, %v4683_v46, %v1223_v3  ;;  %v1228_v40 = vsel %vm5817_vm12, %v1223_v3, %v4683_v46  ;;  %v1284_v46 = vmul.f32 %v5823_v33, %v1272_v2  ;;  %v1285_v61 = vmul.f32 %v5823_v33, %v1273_v63  ;;  %v5826_v2 = vld [vmem:[#allocation32_spill] sm:$0xff] }
 0x49a   : > { %v1235_v21 = vmul.f32 %v5818_v49, %v1228_v40  ;;  %v1236_v16 = vmul.f32 %v5819_v8, %v1226_v11  ;;  %v1214_v55 = vadd.f32 %v1210_v56, %v1177_v53  ;;  %v1215_v26 = vadd.f32 %v1211_v28, %v1178_v24 }
 0x49b   : > { %v1368_v22 = vmul.f32 %v1365_v62, %v3404_v18  ;;  %v1369_v56 = vmul.f32 %v1363_v57, %v3407_v19  ;;  %v5829_v19 = vld [vmem:[#allocation34_spill] sm:$0xff]  ;;  %v5830_v57 = vld [vmem:[#allocation35_spill] sm:$0xff]  ;;  %vm5831_vm3 = vcmp.lt.s32.totalorder %v3304_v45, 1 }
 0x49c   : > { %v1247_v7 = vmul.f32 %v5822_v42, %v1235_v21  ;;  %v1248_v32 = vmul.f32 %v5822_v42, %v1236_v16  ;;  %v1297_v60 = vpop.permute.xlu1 %1296  ;;  %v1465_v21 = vpop.permute.xlu0 %1464  ;;  %vm5832_vm12 = vmmov %vm5831_vm3 }
 0x49d   : > { %v1299_v5 = vsel %vm5824_vm10, %v4736_v27, %v1297_v60  ;;  %v1301_v44 = vsel %vm5825_vm2, %v1297_v60, %v4736_v27  ;;  %v1380_v38 = vmul.f32 %v5829_v19, %v1368_v22  ;;  %v1381_v49 = vmul.f32 %v5829_v19, %v1369_v56 }
 0x49e   : > { %v1251_v17 = vadd.f32 %v1247_v7, %v1214_v55  ;;  %v1252_v36 = vadd.f32 %v1248_v32, %v1215_v26  ;;  %v1304_v53 = vmul.f32 %v1301_v44, %v3390_v12  ;;  %v1305_v24 = vmul.f32 %v1299_v5, %v3393_v13  ;;  %v5835_v5 = vld [vmem:[#allocation37_spill] sm:$0xff] }
 0x49f   : > { %vm5836_vm10 = vcmp.lt.s32.totalorder %v3304_v45, 2 }
 0x4a0   : > { %v1288_v28 = vadd.f32 %v1284_v46, %v1251_v17  ;;  %v1289_v3 = vadd.f32 %v1285_v61, %v1252_v36  ;;  %v1316_v63 = vmul.f32 %v5826_v2, %v1304_v53  ;;  %v1317_v11 = vmul.f32 %v5826_v2, %v1305_v24  ;;  %v1329_v40 = vpop.permute.xlu1 %1328  ;;  %vm5837_vm2 = vmmov %vm5836_vm10 }
 0x4a1   : > { %v1331_v27 = vsel %vm5827_vm9, %v4792_v20, %v1329_v40  ;;  %v1333_v12 = vsel %vm5828_vm13, %v1329_v40, %v4792_v20  ;;  %v1467_v20 = vsel %vm5831_vm3, %v4997_v41, %v1465_v21  ;;  %vm5840_vm9 = vcmp.lt.s32.totalorder %v3304_v45, 127 }
 0x4a2   : > { %v1336_v13 = vmul.f32 %v1333_v12, %v3371_v9  ;;  %v1337_v18 = vmul.f32 %v1331_v27, %v3380_v10  ;;  %v1320_v8 = vadd.f32 %v1316_v63, %v1288_v28  ;;  %v1321_v16 = vadd.f32 %v1317_v11, %v1289_v3  ;;  %v5838_v3 = vld [vmem:[#allocation38_spill] sm:$0xff]  ;;  %v5839_v11 = vld [vmem:[#allocation40_spill] sm:$0xff]  ;;  %vm5841_vm13 = vmmov %vm5840_vm9 }
 0x4a3   : > { %v1469_v9 = vsel %vm5832_vm12, %v1465_v21, %v4997_v41  ;;  %v1473_v53 = vmul.f32 %v1467_v20, %v3448_v30  ;;  %vm5848_vm3 = vcmp.lt.s32.totalorder %v3304_v45, 112 }
 0x4a4   : > { %v1348_v62 = vmul.f32 %v5830_v57, %v1336_v13  ;;  %v1349_v55 = vmul.f32 %v5830_v57, %v1337_v18  ;;  %v1393_v26 = vpop.permute.xlu1 %1392  ;;  %v1472_v36 = vmul.f32 %v1469_v9, %v3443_v29  ;;  %vm5850_vm12 = vmmov %vm5848_vm3 }
 0x4a5   : > { %v1396_v10 = vsel %vm5833_vm8, %v4843_v58, %v1393_v26  ;;  %v1398_v42 = vsel %vm5834_vm11, %v1393_v26, %v4843_v58  ;;  %vm5854_vm8 = vcmp.lt.s32.totalorder %v3304_v45, 111 }
 0x4a6   : > { %v1352_v7 = vadd.f32 %v1348_v62, %v1320_v8  ;;  %v1353_v32 = vadd.f32 %v1349_v55, %v1321_v16  ;;  %v1405_v60 = vmul.f32 %v4666_v54, %v1398_v42  ;;  %v1406_v33 = vmul.f32 %v4669_v51, %v1396_v10  ;;  %v1545_v51 = vpop.permute.xlu0 %1544  ;;  %v5842_v8 = vld [vmem:[#allocation45_spill] sm:$0xff]  ;;  %v5843_v16 = vld [vmem:[#allocation39_spill] sm:$0xff]  ;;  %vm5855_vm11 = vmmov %vm5854_vm8 }
 0x4a7   : > { %v1548_v56 = vsel %vm1546_vm4, %v5001_v35, %v1545_v51  ;;  %v1550_v29 = vsel %vm1546_vm4, %v1545_v51, %v5001_v35  ;;  %v1484_v40 = vmul.f32 %v5839_v11, %v1472_v36  ;;  %v1500_v57 = vmul.f32 %v5843_v16, %v5842_v8  ;;  %v5845_v10 = vld [vmem:[#allocation43_spill] sm:$0xff] }
 0x4a8   : > { %v1384_v46 = vadd.f32 %v1380_v38, %v1352_v7  ;;  %v1385_v61 = vadd.f32 %v1381_v49, %v1353_v32  ;;  %v1417_v44 = vmul.f32 %v5835_v5, %v1405_v60  ;;  %v1418_v41 = vmul.f32 %v5835_v5, %v1406_v33  ;;  %v1430_v17 = vpop.permute.xlu1 %1429 }
 0x4a9   : > { %v1433_v58 = vsel %vm5836_vm10, %v4915_v39, %v1430_v17  ;;  %v1435_v54 = vsel %vm5837_vm2, %v1430_v17, %v4915_v39  ;;  %v1555_v19 = vmul.f32 %v4709_v48, %v1548_v56  ;;  %v1556_v38 = vmul.f32 %v4743_v1, %v1550_v29  ;;  %v5844_v1 = vld [vmem:[#allocation41_spill] sm:$0xff]  ;;  %v5852_v29 = vld [vmem:[#allocation23_spill] sm:$0xff] }
 0x4aa   : > { %v1440_v24 = vmul.f32 %v4601_v31, %v1435_v54  ;;  %v1441_v22 = vmul.f32 %v4606_v59, %v1433_v58  ;;  %v1421_v30 = vadd.f32 %v1417_v44, %v1384_v46  ;;  %v1422_v28 = vadd.f32 %v1418_v41, %v1385_v61  ;;  %v1649_v9 = vpop.permute.xlu0 %1648 }
 0x4ab   : > { %v1485_v31 = vmul.f32 %v5839_v11, %v1473_v53  ;;  %v1501_v62 = vmul.f32 %v5843_v16, %v4286_v15  ;;  %v1567_v42 = vmul.f32 %v5845_v10, %v1555_v19  ;;  %v1568_v15 = vmul.f32 %v5845_v10, %v1556_v38  ;;  %v5860_v38 = vld [vmem:[#allocation51_spill] sm:$0xff]  ;;  %v5861_v16 = vld [vmem:[#allocation22_spill] sm:$0xff] }
 0x4ac   : > { %v1452_v2 = vmul.f32 %v5838_v3, %v1440_v24  ;;  %v1453_v63 = vmul.f32 %v5838_v3, %v1441_v22  ;;  %v1513_v39 = vpop.permute.xlu1 %1512  ;;  %vm5846_vm4 = vcmp.lt.s32.totalorder %v3304_v45, 113  ;;  %v5851_v24 = vld [vmem:[#allocation48_spill] sm:$0xff]  ;;  %vm5862_vm10 = vcmp.lt.s32.totalorder %v3304_v45, 110  ;;  %v5867_v10 = vld [vmem:[#allocation18_spill] sm:$0xff] }
 0x4ad   : > { %v1515_v59 = vsel %vm5840_vm9, %v4960_v6, %v1513_v39  ;;  %v1517_v27 = vsel %vm5841_vm13, %v1513_v39, %v4960_v6  ;;  %vm5863_vm2 = vmmov %vm5862_vm10 }
 0x4ae   : > { %v1456_v35 = vadd.f32 %v1452_v2, %v1421_v30  ;;  %v1457_v12 = vadd.f32 %v1453_v63, %v1422_v28  ;;  %v1520_v13 = vmul.f32 %v1515_v59, %v3496_v47  ;;  %v1521_v18 = vmul.f32 %v1517_v27, %v3501_v52  ;;  %v5163_v36 = vpop.permute.xlu0 %1917  ;;  %v5853_v2 = vld [vmem:[#allocation72_spill] sm:$0xff]  ;;  %v5857_v59 = vld [vmem:[#allocation25_spill] sm:$0xff] }
 0x4b0   : > { %v1488_v49 = vadd.f32 %v1484_v40, %v1456_v35  ;;  %v1489_v21 = vadd.f32 %v1485_v31, %v1457_v12  ;;  %v1580_v55 = vpop.permute.xlu1 %1579  ;;  %v1532_v26 = vmul.f32 %v5844_v1, %v1520_v13  ;;  %v1533_v20 = vmul.f32 %v5844_v1, %v1521_v18  ;;  %v5856_v40 = vld [vmem:[#allocation24_spill] sm:$0xff]  ;;  %v5858_v35 = vld [vmem:[#allocation50_spill] sm:$0xff]  ;;  %v5859_v12 = vld [vmem:[#allocation55_spill] sm:$0xff] }
 0x4b1   : > { %v1583_v6 = vsel %vm1581_vm0, %v4984_v0, %v1580_v55  ;;  %v1585_v47 = vsel %vm1581_vm0, %v1580_v55, %v4984_v0  ;;  %vm5847_vm0 = vmmov %vm5846_vm4  ;;  %v5864_v55 = vld [vmem:[#allocation21_spill] sm:$0xff] }
 0x4b2   : > { %v1504_v52 = vadd.f32 %v1500_v57, %v1488_v49  ;;  %v1505_v48 = vadd.f32 %v1501_v62, %v1489_v21  ;;  %v1592_v60 = vmul.f32 %v4783_v50, %v1583_v6  ;;  %v1593_v33 = vmul.f32 %v4786_v25, %v1585_v47  ;;  %v5849_v25 = vld [vmem:[#allocation44_spill] sm:$0xff]  ;;  %v1756_v3 = vpop.permute.xlu0 %1755 }
 0x4b3   : > { %v1651_v50 = vsel %vm5848_vm3, %v5003_v14, %v1649_v9  ;;  %v1759_v13 = vsel %vm1757_vm15, %v5859_v12, %v1756_v3  ;;  %v1761_v19 = vsel %vm1757_vm15, %v1756_v3, %v5859_v12  ;;  %v5880_v3 = vld [vmem:[#allocation15_spill] sm:$0xff] }
 0x4b4   : > { %v1536_v7 = vadd.f32 %v1532_v26, %v1504_v52  ;;  %v1537_v32 = vadd.f32 %v1533_v20, %v1505_v48  ;;  %v1617_v46 = vpop.permute.xlu1 %1616  ;;  %v1604_v53 = vmul.f32 %v5849_v25, %v1592_v60  ;;  %v1605_v58 = vmul.f32 %v5849_v25, %v1593_v33  ;;  %v5865_v48 = vld [vmem:[#allocation46_spill] sm:$0xff]  ;;  %v5866_v20 = vld [vmem:[#allocation17_spill] sm:$0xff] }
 0x4b5   : > { %v1619_v0 = vsel %vm5846_vm4, %v4990_v43, %v1617_v46  ;;  %v1621_v61 = vsel %vm5847_vm0, %v1617_v46, %v4990_v43  ;;  %v1653_v43 = vsel %vm5850_vm12, %v1649_v9, %v5003_v14  ;;  %v1656_v56 = vmul.f32 %v1651_v50, %v5756_v34  ;;  %v5869_v46 = vld [vmem:[#allocation54_spill] sm:$0xff]  ;;  %v5872_v25 = vld [vmem:[#allocation65_spill] sm:$0xff] }
 0x4b6   : > { %v1571_v5 = vadd.f32 %v1567_v42, %v1536_v7  ;;  %v1572_v44 = vadd.f32 %v1568_v15, %v1537_v32  ;;  %v1624_v41 = vmul.f32 %v1619_v0, %v5738_v4  ;;  %v1625_v17 = vmul.f32 %v1621_v61, %v5739_v23  ;;  %v1865_v26 = vpop.permute.xlu0 %1864  ;;  %v5868_v15 = vld [vmem:[#allocation53_spill] sm:$0xff] }
 0x4b7   : > { %v1657_v30 = vmul.f32 %v1653_v43, %v5852_v29  ;;  %v1668_v34 = vmul.f32 %v5858_v35, %v1656_v56  ;;  %v1768_v6 = vmul.f32 %v5864_v55, %v1759_v13  ;;  %v1769_v1 = vmul.f32 %v5865_v48, %v1761_v19 }
 0x4b8   : > { %v5170_v54 = vpop.permute.xlu1 %1895  ;;  %v1608_v51 = vadd.f32 %v1604_v53, %v1571_v5  ;;  %v1609_v4 = vadd.f32 %v1605_v58, %v1572_v44  ;;  %v1636_v23 = vmul.f32 %v5851_v24, %v1624_v41  ;;  %v1637_v22 = vmul.f32 %v5851_v24, %v1625_v17  ;;  %v5870_v5 = vld [vmem:[#allocation52_spill] sm:$0xff]  ;;  %v5873_v58 = vld [vmem:[#allocation81_spill] sm:$0xff]  ;;  %v5874_v24 = vld [vmem:[#allocation14_spill] sm:$0xff] }
 0x4b9   : > { %v1669_v18 = vmul.f32 %v5858_v35, %v1657_v30  ;;  %v1868_v7 = vsel %vm1866_vm6, %v5868_v15, %v1865_v26  ;;  %v5871_v17 = vld [vmem:[#allocation56_spill] sm:$0xff]  ;;  %vm5875_vm15 = vcmp.lt.s32.totalorder %v5874_v24, 14  ;;  %v5879_v30 = vld [vmem:[#allocation73_spill] sm:$0xff]  ;;  %vm5881_vm13 = vcmp.lt.s32.totalorder %v5880_v3, 14 }
 0x4ba   : > { %v1640_v39 = vadd.f32 %v1636_v23, %v1608_v51  ;;  %v1641_v11 = vadd.f32 %v1637_v22, %v1609_v4  ;;  %v1780_v50 = vmul.f32 %v5871_v17, %v1768_v6  ;;  %v1781_v51 = vmul.f32 %v5871_v17, %v1769_v1  ;;  %vm5229_vm9 = vmand %vm4824_vm14, %vm5875_vm15  ;;  %v1900_v13 = vpop.permute.xlu0 %1899 }
 0x4bb   : > { %v1870_v4 = vsel %vm1866_vm6, %v1865_v26, %v5868_v15  ;;  %vm1909_vm4 = vmand %vm4834_vm5, %vm5881_vm13  ;;  %v5890_v26 = vld [vmem:[#allocation62_spill] sm:$0xff]  ;;  %vm5896_vm5 = vcmask 130048   ;;  %vm5897_vm14 = vcmask 1043456   ;;  %vm5906_vm15 = vcmask 31744  }
 0x4bc   : > { %v1681_v28 = vpop.permute.xlu1 %1680  ;;  %v1672_v47 = vadd.f32 %v1668_v34, %v1640_v39  ;;  %v1673_v52 = vadd.f32 %v1669_v18, %v1641_v11  ;;  %v5885_v34 = vld [vmem:[#allocation13_spill] sm:$0xff]  ;;  %v5886_v18 = vld [vmem:[#allocation42_spill] sm:$0xff]  ;;  %vm2260_vm13 = vcmask 64512  }
 0x4bd   : > { %v1683_v63 = vsel %vm5854_vm8, %v5853_v2, %v1681_v28  ;;  %v1685_v14 = vsel %vm5855_vm11, %v1681_v28, %v5853_v2  ;;  %v1877_v28 = vmul.f32 %v5879_v30, %v1868_v7  ;;  %v1878_v12 = vmul.f32 %v5885_v34, %v1870_v4  ;;  %v5894_v2 = vld [vmem:[#allocation33_spill] sm:$0xff] }
 0x4be   : > { %v1688_v31 = vmul.f32 %v1683_v63, %v5856_v40  ;;  %v1689_v27 = vmul.f32 %v1685_v14, %v5857_v59  ;;  %v5883_v63 = vld [vmem:[#allocation57_spill] sm:$0xff]  ;;  %v5884_v59 = vld [vmem:[#allocation12_spill] sm:$0xff] }
 0x4c0   : > { %v1700_v49 = vmul.f32 %v5860_v38, %v1688_v31  ;;  %v1701_v21 = vmul.f32 %v5860_v38, %v1689_v27  ;;  %v1713_v8 = vpop.permute.xlu1 %1712  ;;  %v5887_v38 = vld [vmem:[#allocation20_spill] sm:$0xff] }
 0x4c1   : > { %v1716_v57 = vsel %vm5862_vm10, %v5861_v16, %v1713_v8  ;;  %v1718_v62 = vsel %vm5863_vm2, %v1713_v8, %v5861_v16  ;;  %vm3058_vm10 = vmmov 0  }
 0x4c2   : > { %v1725_v9 = vmul.f32 %v5866_v20, %v1716_v57  ;;  %v1726_v42 = vmul.f32 %v5867_v10, %v1718_v62  ;;  %v1704_v32 = vadd.f32 %v1700_v49, %v1672_v47  ;;  %v1705_v60 = vadd.f32 %v1701_v21, %v1673_v52  ;;  %v5889_v47 = vld [vmem:[#allocation60_spill] sm:$0xff] }
 0x4c3   : > { %v5888_v21 = vmov 0.0   ;;  %v1889_v20 = vmul.f32 %v5890_v26, %v1877_v28 }
 0x4c4   : > { %v1793_v33 = vpop.permute.xlu1 %1792  ;;  %v1737_v0 = vmul.f32 %v5869_v46, %v1725_v9  ;;  %v1738_v61 = vmul.f32 %v5869_v46, %v1726_v42  ;;  %v1910_v8 = vsel %vm5229_vm9, 1.0, %v5888_v21  ;;  %v1911_v16 = vsel %vm1909_vm4, 1.0, %v5888_v21  ;;  %2579 = vmatprep.mubr.msk.f32.mxu1 %vm3058_vm10, %v5888_v21 }
 0x4c5   : > { %v1796_v44 = vsel %vm1794_vm1, %v5870_v5, %v1793_v33  ;;  %v1798_v41 = vsel %vm1794_vm1, %v1793_v33, %v5870_v5  ;;  %vm1903_vm1 = vcmp.lt.s32.totalorder %v3304_v45, 94  ;;  %v1890_v42 = vmul.f32 %v5890_v26, %v1878_v12  ;;  %v5892_v45 = vld [vmem:[#allocation49_spill] sm:$0xff] }
 0x4c6   : > { %v1805_v53 = vmul.f32 %v5872_v25, %v1796_v44  ;;  %v1806_v43 = vmul.f32 %v5873_v58, %v1798_v41  ;;  %v1741_v56 = vadd.f32 %v1737_v0, %v1704_v32  ;;  %v1742_v29 = vadd.f32 %v1738_v61, %v1705_v60  ;;  %v5891_v44 = vld [vmem:[#allocation63_spill] sm:$0xff] }
 0x4c7   : > { %v1904_v57 = vsel %vm1903_vm1, %v5170_v54, %v1900_v13  ;;  %v1906_v62 = vsel %vm1903_vm1, %v1900_v13, %v5170_v54  ;;  %v5893_v25 = vld [vmem:[#allocation47_spill] sm:$0xff] }
 0x4c8   : > { %v1817_v14 = vmul.f32 %v5883_v63, %v1805_v53  ;;  %v1818_v39 = vmul.f32 %v5883_v63, %v1806_v43  ;;  %v1830_v11 = vpop.permute.xlu1 %1829  ;;  %v1784_v40 = vadd.f32 %v1780_v50, %v1741_v56  ;;  %v1785_v31 = vadd.f32 %v1781_v51, %v1742_v29  ;;  %v1934_v50 = vpop.permute.xlu0 %1933 }
 0x4c9   : > { %v1833_v27 = vsel %vm1831_vm7, %v5884_v59, %v1830_v11  ;;  %v1835_v35 = vsel %vm1831_vm7, %v1830_v11, %v5884_v59  ;;  %v1913_v54 = vmul.f32 %v1911_v16, %v1906_v62  ;;  %v1912_v32 = vmul.f32 %v1910_v8, %v1904_v57  ;;  %vm5898_vm7 = vmmov %vm5897_vm14  ;;  %v5288_v59 = vld [vmem:[#allocation5] sm:$0xff] }
 0x4ca   : > { %v1840_v19 = vmul.f32 %v5886_v18, %v1833_v27  ;;  %v1841_v49 = vmul.f32 %v5887_v38, %v1835_v35  ;;  %v1821_v55 = vadd.f32 %v1817_v14, %v1784_v40  ;;  %v1822_v6 = vadd.f32 %v1818_v39, %v1785_v31  ;;  %v5895_v14 = vld [vmem:[#allocation30_spill] sm:$0xff]  ;;  %vm5899_vm6 = vmmov %vm5898_vm7 }
 0x4cb   : > { %v1925_v61 = vmul.f32 %v5163_v36, %v1913_v54  ;;  %v1924_v5 = vmul.f32 %v5163_v36, %v1912_v32  ;;  %v2086_v27 = vrot.slane %v5288_v59, 4  ;;  %vm5900_vm0 = vmmov %vm5899_vm6 }
 0x4cc   : > { %v1852_v52 = vmul.f32 %v5889_v47, %v1840_v19  ;;  %v1853_v48 = vmul.f32 %v5889_v47, %v1841_v49  ;;  %v1902_v1 = vpop.permute.xlu1 %1901  ;;  %vm5901_vm3 = vmmov %vm5900_vm0 }
 0x4cd   : > { %v1905_v9 = vsel %vm1903_vm1, %v5031_v37, %v1902_v1  ;;  %v1907_v10 = vsel %vm1903_vm1, %v1902_v1, %v5031_v37  ;;  %v1929_v37 = vadd.f32 %v1925_v61, %v5892_v45  ;;  %v1928_v53 = vadd.f32 %v1924_v5, %v5893_v25  ;;  %vm5902_vm12 = vmmov %vm5900_vm0 }
 0x4ce   : > { %v1856_v15 = vadd.f32 %v1852_v52, %v1821_v55  ;;  %v1857_v7 = vadd.f32 %v1853_v48, %v1822_v6  ;;  %v1914_v60 = vmul.f32 %v1910_v8, %v1905_v9  ;;  %v1915_v33 = vmul.f32 %v1911_v16, %v1907_v10  ;;  %vm5903_vm8 = vmmov %vm5900_vm0 }
 0x4cf   : > { %v1941_v4 = vadd.f32 %v1934_v50, %v1929_v37  ;;  %v1940_v22 = vadd.f32 %v1934_v50, %v1928_v53  ;;  %vm5904_vm11 = vmmov %vm5900_vm0 }
 0x4d0   : > { %v1893_v46 = vadd.f32 %v1889_v20, %v1856_v15  ;;  %v1894_v0 = vadd.f32 %v1890_v42, %v1857_v7  ;;  %v1926_v41 = vmul.f32 %v5891_v44, %v1914_v60  ;;  %v1927_v17 = vmul.f32 %v5891_v44, %v1915_v33  ;;  %vm5905_vm2 = vmmov %vm5900_vm0 }
 0x4d1   : > { %v1945_v36 = vmax.f32 %v1941_v4, 0.0  ;;  %v1944_v28 = vmax.f32 %v1940_v22, 0.0  ;;  %vm5907_vm9 = vmmov %vm5900_vm0 }
 0x4d2   : > { %v1930_v58 = vadd.f32 %v1926_v41, %v1893_v46  ;;  %v1931_v43 = vadd.f32 %v1927_v17, %v1894_v0  ;;  %vm5908_vm1 = vmmov %vm5906_vm15 }
 0x4da   : > { %v1938_v51 = vpop.permute.xlu1 %1937 }
 0x4db   : > { %v1942_v24 = vadd.f32 %v1938_v51, %v1930_v58  ;;  %v1943_v23 = vadd.f32 %v1938_v51, %v1931_v43 }
 0x4dd   : > { %v1946_v56 = vmax.f32 %v1942_v24, 0.0  ;;  %v1947_v29 = vmax.f32 %v1943_v23, 0.0 }
 0x4de   : > { %v1953_v30 = vpop.permute.xlu1 %1952 }
 0x4df   : > { %1984 = vmatprep.subr.mxu0 %v1947_v29 }
 0x4e0   : > { %1985 = vmatpush1.msra.mxu0 %v1946_v56  ;;  %v1950_v35 = vpop.permute.xlu0 %1949 }
 0x4e1   : > { %1986 = vmatprep.subr.mxu0 %v1945_v36 }
 0x4e2   : > { %1987 = vmatpush1.msra.mxu0 %v1944_v28  ;;  %v875_v3 = vpop.permute.xlu1 %874 }
 0x4e3   : > { %v5277_v63 = vadd.f32 %v5894_v2, %v875_v3  ;;  %v5280_v39 = vadd.f32 %v5895_v14, %v875_v3  ;;  %2549 = vmatmul.mubr.msk.f32.vlgmr.msra.gmra.mxu0 %vm5896_vm5, %v1953_v30  ;;  %2572 = vmatprep.subr.mxu0 %v5888_v21 }
 0x4e4   : > { %2574 = vmatprep.mubr.msk.f32.mxu0 %vm3058_vm10, %v5888_v21 }
 0x4e5   : > { %v2027_v11 = vsel %vm5897_vm14, %v5277_v63, 0.0  ;;  %v2028_v40 = vsel %vm5898_vm7, %v5280_v39, 0.0 }
 0x4e6   : > { %v2029_v31 = vadd.f32 %v2028_v40, %v2027_v11 }
 0x4e8   : > { %2030 = vadd.xlane.f32.xlu1 %v2029_v31 }
 0x4f9   : > { %2081 = vrot.lane.b32.xlu1 %v5288_v59, %s5706_s18 }
 0x4fd   : > { %2091 = vrot.lane.b32.xlu1 %v2086_v27, %s3055_s28 }
 0x571   : > { %v2031_v8 = vpop.xlane.xlu1 %2030 }
 0x572   : > { %v2032_v16 = vmul.f32 0.00390625, %v2031_v8 }
 0x574   : > { %v2039_v57 = vsel %vm5901_vm3, %v2032_v16, 0.0 }
 0x575   : > { %v2040_v62 = vrot.slane %v2039_v57, 4  ;;  %v2082_v29 = vpop.permute.xlu1 %2081 }
 0x577   : > { %v2041_v55 = vadd.f32 %v2040_v62, %v2039_v57 }
 0x579   : > { %v2042_v52 = vrot.slane %v2041_v55, 2  ;;  %v2092_v2 = vpop.permute.xlu1 %2091 }
 0x57b   : > { %v2043_v26 = vadd.f32 %v2042_v52, %v2041_v55 }
 0x57d   : > { %v2044_v10 = vrot.slane %v2043_v26, 1 }
 0x57f   : > { %v2045_v15 = vadd.f32 %v2044_v10, %v2043_v26 }
 0x5a3   : > { %v2022_v34 = vpop.f32.mrf.mxu0 }
 0x5a4   : > { %v5293_v12 = vadd.f32 %v2022_v34, %v1950_v35 }
 0x5a5   : > { %v2024_v13 = vpop.f32.mrf.mxu0 }
 0x5a6   : > { %v5295_v18 = vadd.f32 %v2024_v13, %v1950_v35  ;;  %v2033_v19 = vsel %vm5899_vm6, %v5293_v12, 0.0 }
 0x5a8   : > { %v2034_v38 = vsel %vm5900_vm0, %v5295_v18, 0.0 }
 0x5a9   : > { %v2035_v49 = vadd.f32 %v2034_v38, %v2033_v19 }
 0x5ab   : > { %2036 = vadd.xlane.f32.xlu0 %v2035_v49 }
 0x5c1   : > { %2087 = vrot.lane.b32.xlu0 %v2086_v27, %s3056_s3 }
 0x5c5   : > { %2095 = vrot.lane.b32.xlu0 %v5288_v59, %s3057_s4 }
 0x5c9   : > { %2251 = vrot.lane.b32.xlu0 %v5288_v59, %s3042_s27  ;;  %s174_s27 = scalar_lea.vmem [#allocation7], %s5909_s26 }
 0x5ca   : > { %s2449_s17 = sshll.u32 %s174_s27, 4  ;;  %s2450_s17 = int_to_ptr.vmem [resolvable:$true] %s2449_s17 }
 0x5cb   : > { %s2891_s24 = scalar_lea.vmem %s2450_s17, 128 }
 0x5cc   : > { %p2892_p8 = scmp.ne.s32.totalorder %s2450_s17, %s2891_s24 }
 0x5cd   : > { %2257 = vrot.lane.b32.xlu0 %v5288_v59, %s3060_s14 }
 0x5ce   : > { %p2893_p11 = pnand %p2892_p8, %p5911_p3 }
 0x5d0   : > { %p2894_p7 = pneg %p2893_p11 }
 0x634   : > { %v2037_v6 = vpop.xlane.xlu0 %2036 }
 0x635   : > { %v2038_v47 = vmul.f32 0.00390625, %v2037_v6 }
 0x637   : > { %v2046_v48 = vsel %vm5902_vm12, %v2038_v47, 0.0 }
 0x638   : > { %v2047_v1 = vrot.slane %v2046_v48, 4  ;;  %v2088_v36 = vpop.permute.xlu0 %2087 }
 0x63a   : > { %v2048_v20 = vadd.f32 %v2047_v1, %v2046_v48  ;;  %v2333_v48 = vld [vmem:[#allocation5 + $0x8] sm:$0xff] }
 0x63c   : > { %v2049_v9 = vrot.slane %v2048_v20, 2  ;;  %v2096_v27 = vpop.permute.xlu0 %2095 }
 0x63e   : > { %v2050_v42 = vadd.f32 %v2049_v9, %v2048_v20 }
 0x640   : > { %v2051_v54 = vrot.slane %v2050_v42, 1  ;;  %v2252_v49 = vpop.permute.xlu0 %2251 }
 0x642   : > { %v2052_v7 = vadd.f32 %v2051_v54, %v2050_v42 }
 0x644   : > { %v2053_v32 = vadd.f32 %v2052_v7, %v2045_v15  ;;  %v2258_v55 = vpop.permute.xlu0 %2257 }
 0x646   : > { %v2054_v60 = vmul.f32 0.125, %v2053_v32 }
 0x648   : > { %v2056_v33 = vsub.f32 %v2038_v47, %v2054_v60  ;;  %v2055_v46 = vsub.f32 %v2032_v16, %v2054_v60 }
 0x64a   : > { %v2065_v0 = vmul.f32 %v2056_v33, %v2056_v33  ;;  %v2057_v61 = vmul.f32 %v2055_v46, %v2055_v46 }
 0x64c   : > { %v2066_v5 = vsel %vm5903_vm8, %v2065_v0, 0.0  ;;  %v2058_v44 = vsel %vm5904_vm11, %v2057_v61, 0.0  ;;  %v2836_v61 = vld [vmem:[%s3191_s22] sm:$0xff] }
 0x64d   : > { %v2067_v41 = vrot.slane %v2066_v5, 4  ;;  %v2059_v17 = vrot.slane %v2058_v44, 4 }
 0x64f   : > { %v2068_v45 = vadd.f32 %v2067_v41, %v2066_v5  ;;  %v2060_v37 = vadd.f32 %v2059_v17, %v2058_v44  ;;  %v5910_v44 = vld [vmem:[#allocation11_spill] sm:$0xff] }
 0x651   : > { %v2069_v50 = vrot.slane %v2068_v45, 2  ;;  %v2061_v25 = vrot.slane %v2060_v37, 2 }
 0x653   : > { %v2070_v53 = vadd.f32 %v2069_v50, %v2068_v45  ;;  %v2062_v58 = vadd.f32 %v2061_v25, %v2060_v37 }
 0x655   : > { %v2071_v43 = vrot.slane %v2070_v53, 1  ;;  %v2063_v51 = vrot.slane %v2062_v58, 1 }
 0x657   : > { %v2072_v4 = vadd.f32 %v2071_v43, %v2070_v53  ;;  %v2064_v24 = vadd.f32 %v2063_v51, %v2062_v58 }
 0x659   : > { %v2073_v23 = vadd.f32 %v2072_v4, %v2064_v24 }
 0x65b   : > { %v2074_v22 = vmul.f32 0.125, %v2073_v23 }
 0x65d   : > { %v2075_v56 = vadd.f32 1e-05, %v2074_v22 }
 0x65f   : > { %2826 = vrsqrt.f32 %v2075_v56 }
 0x66c   : > { %v2827_v30 = vpop.eup %2826 }
 0x66d   : > { %v2078_v28 = vmul.f32 %v2827_v30, %v2055_v46  ;;  %v2085_v3 = vmul.f32 %v2827_v30, %v2056_v33 }
 0x66f   : > { %v2079_v14 = vmul.f32 %v2078_v28, %v5288_v59  ;;  %v2090_v11 = vmul.f32 %v2088_v36, %v2085_v3 }
 0x671   : > { %v2084_v40 = vadd.f32 %v2082_v29, %v2079_v14  ;;  %v2094_v31 = vadd.f32 %v2092_v2, %v2090_v11 }
 0x673   : > { %2175 = vrot.lane.b32.xlu1 %v2084_v40, %s3056_s3  ;;  %2573 = vmatpush3.msk.msra.mxu0 %vm5905_vm2, %v2094_v31 }
 0x674   : > { %2575 = vmatmul.mubr.msk.f32.vlgmr.msra.gmra.mxu0 %vm5906_vm15, %v2096_v27  ;;  %2582 = vmatprep.subr.mxu0 %v5888_v21 }
 0x675   : > { %2584 = vmatprep.mubr.msk.f32.mxu0 %vm3058_vm10, %v5888_v21 }
 0x677   : > { %2172 = vrot.lane.b32.xlu1 %v5288_v59, %s3059_s5 }
 0x67b   : > { %2255 = vrot.lane.b32.xlu1 %v5288_v59, %s2967_s15  ;;  %s2563_s15 = sshll.u32 %s3099_s13, 7  ;;  %s3062_s13 = smov [#allocation7]  }
 0x67c   : > { %s2447_s19 = scalar_lea.hbm %s5375_s2, %s2563_s15  ;;  %s2895_s7 = sshll.u32 %s3062_s13, 4  ;;  %s2896_s7 = int_to_ptr.vmem [resolvable:$false] %s2895_s7 }
 0x67d   : > { %s2897_s22 = scalar_lea.vmem %s2896_s7, 256  ;;  %p2898_p10 = scmp.lt.s32.totalorder %s2450_s17, %s2896_s7 }
 0x67e   : > { %p2899_p2 = scmp.lt.s32.totalorder %s2897_s22, %s2891_s24 }
 0x67f   : > { %2334 = vrot.lane.b32.xlu1 %v5288_v59, %s3061_s25 }
 0x680   : > { %p2900_p13 = por %p2899_p2, %p2898_p10 }
 0x682   : > { %p2901_p0 = pnand %p2900_p13, %p2894_p7 }
 0x6e5   : > { %v2176_v35 = vpop.permute.xlu1 %2175 }
 0x6e6   : > { %2578 = vmatpush3.msk.msra.mxu1 %vm5907_vm9, %v2176_v35 }
 0x6e7   : > { %2587 = vmatprep.subr.mxu1 %v5888_v21 }
 0x6e9   : > { %v2173_v34 = vpop.permute.xlu1 %2172 }
 0x6ea   : > { %2580 = vmatmul.mubr.msk.f32.vlgmr.msra.gmra.mxu1 %vm5908_vm1, %v2173_v34 }
 0x6eb   : > { %2589 = vmatprep.mubr.msk.f32.mxu1 %vm3058_vm10, %v5888_v21 }
 0x6ed   : > { %v2256_v62 = vpop.permute.xlu1 %2255 }
 0x6f1   : > { %v2335_v47 = vpop.permute.xlu1 %2334 }
 0x734   : > { %v2168_v13 = vpop.f32.mrf.mxu0 }
 0x736   : > { %v2576_v19 = vpop.f32.mrf.mxu0 }
 0x7aa   : > { %v2247_v38 = vpop.f32.mrf.mxu1 }
 0x7ab   : > { %v2248_v8 = vadd.f32 %v2247_v38, %v2168_v13 }
 0x7ac   : > { %v2581_v16 = vpop.f32.mrf.mxu1 }
 0x7ad   : > { %v2254_v57 = vadd.f32 %v2252_v49, %v2248_v8 }
 0x7af   : > { %2583 = vmatpush3.msra.mxu0 %v2254_v57 }
 0x7b0   : > { %2585 = vmatmul.mubr.msk.f32.vlgmr.msra.gmra.mxu0 %vm2260_vm13, %v2256_v62 }
 0x870   : > { %v2329_v6 = vpop.f32.mrf.mxu0 }
 0x871   : > { %v2330_v21 = vadd.f32 %v2329_v6, %v2258_v55 }
 0x872   : > { %v2586_v52 = vpop.f32.mrf.mxu0 }
 0x873   : > { %2588 = vmatpush3.msra.mxu1 %v2330_v21 }
 0x874   : > { %2590 = vmatmul.mubr.msk.f32.vlgmr.msra.gmra.mxu1 %vm2260_vm13, %v2335_v47 }
 0x934   : > { %v2404_v59 = vpop.f32.mrf.mxu1 }
 0x935   : > { %v2405_v1 = vadd.f32 %v2404_v59, %v2333_v48 }
 0x936   : > { %v2591_v26 = vpop.f32.mrf.mxu1 }
 0x937   : > { %v2556_v20 = vmul.f32 -1.442695, %v2405_v1 }
 0x939   : > { %2828 = vpow2.f32 %v2556_v20 }
 0x946   : > { %v2829_v9 = vpop.eup %2828 }
 0x947   : > { %v2411_v10 = vadd.f32 1.0, %v2829_v9 }
 0x949   : > { %2830 = vrcp.f32 %v2411_v10 }
 0x956   : > { %v2831_v42 = vpop.eup %2830 }
 0x957   : > { %2416 = vperm.xlu0 %2824, %v2831_v42  }
 0x9d2   : > { %v2417_v54 = vpop.permute.xlu0 %2416 }
 0x9d3   : > { %v2421_v15 = vrot.slane %v2417_v54, 4  ;;  %v2419_v7 = vmul.f32 %v2417_v54, %v5277_v63  ;;  %v2420_v32 = vmul.f32 %v2417_v54, %v5280_v39 }
 0x9d5   : > { %v2423_v60 = vmul.f32 %v2421_v15, %v5293_v12  ;;  %v2424_v33 = vmul.f32 %v2421_v15, %v5295_v18 }
 0x9d7   : > { %v2425_v46 = vadd.f32 %v2423_v60, %v2419_v7  ;;  %v2426_v0 = vadd.f32 %v2424_v33, %v2420_v32 }
 0x9d9   : > { %v2427_v5 = vadd.f32 %v2836_v61, %v2425_v46  ;;  %v2428_v41 = vadd.f32 %v2426_v0, %v5910_v44 }
 0x9db   : > { %v2431_v17 = vcombine.low %v2427_v5, %v2428_v41 }
 0x9dd   : > { %2433 = vst [vmem:[%s174_s27] sm:$0xff] %v2431_v17 }
 0x9de   : > { %2904 = shalt.err (!%p2901_p0)
}
 0x9df   : > { %s2905_s20 = scalar_lea.hbm %s2447_s19, 128  ;;  %s2909_s3 = scalar_lea.hbm %s5375_s2, 256 }
 0x9e0   : > { %p2906_p5 = scmp.ne.s32.totalorder %s2447_s19, %s2905_s20  ;;  %p2910_p1 = scmp.lt.s32.totalorder %s2447_s19, %s5375_s2 }
 0x9e1   : > { %p2911_p4 = scmp.lt.s32.totalorder %s2909_s3, %s2905_s20 }
 0x9e2   : > { %p2907_p9 = pnand %p2906_p5, %p5911_p3 }
 0x9e3   : > { %p2912_p6 = por %p2911_p4, %p2910_p1 }
 0x9e4   : > { %p2908_p12 = pneg %p2907_p9 }
 0x9e6   : > { %p2913_p8 = pnand %p2912_p6, %p2908_p12 }
 0x9e8   : > { %2916 = shalt.err (!%p2913_p8)
}
 0x9e9   : > { %2598 = dma.vmem_to_hbm [thread:$0]  (%p5911_p3), %s2450_s17, 128, %s2447_s19, %s2435_s23  }
 0x9ea PF: > { %s2461_s14 = sand.u32 1, %s2947_s9   ;;  %p5912_p11 = scmp.ne.s32.totalorder %s5548_s16, 0 }
 0x9eb   : > { %p5913_p7 = scmp.ge.s32.totalorder %s2959_s12, 2  ;;  %s2462_s25 = scalar_lea.sflag [#allocation4], %s2461_s14 }
 0x9ed   : > { %p2609_p10 = pnand %p5913_p7, %p5912_p11 }
 0x9ef   : > { %p2610_p2 = pneg %p2609_p10 }
 0x9f1   : > { %2942 = dma.done.wait (%p2610_p2), %s2462_s25, 128  }
 0x9f2   : > { %2944 = vsyncadd (%p2610_p2), %s2462_s25, 4294967168  ;;  %p16_p13 = scmp.ge.s32.totalorder %s3132_s21, 4   ;;  %s5914_s9 = smov %s2951_s10 }
 0x9f3   : > { %s5915_s10 = smov %s2955_s11  ;;  %s5916_s11 = smov %s3149_s29 }
 0x9f4   : > { %s5917_s12 = smov %s3132_s21  ;;  %18 = sbr.rel (!%p16_p13) target bundleno = 6 (0x6), region = 77 }
 0x9f9   :  { %2467 = vsyncpa [#allocation3], 1 }
 0x9fa   :  { %2469 = vsyncpa [#allocation3 + $0x1], 1 }
 0x9fb   :  { %2470 = vsyncpa [#allocation6], 1 }
 0x9fc   :  { %2471 = vsyncpa [#allocation4], 1 }
 0x9fd   :  { %2473 = vsyncpa [#allocation4 + $0x1], 1 }

</bundles_post_ra>
